<compile_context>
chip_gen: v5e
topology: v5e:2x2
jax: 0.10.0
libtpu: 0.0.40
codegen_flags: <defaults>
</compile_context>

<pallas_src>
import functools

import jax
import jax.numpy as jnp
from jax.experimental import pallas as pl
from jax.experimental.pallas import tpu as pltpu


def _round_up(x, m):
    return (x + m - 1) // m * m


def _convnet_kernel(p1_ref, w1a_ref, w2_ref, b2_ref, out_ref, z_ref, *,
                    wp, m_chunk):
    """Fused conv1 -> conv2 for a block of images; intermediate never leaves VMEM.

    p1_ref : (BN, P_pad, 16)  bf16  conv1 patches on the padded output grid
                                    (cols 0..8 = 3x3 taps, col 9 = interior
                                    indicator carrying bias b1, cols 10..15 = 0;
                                    ring / tail rows are all-zero)
    w1a_ref: (16, 64)         bf16  rows 0..8 = w1 taps (dy*3+dx), row 9 = b1
    w2_ref : (576, 128)       bf16  row = (ey*3 + ex)*64 + cin
    b2_ref : (1, 128)         f32
    out_ref: (BN, M_pad, 128) f32   lane-dense slab; row r of image b is the
                                    output pixel with padded-grid anchor r
    z_ref  : VMEM (BN*P_pad, 64) bf16 scratch -- conv1 output in padded-grid
                                    flat layout (== conv2's zero-padded input)
    """
    bn, p_pad, k1 = p1_ref.shape
    c1 = w1a_ref.shape[1]
    c2 = out_ref.shape[2]
    m_pad = out_ref.shape[1]

    # ---- conv1 (+bias, +zero ring) for the whole block: one MXU matmul ----
    z = jnp.dot(p1_ref[...].reshape(bn * p_pad, k1), w1a_ref[...],
                preferred_element_type=jnp.float32)
    z_ref[...] = z.astype(jnp.bfloat16)          # bf16 intermediate in VMEM

    b2 = b2_ref[...]                              # (1, c2) f32
    for b in range(bn):
        base = b * p_pad
        # Chunk output rows so the f32 accumulator stays in vregs.
        for m0 in range(0, m_pad, m_chunk):
            cur = min(m_chunk, m_pad - m0)
            acc = None
            for ey in range(3):
                for ex in range(3):
                    t = ey * 3 + ex
                    # Contiguous row window of the flat padded intermediate:
                    # anchor r needs z[r + ey*wp + ex].
                    off = base + m0 + ey * wp + ex
                    part = jnp.dot(z_ref[off:off + cur, :],
                                   w2_ref[t * c1:(t + 1) * c1, :],
                                   preferred_element_type=jnp.float32)
                    acc = part if acc is None else acc + part
            out_ref[b, m0:m0 + cur, :] = acc + b2      # f32 bias / epilogue


def convnet_pallas(x_nchw, w1, b1, w2, b2):
    """ConvNet forward: conv1(1->64, 3x3, pad 1) -> conv2(64->128, 3x3, pad 1)."""
    n, cin, h, w = x_nchw.shape
    assert cin == 1
    c1, c2 = w1.shape[-1], w2.shape[-1]
    hp, wp = h + 2, w + 2                       # padded conv1-output grid
    k1 = 16                                     # 9 taps + bias col, padded to 16
    m_pad = _round_up(h * wp, 8)                # anchor rows computed per image
    p_pad = _round_up(m_pad + 2 * wp + 2, 8)    # rows of the padded intermediate

    # ---- conv1 patches on the padded grid (built once; dense 16-wide minor) ----
    xp2 = jnp.pad(x_nchw[:, 0], ((0, 0), (2, 2), (2, 2)))            # (n, h+4, w+4)
    taps = jnp.stack([xp2[:, dy:dy + hp, dx:dx + wp]
                      for dy in range(3) for dx in range(3)], axis=-1)  # (n,hp,wp,9)
    ii = jnp.arange(hp)
    jj = jnp.arange(wp)
    interior = (((ii >= 1) & (ii <= h))[:, None]
                & ((jj >= 1) & (jj <= w))[None, :]).astype(x_nchw.dtype)
    feats = jnp.concatenate(
        [taps, jnp.ones((n, hp, wp, 1), x_nchw.dtype)], axis=-1)     # (n,hp,wp,10)
    feats = feats * interior[None, :, :, None]   # zero ring == conv2 zero padding
    feats = jnp.pad(feats, ((0, 0), (0, 0), (0, 0), (0, k1 - 10)))
    p1 = feats.reshape(n, hp * wp, k1)
    p1 = jnp.pad(p1, ((0, 0), (0, p_pad - hp * wp), (0, 0))).astype(jnp.bfloat16)

    # ---- weights: conv1 taps + b1 folded into (16,64); conv2 as (576,128) ----
    w1a = jnp.concatenate(
        [w1.reshape(9, c1), b1.reshape(1, c1),
         jnp.zeros((k1 - 10, c1), w1.dtype)], axis=0).astype(jnp.bfloat16)
    w2r = w2.reshape(9 * c1, c2).astype(jnp.bfloat16)
    b2r = b2.reshape(1, c2).astype(jnp.float32)

    # ---- batch blocking: <=2 grid steps (both v7x TCs; tiny overhead on v5e/v6e)
    bn = max(1, -(-n // 2))                     # images per grid step
    g = -(-n // bn)                             # number of grid steps (<= 2)
    if bn * g != n:
        p1 = jnp.pad(p1, ((0, bn * g - n), (0, 0), (0, 0)))

    m_chunk = 96 if m_pad % 96 == 0 else min(m_pad, 128)
    kernel = functools.partial(_convnet_kernel, wp=wp, m_chunk=m_chunk)

    y = pl.pallas_call(
        kernel,
        out_shape=jax.ShapeDtypeStruct((bn * g, m_pad, c2), jnp.float32),
        grid=(g,),
        in_specs=[
            pl.BlockSpec((bn, p_pad, k1), lambda i: (i, 0, 0)),
            pl.BlockSpec((k1, c1), lambda i: (0, 0)),
            pl.BlockSpec((9 * c1, c2), lambda i: (0, 0)),
            pl.BlockSpec((1, c2), lambda i: (0, 0)),
        ],
        out_specs=pl.BlockSpec((bn, m_pad, c2), lambda i: (i, 0, 0)),
        scratch_shapes=[pltpu.VMEM((bn * p_pad, c1), jnp.bfloat16)],
        compiler_params=pltpu.CompilerParams(
            dimension_semantics=("parallel",)),
    )(p1, w1a, w2r, b2r)

    # Lane-dense kernel output -> drop padded anchor columns, NCHW at the edge.
    y = y[:n, :h * wp, :].reshape(n, h, wp, c2)[:, :, :w, :]
    return jnp.transpose(y, (0, 3, 1, 2))


def init_params(key):
    """Deterministic synthetic parameters matching ConvNet.__init__ shapes (HWIO)."""
    k1, k2, k3, k4 = jax.random.split(key, 4)

    def u(k, shape, fan_in):  # PyTorch default: U(-1/sqrt(fan_in), 1/sqrt(fan_in))
        bound = 1.0 / jnp.sqrt(fan_in)
        return jax.random.uniform(k, shape, jnp.float32, -bound, bound)

    w1 = u(k1, (3, 3, 1, 64), 1 * 9)
    b1 = u(k2, (64,), 1 * 9)
    w2 = u(k3, (3, 3, 64, 128), 64 * 9)
    b2 = u(k4, (128,), 64 * 9)
    return w1, b1, w2, b2


@jax.jit
def convnet_forward(x_nchw, w1, b1, w2, b2):
    return convnet_pallas(x_nchw, w1, b1, w2, b2)


def _reference_forward(x_nchw, w1, b1, w2, b2):
    """Pure-JAX f32 reference (lax.conv) for correctness checking."""
    dn = ("NCHW", "HWIO", "NCHW")
    y = jax.lax.conv_general_dilated(x_nchw, w1, (1, 1), "SAME",
                                     dimension_numbers=dn)
    y = y + b1.reshape(1, -1, 1, 1)
    y = jax.lax.conv_general_dilated(y, w2, (1, 1), "SAME",
                                     dimension_numbers=dn)
    y = y + b2.reshape(1, -1, 1, 1)
    return y


if __name__ == "__main__":
    key = jax.random.PRNGKey(0)
    kx, kp = jax.random.split(key)

    # Shapes implied by the module: batch=2, in_channels=1, 16x16 spatial.
    x = jax.random.normal(kx, (2, 1, 16, 16), dtype=jnp.float32)
    w1, b1, w2, b2 = init_params(kp)

    out = convnet_forward(x, w1, b1, w2, b2)
    out = jax.block_until_ready(out)
    assert out.shape == (2, 128, 16, 16), out.shape

    ref = _reference_forward(x, w1, b1, w2, b2)
    # bf16 matmul inputs / intermediate (f32 accumulate) vs f32 reference.
    assert jnp.allclose(out, ref, rtol=3e-2, atol=3e-2), "mismatch vs reference"

    print("KERNEL_OK")
</pallas_src>

<mosaic_0001>
module attributes {stable_mosaic.version = 11 : i64} {
  func.func @_convnet_kernel(%arg0: i32, %arg1: memref<1x328x16xbf16, #tpu.memory_space<vmem>>, %arg2: memref<16x64xbf16, #tpu.memory_space<vmem>>, %arg3: memref<576x128xbf16, #tpu.memory_space<vmem>>, %arg4: memref<1x128xf32, #tpu.memory_space<vmem>>, %arg5: memref<1x288x128xf32, #tpu.memory_space<vmem>>, %arg6: memref<328x64xbf16, #tpu.memory_space<vmem>>) attributes {dimension_semantics = [#tpu.dimension_semantics<parallel>], iteration_bounds = array<i64: 2>, scalar_prefetch = 0 : i64, scratch_operands = 1 : i64, tpu.core_type = #tpu.core_type<tc>, window_params = [{transform_indices = @transform_0, window_bounds = array<i64: 1, 328, 16>}, {pipeline_mode = #tpu.pipeline_mode<synchronous>, transform_indices = @transform_1, window_bounds = array<i64: 16, 64>}, {pipeline_mode = #tpu.pipeline_mode<synchronous>, transform_indices = @transform_2, window_bounds = array<i64: 576, 128>}, {pipeline_mode = #tpu.pipeline_mode<synchronous>, transform_indices = @transform_3, window_bounds = array<i64: 1, 128>}, {transform_indices = @transform_4, window_bounds = array<i64: 1, 288, 128>}]} {
    %c0 = arith.constant 0 : index
    %c0_0 = arith.constant 0 : index
    %c0_1 = arith.constant 0 : index
    %0 = vector.load %arg1[%c0, %c0_0, %c0_1] : memref<1x328x16xbf16, #tpu.memory_space<vmem>>, vector<1x328x16xbf16>
    %1 = vector.shape_cast %0 : vector<1x328x16xbf16> to vector<328x16xbf16>
    %c0_2 = arith.constant 0 : index
    %c0_3 = arith.constant 0 : index
    %2 = vector.load %arg2[%c0_2, %c0_3] : memref<16x64xbf16, #tpu.memory_space<vmem>>, vector<16x64xbf16>
    %cst = arith.constant dense<0.000000e+00> : vector<328x64xf32>
    %3 = tpu.matmul %1, %2, %cst {dimension_numbers = #tpu.dot_dimension_numbers<[1], [0], [0], [1], [0, 0, 1, 1], [], []>} : vector<328x16xbf16>, vector<16x64xbf16>, vector<328x64xf32> -> vector<328x64xf32>
    %4 = arith.truncf %3 : vector<328x64xf32> to vector<328x64xbf16>
    %c0_4 = arith.constant 0 : index
    %c0_5 = arith.constant 0 : index
    %5 = vector.load %arg6[%c0_4, %c0_5] : memref<328x64xbf16, #tpu.memory_space<vmem>>, vector<328x64xbf16>
    tpu.vector_store %arg6[%c0_4, %c0_5], %4 {strides = array<i32>} : memref<328x64xbf16, #tpu.memory_space<vmem>>, vector<328x64xbf16>,
    %c0_6 = arith.constant 0 : index
    %c0_7 = arith.constant 0 : index
    %6 = vector.load %arg4[%c0_6, %c0_7] : memref<1x128xf32, #tpu.memory_space<vmem>>, vector<1x128xf32>
    %c0_8 = arith.constant 0 : index
    %c0_9 = arith.constant 0 : index
    %7 = vector.load %arg6[%c0_8, %c0_9] : memref<328x64xbf16, #tpu.memory_space<vmem>>, vector<96x64xbf16>
    %c0_10 = arith.constant 0 : index
    %c0_11 = arith.constant 0 : index
    %8 = vector.load %arg3[%c0_10, %c0_11] : memref<576x128xbf16, #tpu.memory_space<vmem>>, vector<64x128xbf16>
    %cst_12 = arith.constant dense<0.000000e+00> : vector<96x128xf32>
    %9 = tpu.matmul %7, %8, %cst_12 {dimension_numbers = #tpu.dot_dimension_numbers<[1], [0], [0], [1], [0, 0, 1, 1], [], []>} : vector<96x64xbf16>, vector<64x128xbf16>, vector<96x128xf32> -> vector<96x128xf32>
    %c1 = arith.constant 1 : index
    %c0_13 = arith.constant 0 : index
    %10 = vector.load %arg6[%c1, %c0_13] : memref<328x64xbf16, #tpu.memory_space<vmem>>, vector<96x64xbf16>
    %c64 = arith.constant 64 : index
    %c0_14 = arith.constant 0 : index
    %11 = vector.load %arg3[%c64, %c0_14] : memref<576x128xbf16, #tpu.memory_space<vmem>>, vector<64x128xbf16>
    %cst_15 = arith.constant dense<0.000000e+00> : vector<96x128xf32>
    %12 = tpu.matmul %10, %11, %cst_15 {dimension_numbers = #tpu.dot_dimension_numbers<[1], [0], [0], [1], [0, 0, 1, 1], [], []>} : vector<96x64xbf16>, vector<64x128xbf16>, vector<96x128xf32> -> vector<96x128xf32>
    %13 = arith.addf %9, %12 : vector<96x128xf32>
    %c2 = arith.constant 2 : index
    %c0_16 = arith.constant 0 : index
    %14 = vector.load %arg6[%c2, %c0_16] : memref<328x64xbf16, #tpu.memory_space<vmem>>, vector<96x64xbf16>
    %c128 = arith.constant 128 : index
    %c0_17 = arith.constant 0 : index
    %15 = vector.load %arg3[%c128, %c0_17] : memref<576x128xbf16, #tpu.memory_space<vmem>>, vector<64x128xbf16>
    %cst_18 = arith.constant dense<0.000000e+00> : vector<96x128xf32>
    %16 = tpu.matmul %14, %15, %cst_18 {dimension_numbers = #tpu.dot_dimension_numbers<[1], [0], [0], [1], [0, 0, 1, 1], [], []>} : vector<96x64xbf16>, vector<64x128xbf16>, vector<96x128xf32> -> vector<96x128xf32>
    %17 = arith.addf %13, %16 : vector<96x128xf32>
    %c18 = arith.constant 18 : index
    %c0_19 = arith.constant 0 : index
    %18 = vector.load %arg6[%c18, %c0_19] : memref<328x64xbf16, #tpu.memory_space<vmem>>, vector<96x64xbf16>
    %c192 = arith.constant 192 : index
    %c0_20 = arith.constant 0 : index
    %19 = vector.load %arg3[%c192, %c0_20] : memref<576x128xbf16, #tpu.memory_space<vmem>>, vector<64x128xbf16>
    %cst_21 = arith.constant dense<0.000000e+00> : vector<96x128xf32>
    %20 = tpu.matmul %18, %19, %cst_21 {dimension_numbers = #tpu.dot_dimension_numbers<[1], [0], [0], [1], [0, 0, 1, 1], [], []>} : vector<96x64xbf16>, vector<64x128xbf16>, vector<96x128xf32> -> vector<96x128xf32>
    %21 = arith.addf %17, %20 : vector<96x128xf32>
    %c19 = arith.constant 19 : index
    %c0_22 = arith.constant 0 : index
    %22 = vector.load %arg6[%c19, %c0_22] : memref<328x64xbf16, #tpu.memory_space<vmem>>, vector<96x64xbf16>
    %c256 = arith.constant 256 : index
    %c0_23 = arith.constant 0 : index
    %23 = vector.load %arg3[%c256, %c0_23] : memref<576x128xbf16, #tpu.memory_space<vmem>>, vector<64x128xbf16>
    %cst_24 = arith.constant dense<0.000000e+00> : vector<96x128xf32>
    %24 = tpu.matmul %22, %23, %cst_24 {dimension_numbers = #tpu.dot_dimension_numbers<[1], [0], [0], [1], [0, 0, 1, 1], [], []>} : vector<96x64xbf16>, vector<64x128xbf16>, vector<96x128xf32> -> vector<96x128xf32>
    %25 = arith.addf %21, %24 : vector<96x128xf32>
    %c20 = arith.constant 20 : index
    %c0_25 = arith.constant 0 : index
    %26 = vector.load %arg6[%c20, %c0_25] : memref<328x64xbf16, #tpu.memory_space<vmem>>, vector<96x64xbf16>
    %c320 = arith.constant 320 : index
    %c0_26 = arith.constant 0 : index
    %27 = vector.load %arg3[%c320, %c0_26] : memref<576x128xbf16, #tpu.memory_space<vmem>>, vector<64x128xbf16>
    %cst_27 = arith.constant dense<0.000000e+00> : vector<96x128xf32>
    %28 = tpu.matmul %26, %27, %cst_27 {dimension_numbers = #tpu.dot_dimension_numbers<[1], [0], [0], [1], [0, 0, 1, 1], [], []>} : vector<96x64xbf16>, vector<64x128xbf16>, vector<96x128xf32> -> vector<96x128xf32>
    %29 = arith.addf %25, %28 : vector<96x128xf32>
    %c36 = arith.constant 36 : index
    %c0_28 = arith.constant 0 : index
    %30 = vector.load %arg6[%c36, %c0_28] : memref<328x64xbf16, #tpu.memory_space<vmem>>, vector<96x64xbf16>
    %c384 = arith.constant 384 : index
    %c0_29 = arith.constant 0 : index
    %31 = vector.load %arg3[%c384, %c0_29] : memref<576x128xbf16, #tpu.memory_space<vmem>>, vector<64x128xbf16>
    %cst_30 = arith.constant dense<0.000000e+00> : vector<96x128xf32>
    %32 = tpu.matmul %30, %31, %cst_30 {dimension_numbers = #tpu.dot_dimension_numbers<[1], [0], [0], [1], [0, 0, 1, 1], [], []>} : vector<96x64xbf16>, vector<64x128xbf16>, vector<96x128xf32> -> vector<96x128xf32>
    %33 = arith.addf %29, %32 : vector<96x128xf32>
    %c37 = arith.constant 37 : index
    %c0_31 = arith.constant 0 : index
    %34 = vector.load %arg6[%c37, %c0_31] : memref<328x64xbf16, #tpu.memory_space<vmem>>, vector<96x64xbf16>
    %c448 = arith.constant 448 : index
    %c0_32 = arith.constant 0 : index
    %35 = vector.load %arg3[%c448, %c0_32] : memref<576x128xbf16, #tpu.memory_space<vmem>>, vector<64x128xbf16>
    %cst_33 = arith.constant dense<0.000000e+00> : vector<96x128xf32>
    %36 = tpu.matmul %34, %35, %cst_33 {dimension_numbers = #tpu.dot_dimension_numbers<[1], [0], [0], [1], [0, 0, 1, 1], [], []>} : vector<96x64xbf16>, vector<64x128xbf16>, vector<96x128xf32> -> vector<96x128xf32>
    %37 = arith.addf %33, %36 : vector<96x128xf32>
    %c38 = arith.constant 38 : index
    %c0_34 = arith.constant 0 : index
    %38 = vector.load %arg6[%c38, %c0_34] : memref<328x64xbf16, #tpu.memory_space<vmem>>, vector<96x64xbf16>
    %c512 = arith.constant 512 : index
    %c0_35 = arith.constant 0 : index
    %39 = vector.load %arg3[%c512, %c0_35] : memref<576x128xbf16, #tpu.memory_space<vmem>>, vector<64x128xbf16>
    %cst_36 = arith.constant dense<0.000000e+00> : vector<96x128xf32>
    %40 = tpu.matmul %38, %39, %cst_36 {dimension_numbers = #tpu.dot_dimension_numbers<[1], [0], [0], [1], [0, 0, 1, 1], [], []>} : vector<96x64xbf16>, vector<64x128xbf16>, vector<96x128xf32> -> vector<96x128xf32>
    %41 = arith.addf %37, %40 : vector<96x128xf32>
    %42 = vector.broadcast %6 : vector<1x128xf32> to vector<96x128xf32>
    %43 = arith.addf %41, %42 : vector<96x128xf32>
    %c0_37 = arith.constant 0 : index
    %c0_38 = arith.constant 0 : index
    %c0_39 = arith.constant 0 : index
    %44 = vector.load %arg5[%c0_37, %c0_38, %c0_39] : memref<1x288x128xf32, #tpu.memory_space<vmem>>, vector<1x96x128xf32>
    %45 = vector.shape_cast %44 : vector<1x96x128xf32> to vector<96x128xf32>
    %46 = vector.shape_cast %43 : vector<96x128xf32> to vector<1x96x128xf32>
    tpu.vector_store %arg5[%c0_37, %c0_38, %c0_39], %46 {strides = array<i32>} : memref<1x288x128xf32, #tpu.memory_space<vmem>>, vector<1x96x128xf32>,
    %c96 = arith.constant 96 : index
    %c0_40 = arith.constant 0 : index
    %47 = vector.load %arg6[%c96, %c0_40] : memref<328x64xbf16, #tpu.memory_space<vmem>>, vector<96x64xbf16>
    %c0_41 = arith.constant 0 : index
    %c0_42 = arith.constant 0 : index
    %48 = vector.load %arg3[%c0_41, %c0_42] : memref<576x128xbf16, #tpu.memory_space<vmem>>, vector<64x128xbf16>
    %cst_43 = arith.constant dense<0.000000e+00> : vector<96x128xf32>
    %49 = tpu.matmul %47, %48, %cst_43 {dimension_numbers = #tpu.dot_dimension_numbers<[1], [0], [0], [1], [0, 0, 1, 1], [], []>} : vector<96x64xbf16>, vector<64x128xbf16>, vector<96x128xf32> -> vector<96x128xf32>
    %c97 = arith.constant 97 : index
    %c0_44 = arith.constant 0 : index
    %50 = vector.load %arg6[%c97, %c0_44] : memref<328x64xbf16, #tpu.memory_space<vmem>>, vector<96x64xbf16>
    %c64_45 = arith.constant 64 : index
    %c0_46 = arith.constant 0 : index
    %51 = vector.load %arg3[%c64_45, %c0_46] : memref<576x128xbf16, #tpu.memory_space<vmem>>, vector<64x128xbf16>
    %cst_47 = arith.constant dense<0.000000e+00> : vector<96x128xf32>
    %52 = tpu.matmul %50, %51, %cst_47 {dimension_numbers = #tpu.dot_dimension_numbers<[1], [0], [0], [1], [0, 0, 1, 1], [], []>} : vector<96x64xbf16>, vector<64x128xbf16>, vector<96x128xf32> -> vector<96x128xf32>
    %53 = arith.addf %49, %52 : vector<96x128xf32>
    %c98 = arith.constant 98 : index
    %c0_48 = arith.constant 0 : index
    %54 = vector.load %arg6[%c98, %c0_48] : memref<328x64xbf16, #tpu.memory_space<vmem>>, vector<96x64xbf16>
    %c128_49 = arith.constant 128 : index
    %c0_50 = arith.constant 0 : index
    %55 = vector.load %arg3[%c128_49, %c0_50] : memref<576x128xbf16, #tpu.memory_space<vmem>>, vector<64x128xbf16>
    %cst_51 = arith.constant dense<0.000000e+00> : vector<96x128xf32>
    %56 = tpu.matmul %54, %55, %cst_51 {dimension_numbers = #tpu.dot_dimension_numbers<[1], [0], [0], [1], [0, 0, 1, 1], [], []>} : vector<96x64xbf16>, vector<64x128xbf16>, vector<96x128xf32> -> vector<96x128xf32>
    %57 = arith.addf %53, %56 : vector<96x128xf32>
    %c114 = arith.constant 114 : index
    %c0_52 = arith.constant 0 : index
    %58 = vector.load %arg6[%c114, %c0_52] : memref<328x64xbf16, #tpu.memory_space<vmem>>, vector<96x64xbf16>
    %c192_53 = arith.constant 192 : index
    %c0_54 = arith.constant 0 : index
    %59 = vector.load %arg3[%c192_53, %c0_54] : memref<576x128xbf16, #tpu.memory_space<vmem>>, vector<64x128xbf16>
    %cst_55 = arith.constant dense<0.000000e+00> : vector<96x128xf32>
    %60 = tpu.matmul %58, %59, %cst_55 {dimension_numbers = #tpu.dot_dimension_numbers<[1], [0], [0], [1], [0, 0, 1, 1], [], []>} : vector<96x64xbf16>, vector<64x128xbf16>, vector<96x128xf32> -> vector<96x128xf32>
    %61 = arith.addf %57, %60 : vector<96x128xf32>
    %c115 = arith.constant 115 : index
    %c0_56 = arith.constant 0 : index
    %62 = vector.load %arg6[%c115, %c0_56] : memref<328x64xbf16, #tpu.memory_space<vmem>>, vector<96x64xbf16>
    %c256_57 = arith.constant 256 : index
    %c0_58 = arith.constant 0 : index
    %63 = vector.load %arg3[%c256_57, %c0_58] : memref<576x128xbf16, #tpu.memory_space<vmem>>, vector<64x128xbf16>
    %cst_59 = arith.constant dense<0.000000e+00> : vector<96x128xf32>
    %64 = tpu.matmul %62, %63, %cst_59 {dimension_numbers = #tpu.dot_dimension_numbers<[1], [0], [0], [1], [0, 0, 1, 1], [], []>} : vector<96x64xbf16>, vector<64x128xbf16>, vector<96x128xf32> -> vector<96x128xf32>
    %65 = arith.addf %61, %64 : vector<96x128xf32>
    %c116 = arith.constant 116 : index
    %c0_60 = arith.constant 0 : index
    %66 = vector.load %arg6[%c116, %c0_60] : memref<328x64xbf16, #tpu.memory_space<vmem>>, vector<96x64xbf16>
    %c320_61 = arith.constant 320 : index
    %c0_62 = arith.constant 0 : index
    %67 = vector.load %arg3[%c320_61, %c0_62] : memref<576x128xbf16, #tpu.memory_space<vmem>>, vector<64x128xbf16>
    %cst_63 = arith.constant dense<0.000000e+00> : vector<96x128xf32>
    %68 = tpu.matmul %66, %67, %cst_63 {dimension_numbers = #tpu.dot_dimension_numbers<[1], [0], [0], [1], [0, 0, 1, 1], [], []>} : vector<96x64xbf16>, vector<64x128xbf16>, vector<96x128xf32> -> vector<96x128xf32>
    %69 = arith.addf %65, %68 : vector<96x128xf32>
    %c132 = arith.constant 132 : index
    %c0_64 = arith.constant 0 : index
    %70 = vector.load %arg6[%c132, %c0_64] : memref<328x64xbf16, #tpu.memory_space<vmem>>, vector<96x64xbf16>
    %c384_65 = arith.constant 384 : index
    %c0_66 = arith.constant 0 : index
    %71 = vector.load %arg3[%c384_65, %c0_66] : memref<576x128xbf16, #tpu.memory_space<vmem>>, vector<64x128xbf16>
    %cst_67 = arith.constant dense<0.000000e+00> : vector<96x128xf32>
    %72 = tpu.matmul %70, %71, %cst_67 {dimension_numbers = #tpu.dot_dimension_numbers<[1], [0], [0], [1], [0, 0, 1, 1], [], []>} : vector<96x64xbf16>, vector<64x128xbf16>, vector<96x128xf32> -> vector<96x128xf32>
    %73 = arith.addf %69, %72 : vector<96x128xf32>
    %c133 = arith.constant 133 : index
    %c0_68 = arith.constant 0 : index
    %74 = vector.load %arg6[%c133, %c0_68] : memref<328x64xbf16, #tpu.memory_space<vmem>>, vector<96x64xbf16>
    %c448_69 = arith.constant 448 : index
    %c0_70 = arith.constant 0 : index
    %75 = vector.load %arg3[%c448_69, %c0_70] : memref<576x128xbf16, #tpu.memory_space<vmem>>, vector<64x128xbf16>
    %cst_71 = arith.constant dense<0.000000e+00> : vector<96x128xf32>
    %76 = tpu.matmul %74, %75, %cst_71 {dimension_numbers = #tpu.dot_dimension_numbers<[1], [0], [0], [1], [0, 0, 1, 1], [], []>} : vector<96x64xbf16>, vector<64x128xbf16>, vector<96x128xf32> -> vector<96x128xf32>
    %77 = arith.addf %73, %76 : vector<96x128xf32>
    %c134 = arith.constant 134 : index
    %c0_72 = arith.constant 0 : index
    %78 = vector.load %arg6[%c134, %c0_72] : memref<328x64xbf16, #tpu.memory_space<vmem>>, vector<96x64xbf16>
    %c512_73 = arith.constant 512 : index
    %c0_74 = arith.constant 0 : index
    %79 = vector.load %arg3[%c512_73, %c0_74] : memref<576x128xbf16, #tpu.memory_space<vmem>>, vector<64x128xbf16>
    %cst_75 = arith.constant dense<0.000000e+00> : vector<96x128xf32>
    %80 = tpu.matmul %78, %79, %cst_75 {dimension_numbers = #tpu.dot_dimension_numbers<[1], [0], [0], [1], [0, 0, 1, 1], [], []>} : vector<96x64xbf16>, vector<64x128xbf16>, vector<96x128xf32> -> vector<96x128xf32>
    %81 = arith.addf %77, %80 : vector<96x128xf32>
    %82 = vector.broadcast %6 : vector<1x128xf32> to vector<96x128xf32>
    %83 = arith.addf %81, %82 : vector<96x128xf32>
    %c0_76 = arith.constant 0 : index
    %c96_77 = arith.constant 96 : index
    %c0_78 = arith.constant 0 : index
    %84 = vector.load %arg5[%c0_76, %c96_77, %c0_78] : memref<1x288x128xf32, #tpu.memory_space<vmem>>, vector<1x96x128xf32>
    %85 = vector.shape_cast %84 : vector<1x96x128xf32> to vector<96x128xf32>
    %86 = vector.shape_cast %83 : vector<96x128xf32> to vector<1x96x128xf32>
    tpu.vector_store %arg5[%c0_76, %c96_77, %c0_78], %86 {strides = array<i32>} : memref<1x288x128xf32, #tpu.memory_space<vmem>>, vector<1x96x128xf32>,
    %c192_79 = arith.constant 192 : index
    %c0_80 = arith.constant 0 : index
    %87 = vector.load %arg6[%c192_79, %c0_80] : memref<328x64xbf16, #tpu.memory_space<vmem>>, vector<96x64xbf16>
    %c0_81 = arith.constant 0 : index
    %c0_82 = arith.constant 0 : index
    %88 = vector.load %arg3[%c0_81, %c0_82] : memref<576x128xbf16, #tpu.memory_space<vmem>>, vector<64x128xbf16>
    %cst_83 = arith.constant dense<0.000000e+00> : vector<96x128xf32>
    %89 = tpu.matmul %87, %88, %cst_83 {dimension_numbers = #tpu.dot_dimension_numbers<[1], [0], [0], [1], [0, 0, 1, 1], [], []>} : vector<96x64xbf16>, vector<64x128xbf16>, vector<96x128xf32> -> vector<96x128xf32>
    %c193 = arith.constant 193 : index
    %c0_84 = arith.constant 0 : index
    %90 = vector.load %arg6[%c193, %c0_84] : memref<328x64xbf16, #tpu.memory_space<vmem>>, vector<96x64xbf16>
    %c64_85 = arith.constant 64 : index
    %c0_86 = arith.constant 0 : index
    %91 = vector.load %arg3[%c64_85, %c0_86] : memref<576x128xbf16, #tpu.memory_space<vmem>>, vector<64x128xbf16>
    %cst_87 = arith.constant dense<0.000000e+00> : vector<96x128xf32>
    %92 = tpu.matmul %90, %91, %cst_87 {dimension_numbers = #tpu.dot_dimension_numbers<[1], [0], [0], [1], [0, 0, 1, 1], [], []>} : vector<96x64xbf16>, vector<64x128xbf16>, vector<96x128xf32> -> vector<96x128xf32>
    %93 = arith.addf %89, %92 : vector<96x128xf32>
    %c194 = arith.constant 194 : index
    %c0_88 = arith.constant 0 : index
    %94 = vector.load %arg6[%c194, %c0_88] : memref<328x64xbf16, #tpu.memory_space<vmem>>, vector<96x64xbf16>
    %c128_89 = arith.constant 128 : index
    %c0_90 = arith.constant 0 : index
    %95 = vector.load %arg3[%c128_89, %c0_90] : memref<576x128xbf16, #tpu.memory_space<vmem>>, vector<64x128xbf16>
    %cst_91 = arith.constant dense<0.000000e+00> : vector<96x128xf32>
    %96 = tpu.matmul %94, %95, %cst_91 {dimension_numbers = #tpu.dot_dimension_numbers<[1], [0], [0], [1], [0, 0, 1, 1], [], []>} : vector<96x64xbf16>, vector<64x128xbf16>, vector<96x128xf32> -> vector<96x128xf32>
    %97 = arith.addf %93, %96 : vector<96x128xf32>
    %c210 = arith.constant 210 : index
    %c0_92 = arith.constant 0 : index
    %98 = vector.load %arg6[%c210, %c0_92] : memref<328x64xbf16, #tpu.memory_space<vmem>>, vector<96x64xbf16>
    %c192_93 = arith.constant 192 : index
    %c0_94 = arith.constant 0 : index
    %99 = vector.load %arg3[%c192_93, %c0_94] : memref<576x128xbf16, #tpu.memory_space<vmem>>, vector<64x128xbf16>
    %cst_95 = arith.constant dense<0.000000e+00> : vector<96x128xf32>
    %100 = tpu.matmul %98, %99, %cst_95 {dimension_numbers = #tpu.dot_dimension_numbers<[1], [0], [0], [1], [0, 0, 1, 1], [], []>} : vector<96x64xbf16>, vector<64x128xbf16>, vector<96x128xf32> -> vector<96x128xf32>
    %101 = arith.addf %97, %100 : vector<96x128xf32>
    %c211 = arith.constant 211 : index
    %c0_96 = arith.constant 0 : index
    %102 = vector.load %arg6[%c211, %c0_96] : memref<328x64xbf16, #tpu.memory_space<vmem>>, vector<96x64xbf16>
    %c256_97 = arith.constant 256 : index
    %c0_98 = arith.constant 0 : index
    %103 = vector.load %arg3[%c256_97, %c0_98] : memref<576x128xbf16, #tpu.memory_space<vmem>>, vector<64x128xbf16>
    %cst_99 = arith.constant dense<0.000000e+00> : vector<96x128xf32>
    %104 = tpu.matmul %102, %103, %cst_99 {dimension_numbers = #tpu.dot_dimension_numbers<[1], [0], [0], [1], [0, 0, 1, 1], [], []>} : vector<96x64xbf16>, vector<64x128xbf16>, vector<96x128xf32> -> vector<96x128xf32>
    %105 = arith.addf %101, %104 : vector<96x128xf32>
    %c212 = arith.constant 212 : index
    %c0_100 = arith.constant 0 : index
    %106 = vector.load %arg6[%c212, %c0_100] : memref<328x64xbf16, #tpu.memory_space<vmem>>, vector<96x64xbf16>
    %c320_101 = arith.constant 320 : index
    %c0_102 = arith.constant 0 : index
    %107 = vector.load %arg3[%c320_101, %c0_102] : memref<576x128xbf16, #tpu.memory_space<vmem>>, vector<64x128xbf16>
    %cst_103 = arith.constant dense<0.000000e+00> : vector<96x128xf32>
    %108 = tpu.matmul %106, %107, %cst_103 {dimension_numbers = #tpu.dot_dimension_numbers<[1], [0], [0], [1], [0, 0, 1, 1], [], []>} : vector<96x64xbf16>, vector<64x128xbf16>, vector<96x128xf32> -> vector<96x128xf32>
    %109 = arith.addf %105, %108 : vector<96x128xf32>
    %c228 = arith.constant 228 : index
    %c0_104 = arith.constant 0 : index
    %110 = vector.load %arg6[%c228, %c0_104] : memref<328x64xbf16, #tpu.memory_space<vmem>>, vector<96x64xbf16>
    %c384_105 = arith.constant 384 : index
    %c0_106 = arith.constant 0 : index
    %111 = vector.load %arg3[%c384_105, %c0_106] : memref<576x128xbf16, #tpu.memory_space<vmem>>, vector<64x128xbf16>
    %cst_107 = arith.constant dense<0.000000e+00> : vector<96x128xf32>
    %112 = tpu.matmul %110, %111, %cst_107 {dimension_numbers = #tpu.dot_dimension_numbers<[1], [0], [0], [1], [0, 0, 1, 1], [], []>} : vector<96x64xbf16>, vector<64x128xbf16>, vector<96x128xf32> -> vector<96x128xf32>
    %113 = arith.addf %109, %112 : vector<96x128xf32>
    %c229 = arith.constant 229 : index
    %c0_108 = arith.constant 0 : index
    %114 = vector.load %arg6[%c229, %c0_108] : memref<328x64xbf16, #tpu.memory_space<vmem>>, vector<96x64xbf16>
    %c448_109 = arith.constant 448 : index
    %c0_110 = arith.constant 0 : index
    %115 = vector.load %arg3[%c448_109, %c0_110] : memref<576x128xbf16, #tpu.memory_space<vmem>>, vector<64x128xbf16>
    %cst_111 = arith.constant dense<0.000000e+00> : vector<96x128xf32>
    %116 = tpu.matmul %114, %115, %cst_111 {dimension_numbers = #tpu.dot_dimension_numbers<[1], [0], [0], [1], [0, 0, 1, 1], [], []>} : vector<96x64xbf16>, vector<64x128xbf16>, vector<96x128xf32> -> vector<96x128xf32>
    %117 = arith.addf %113, %116 : vector<96x128xf32>
    %c230 = arith.constant 230 : index
    %c0_112 = arith.constant 0 : index
    %118 = vector.load %arg6[%c230, %c0_112] : memref<328x64xbf16, #tpu.memory_space<vmem>>, vector<96x64xbf16>
    %c512_113 = arith.constant 512 : index
    %c0_114 = arith.constant 0 : index
    %119 = vector.load %arg3[%c512_113, %c0_114] : memref<576x128xbf16, #tpu.memory_space<vmem>>, vector<64x128xbf16>
    %cst_115 = arith.constant dense<0.000000e+00> : vector<96x128xf32>
    %120 = tpu.matmul %118, %119, %cst_115 {dimension_numbers = #tpu.dot_dimension_numbers<[1], [0], [0], [1], [0, 0, 1, 1], [], []>} : vector<96x64xbf16>, vector<64x128xbf16>, vector<96x128xf32> -> vector<96x128xf32>
    %121 = arith.addf %117, %120 : vector<96x128xf32>
    %122 = vector.broadcast %6 : vector<1x128xf32> to vector<96x128xf32>
    %123 = arith.addf %121, %122 : vector<96x128xf32>
    %c0_116 = arith.constant 0 : index
    %c192_117 = arith.constant 192 : index
    %c0_118 = arith.constant 0 : index
    %124 = vector.load %arg5[%c0_116, %c192_117, %c0_118] : memref<1x288x128xf32, #tpu.memory_space<vmem>>, vector<1x96x128xf32>
    %125 = vector.shape_cast %124 : vector<1x96x128xf32> to vector<96x128xf32>
    %126 = vector.shape_cast %123 : vector<96x128xf32> to vector<1x96x128xf32>
    tpu.vector_store %arg5[%c0_116, %c192_117, %c0_118], %126 {strides = array<i32>} : memref<1x288x128xf32, #tpu.memory_space<vmem>>, vector<1x96x128xf32>,
    return
  }
  func.func @transform_0(%arg0: i32) -> (i32, i32, i32) {
    %c0_i32 = arith.constant 0 : i32
    %c0_i32_0 = arith.constant 0 : i32
    %c0_i32_1 = arith.constant 0 : i32
    return %arg0, %c0_i32, %c0_i32_0 : i32, i32, i32
  }
  func.func @transform_1(%arg0: i32) -> (i32, i32) {
    %c0_i32 = arith.constant 0 : i32
    %c0_i32_0 = arith.constant 0 : i32
    %c0_i32_1 = arith.constant 0 : i32
    return %c0_i32, %c0_i32_0 : i32, i32
  }
  func.func @transform_2(%arg0: i32) -> (i32, i32) {
    %c0_i32 = arith.constant 0 : i32
    %c0_i32_0 = arith.constant 0 : i32
    %c0_i32_1 = arith.constant 0 : i32
    return %c0_i32, %c0_i32_0 : i32, i32
  }
  func.func @transform_3(%arg0: i32) -> (i32, i32) {
    %c0_i32 = arith.constant 0 : i32
    %c0_i32_0 = arith.constant 0 : i32
    %c0_i32_1 = arith.constant 0 : i32
    return %c0_i32, %c0_i32_0 : i32, i32
  }
  func.func @transform_4(%arg0: i32) -> (i32, i32, i32) {
    %c0_i32 = arith.constant 0 : i32
    %c0_i32_0 = arith.constant 0 : i32
    %c0_i32_1 = arith.constant 0 : i32
    return %arg0, %c0_i32, %c0_i32_0 : i32, i32, i32
  }
}

</mosaic_0001>

<bundles_post_ra>
// kernel: convnet_forward.1
= control target key start
LH: loop header
LB: loop body
LE: loop exit
PB: predicated region body
PF: predicated region fallthrough
CT: control target
= control target key end

     0   :  { %s5730_s15 = smov 0   ;;  %s7756_s0 = inlined_call_operand.vmem [shape: bf16[2,328,16], index: 0, kind: input, shape index: {}]   ;;  %s7757_s1 = inlined_call_operand.vmem [shape: bf16[16,64], index: 1, kind: input, shape index: {}]   ;;  %s7758_s2 = inlined_call_operand.vmem [shape: bf16[576,128], index: 2, kind: input, shape index: {}]   ;;  %s7759_s3 = inlined_call_operand.vmem [shape: f32[1,128], index: 3, kind: input, shape index: {}]   ;;  %s7760_s4 = inlined_call_operand.vmem [shape: f32[2,288,128], index: 4, kind: output, shape index: {}]  }
   0x1 LB: > { %s4583_s16 = sadd.s32 4294967295, %s5703_s15   ;;  %p4587_p0 = scmp.ge.s32.totalorder %s5703_s15, 1  ;;  %s5703_s15 = sphi %s5730_s15, %s14_s15  }
   0x2   : > { %p162_p1 = scmp.lt.s32.totalorder %s5703_s15, 3 }
   0x4   : > { %p163_p2 = pnand %p4587_p0, %p162_p1 }
   0x6   : > { %166 = sbr.rel (%p163_p2) target bundleno = 1118 (0x45e), region = 36 }
   0xb   : > { %v5491_v0 = vld [vmem:[%s7757_s1] sm:$0xff]  ;;  %p188_p3 = scmp.lt.s32.totalorder %s4583_s16, 1  ;;  %vm351_vm0 = vcmask 130048   ;;  %v5500_v8 = vld [vmem:[%s7758_s2 + $0x18] sm:$0xff]  ;;  %v5499_v9 = vld [vmem:[%s7758_s2 + $0x10] sm:$0xff]  ;;  %vm569_vm1 = vcmask 519168  }
   0xc   : > { %422 = vmatpush.bf16.msra.mxu0 %v5491_v0  ;;  %849 = vmatpush.bf16.msra.mxu2 %v5500_v8  ;;  %v5498_v10 = vld [vmem:[%s7758_s2 + $0x8] sm:$0xff]  ;;  %v5497_v11 = vld [vmem:[%s7758_s2] sm:$0xff]  ;;  %v5504_v13 = vld [vmem:[%s7758_s2 + $0x38] sm:$0xff]  ;;  %vm751_vm2 = vcmask 523264   ;;  %vm674_vm3 = vsmask.f32 7424 }
   0xd   : > { %s7971_s16 = smov (!%p188_p3, %s4583_s16), 1  ;;  %774 = vmatpush.bf16.msra.mxu1 %v5504_v13  ;;  %5668 = vmatpush.bf16.msra.mxu3 %v5504_v13  ;;  %v5503_v14 = vld [vmem:[%s7758_s2 + $0x30] sm:$0xff]  ;;  %v5502_v17 = vld [vmem:[%s7758_s2 + $0x28] sm:$0xff]  ;;  %v5501_v19 = vld [vmem:[%s7758_s2 + $0x20] sm:$0xff]  ;;  %vm896_vm4 = vcmask 1046528   ;;  %vm1343_vm5 = vcmask 1045504  }
   0xe   : > { %s5676_s19 = smul.u32 164, %s7971_s16  ;;  %v5521_v34 = vld [vmem:[%s7758_s2 + $0x98] sm:$0xff]  ;;  %v5520_v39 = vld [vmem:[%s7758_s2 + $0x90] sm:$0xff]  ;;  %v5519_v43 = vld [vmem:[%s7758_s2 + $0x88] sm:$0xff]  ;;  %vm1790_vm6 = vcmask 1044480  }
   0xf   : > { %v5518_v47 = vld [vmem:[%s7758_s2 + $0x80] sm:$0xff]  ;;  %vm1175_vm7 = vsmask.f32 6400  ;;  %vm1622_vm8 = vsmask.f32 5376 }
  0x10   : > { %s5747_s22 = scalar_lea.vmem %s7756_s0, %s5676_s19  ;;  %850 = vmatpush.bf16.msra.mxu2 %v5499_v9 }
  0x11   : > { %v5471_v1 = vld [vmem:[%s5747_s22] sm:$0xff]  ;;  %v5472_v2 = vld [vmem:[%s5747_s22 + $0x8] sm:$0xff]  ;;  %v5473_v3 = vld [vmem:[%s5747_s22 + $0x10] sm:$0xff]  ;;  %775 = vmatpush.bf16.msra.mxu1 %v5503_v14  ;;  %5669 = vmatpush.bf16.msra.mxu3 %v5503_v14 }
  0x12   : > { %4674 = vmatmul.msk.bf16.vlgmr.msra.gmra.mxu0 %vm351_vm0, %v5471_v1  ;;  %v5474_v4 = vld [vmem:[%s5747_s22 + $0x18] sm:$0xff]  ;;  %v5475_v5 = vld [vmem:[%s5747_s22 + $0x20] sm:$0xff]  ;;  %v5476_v6 = vld [vmem:[%s5747_s22 + $0x28] sm:$0xff] }
  0x13   : > { %v5477_v7 = vld [vmem:[%s5747_s22 + $0x30] sm:$0xff]  ;;  %v5478_v12 = vld [vmem:[%s5747_s22 + $0x38] sm:$0xff]  ;;  %v5479_v15 = vld [vmem:[%s5747_s22 + $0x40] sm:$0xff] }
  0x14   : > { %851 = vmatpush.bf16.msra.mxu2 %v5498_v10  ;;  %v5480_v22 = vld [vmem:[%s5747_s22 + $0x48] sm:$0xff]  ;;  %v5481_v29 = vld [vmem:[%s5747_s22 + $0x50] sm:$0xff]  ;;  %v5482_v46 = vld [vmem:[%s5747_s22 + $0x58] sm:$0xff] }
  0x15   : > { %776 = vmatpush.bf16.msra.mxu1 %v5502_v17  ;;  %5670 = vmatpush.bf16.msra.mxu3 %v5502_v17 }
  0x18   : > { %852 = vmatpush.bf16.msra.mxu2 %v5497_v11 }
  0x19   : > { %777 = vmatpush.bf16.msra.mxu1 %v5501_v19  ;;  %5671 = vmatpush.bf16.msra.mxu3 %v5501_v19 }
  0x1c   : > { %1284 = vmatpush.bf16.msrb.mxu2 %v5521_v34 }
  0x1d   : > { %5672 = vmatpush.bf16.msrb.mxu3 %v5500_v8 }
  0x20   : > { %1285 = vmatpush.bf16.msrb.mxu2 %v5520_v39 }
  0x21   : > { %5673 = vmatpush.bf16.msrb.mxu3 %v5499_v9 }
  0x22   : > { %4675 = vmatmul.msk.bf16.gmra.mxu0 %vm351_vm0, %v5472_v2  ;;  %v5517_v2 = vld [vmem:[%s7758_s2 + $0x78] sm:$0xff] }
  0x23   : > { %1116 = vmatpush.bf16.msrb.mxu1 %v5517_v2 }
  0x24   : > { %1286 = vmatpush.bf16.msrb.mxu2 %v5519_v43 }
  0x25   : > { %5674 = vmatpush.bf16.msrb.mxu3 %v5498_v10  ;;  %v5515_v10 = vld [vmem:[%s7758_s2 + $0x68] sm:$0xff] }
  0x28   : > { %1287 = vmatpush.bf16.msrb.mxu2 %v5518_v47 }
  0x29   : > { %5675 = vmatpush.bf16.msrb.mxu3 %v5497_v11 }
  0x32   : > { %4676 = vmatmul.msk.bf16.gmra.mxu0 %vm351_vm0, %v5473_v3 }
  0x42   : > { %4677 = vmatmul.msk.bf16.gmra.mxu0 %vm351_vm0, %v5474_v4 }
  0x52   : > { %4678 = vmatmul.msk.bf16.gmra.mxu0 %vm351_vm0, %v5475_v5  ;;  %v5516_v5 = vld [vmem:[%s7758_s2 + $0x70] sm:$0xff] }
  0x53   : > { %1117 = vmatpush.bf16.msrb.mxu1 %v5516_v5 }
  0x57   : > { %1118 = vmatpush.bf16.msrb.mxu1 %v5515_v10 }
  0x62   : > { %4679 = vmatmul.msk.bf16.gmra.mxu0 %vm351_vm0, %v5476_v6 }
  0x72   : > { %4680 = vmatmul.msk.bf16.gmra.mxu0 %vm351_vm0, %v5477_v7  ;;  %v5483_v7 = vld [vmem:[%s5747_s22 + $0x60] sm:$0xff] }
  0x82   : > { %4681 = vmatmul.msk.bf16.gmra.mxu0 %vm351_vm0, %v5478_v12 }
  0x8f   : > { %v424_v16 = vpop.f32.mrf.mxu0 }
  0x90   : > { %v528_v18 = vpack.c.bf16 %v424_v16, %v424_v16 }
  0x92   : > { %570 = vst.msk [vmem:[#allocation2] sm:$0xf] %vm569_vm1, %v528_v18  ;;  %4682 = vmatmul.msk.bf16.gmra.mxu0 %vm351_vm0, %v5479_v15 }
  0x97   : > { %v426_v20 = vpop.f32.mrf.mxu0 }
  0x98   : > { %v529_v21 = vpack.c.bf16 %v426_v20, %v426_v20  ;;  %v5514_v20 = vld [vmem:[%s7758_s2 + $0x60] sm:$0xff] }
  0x99   : > { %1119 = vmatpush.bf16.msrb.mxu1 %v5514_v20  ;;  %v5568_v20 = vld [vmem:[%s7758_s2 + $0x78] sm:$0xff] }
  0x9a   : > { %571 = vst.msk [vmem:[#allocation2 + $0x4] sm:$0xf] %vm569_vm1, %v529_v21  ;;  %2425 = vmatpush.bf16.msrb.mxu0 %v5568_v20 }
  0x9f   : > { %v429_v23 = vpop.f32.mrf.mxu0 }
  0xa0   : > { %v530_v24 = vpack.c.bf16 %v429_v23, %v429_v23 }
  0xa1   : > { %v5646_v25 = vld [vmem:[#allocation2] sm:$0xff]  }
  0xa2   : > { %572 = vst.msk [vmem:[#allocation2 + $0x8] sm:$0xf] %vm569_vm1, %v530_v24  ;;  %4683 = vmatmul.msk.bf16.gmra.mxu0 %vm351_vm0, %v5480_v22  ;;  %4753 = vmatmul.msk.bf16.vlgmr.msra.gmra.mxu2 %vm751_vm2, %v5646_v25  ;;  %v678_v28 = vshll.u32 %v5646_v25, 16  ;;  %v676_v35 = vshrl.u32 %v5646_v25, 16 }
  0xa4   : > { %v680_v32 = vrot.slane %v678_v28, 1 }
  0xa6   : > { %v681_v37 = vor.u32 %v680_v32, %v676_v35 }
  0xa7   : > { %v431_v26 = vpop.f32.mrf.mxu0 }
  0xa8   : > { %v531_v27 = vpack.c.bf16 %v431_v26, %v431_v26 }
  0xa9   : > { %v1331_v45 = vld [vmem:[#allocation2 + $0x8] sm:$0xc] }
  0xaa   : > { %573 = vst.msk [vmem:[#allocation2 + $0xc] sm:$0xf] %vm569_vm1, %v531_v27  ;;  %v1341_v51 = vunpack.c.l.b16 %v1331_v45  ;;  %v1003_v8 = vld [vmem:[#allocation2 + $0x8] sm:$0xe] }
  0xab   : > { %v1037_v15 = vunpack.c.l.b16 %v1003_v8  ;;  %v5484_v45 = vld [vmem:[%s5747_s22 + $0x68] sm:$0xff] }
  0xaf   : > { %v434_v30 = vpop.f32.mrf.mxu0 }
  0xb0   : > { %v532_v31 = vpack.c.bf16 %v434_v30, %v434_v30 }
  0xb1   : > { %v5799_v33 = vld [vmem:[#allocation2 + $0x8] sm:$0xff] }
  0xb2   : > { %574 = vst.msk [vmem:[#allocation2 + $0x10] sm:$0xf] %vm569_vm1, %v532_v31  ;;  %4684 = vmatmul.msk.bf16.gmra.mxu0 %vm351_vm0, %v5481_v29  ;;  %4754 = vmatmul.msk.bf16.gmra.mxu2 %vm751_vm2, %v5799_v33  ;;  %v683_v36 = vshll.u32 %v5799_v33, 16  ;;  %v1004_v44 = vld [vmem:[#allocation2 + $0xc] sm:$0xf]  ;;  %v687_v55 = vshrl.u32 %v5799_v33, 16 }
  0xb3   : > { %v1038_v48 = vunpack.c.l.b16 %v1004_v44  ;;  %v898_v57 = vrot.slane %v5799_v33, 1 }
  0xb4   : > { %v685_v38 = vrot.slane %v683_v36, 1 }
  0xb5   : > { %v1342_v54 = vpack.c.b16 %v1038_v48, %v1341_v51  ;;  %v5857_v19 = vpack.c.b16 %v1038_v48, %v1037_v15 }
  0xb6   : > { %v686_v41 = vsel %vm674_vm3, %v681_v37, %v685_v38  ;;  %v689_v60 = vor.u32 %v687_v55, %v685_v38 }
  0xb7   : > { %v436_v40 = vpop.f32.mrf.mxu0  ;;  %4731 = vmatmul.msk.bf16.vlgmr.msra.gmra.mxu1 %vm751_vm2, %v686_v41  ;;  %v1344_v63 = vrot.slane %v1342_v54, 2  ;;  %v1177_v32 = vshrl.u32 %v5857_v19, 16  ;;  %v1180_v34 = vshll.u32 %v5857_v19, 16 }
  0xb8   : > { %v533_v42 = vpack.c.bf16 %v436_v40, %v436_v40 }
  0xb9   : > { %v1778_v11 = vld [vmem:[#allocation2 + $0x10] sm:$0x8]  ;;  %v1179_v43 = vrot.slane %v1177_v32, 1  ;;  %v1182_v44 = vrot.slane %v1180_v34, 2  ;;  %v1057_v32 = vrot.slane %v5857_v19, 1 }
  0xba   : > { %575 = vst.msk [vmem:[#allocation2 + $0x14] sm:$0xf] %vm569_vm1, %v533_v42  ;;  %v1788_v16 = vunpack.c.l.b16 %v1778_v11 }
  0xbf   : > { %v439_v49 = vpop.f32.mrf.mxu0 }
  0xc0   : > { %v534_v50 = vpack.c.bf16 %v439_v49, %v439_v49  ;;  %v1183_v49 = vor.u32 %v1182_v44, %v1179_v43 }
  0xc1   : > { %v5493_v52 = vld [vmem:[#allocation2 + $0x10] sm:$0xff] }
  0xc2   : > { %v5822_v53 = vld [vmem:[#allocation2 + $0x10] sm:$0xff]  ;;  %576 = vst.msk [vmem:[#allocation2 + $0x18] sm:$0xf] %vm569_vm1, %v534_v50  ;;  %4685 = vmatmul.msk.bf16.gmra.mxu0 %vm351_vm0, %v5482_v46  ;;  %4755 = vmatmul.msk.bf16.gmra.mxu2 %vm751_vm2, %v5493_v52  ;;  %v691_v56 = vshll.u32 %v5493_v52, 16  ;;  %v900_v58 = vrot.slane %v5493_v52, 1  ;;  %v695_v17 = vshrl.u32 %v5493_v52, 16 }
  0xc3   : > { %v1345_v59 = vrot.slane %v5822_v53, 2  ;;  %v5847_v6 = vld [vmem:[#allocation2 + $0x14] sm:$0xf]  ;;  %v1185_v27 = vshrl.u32 %v5822_v53, 16  ;;  %v1188_v28 = vshll.u32 %v5822_v53, 16 }
  0xc4   : > { %v693_v61 = vrot.slane %v691_v56, 1  ;;  %v5833_v62 = vsel %vm896_vm4, %v898_v57, %v900_v58  ;;  %v1485_v13 = vunpack.c.l.b16 %v5847_v6  ;;  %v5567_v6 = vld [vmem:[%s7758_s2 + $0x70] sm:$0xff] }
  0xc5   : > { %v5841_v4 = vsel %vm1343_vm5, %v1344_v63, %v1345_v59  ;;  %v1187_v39 = vrot.slane %v1185_v27, 1  ;;  %v1190_v40 = vrot.slane %v1188_v28, 2  ;;  %2426 = vmatpush.bf16.msrb.mxu0 %v5567_v6 }
  0xc6   : > { %v694_v1 = vsel %vm674_vm3, %v689_v60, %v693_v61  ;;  %v1789_v24 = vpack.c.b16 %v1485_v13, %v1788_v16  ;;  %v697_v25 = vor.u32 %v695_v17, %v693_v61 }
  0xc7   : > { %v441_v0 = vpop.f32.mrf.mxu0  ;;  %4732 = vmatmul.msk.bf16.gmra.mxu1 %vm751_vm2, %v694_v1  ;;  %v1191_v46 = vor.u32 %v1190_v40, %v1187_v39 }
  0xc8   : > { %v535_v3 = vpack.c.bf16 %v441_v0, %v441_v0  ;;  %v1791_v37 = vrot.slane %v1789_v24, 3 }
  0xc9   : > { %v1192_v51 = vsel %vm1175_vm7, %v1183_v49, %v1191_v46 }
  0xca   : > { %577 = vst.msk [vmem:[#allocation2 + $0x1c] sm:$0xf] %vm569_vm1, %v535_v3 }
  0xcf   : > { %v444_v9 = vpop.f32.mrf.mxu0 }
  0xd0   : > { %v536_v12 = vpack.c.bf16 %v444_v9, %v444_v9 }
  0xd1   : > { %v5494_v14 = vld [vmem:[#allocation2 + $0x18] sm:$0xff] }
  0xd2   : > { %578 = vst.msk [vmem:[#allocation2 + $0x20] sm:$0xf] %vm569_vm1, %v536_v12  ;;  %4686 = vmatmul.msk.bf16.gmra.mxu0 %vm351_vm0, %v5483_v7  ;;  %4756 = vmatmul.msk.bf16.gmra.mxu2 %vm751_vm2, %v5494_v14  ;;  %v699_v18 = vshll.u32 %v5494_v14, 16  ;;  %v5862_v21 = vld [vmem:[#allocation2 + $0x18] sm:$0xff]  ;;  %v902_v23 = vrot.slane %v5494_v14, 1  ;;  %v703_v52 = vshrl.u32 %v5494_v14, 16 }
  0xd3   : > { %v5864_v22 = vld [vmem:[#allocation2 + $0x18] sm:$0xff]  ;;  %v1347_v36 = vrot.slane %v5862_v21, 2  ;;  %v1194_v61 = vshrl.u32 %v5862_v21, 16  ;;  %v1197_v63 = vshll.u32 %v5862_v21, 16  ;;  %v5485_v12 = vld [vmem:[%s5747_s22 + $0x70] sm:$0xff] }
  0xd4   : > { %v701_v26 = vrot.slane %v699_v18, 1  ;;  %v5871_v29 = vsel %vm896_vm4, %v900_v58, %v902_v23  ;;  %v1792_v38 = vrot.slane %v5864_v22, 3 }
  0xd5   : > { %v5881_v41 = vsel %vm1343_vm5, %v1345_v59, %v1347_v36  ;;  %v1196_v8 = vrot.slane %v1194_v61, 1  ;;  %v1199_v9 = vrot.slane %v1197_v63, 2 }
  0xd6   : > { %v702_v31 = vsel %vm674_vm3, %v697_v25, %v701_v26  ;;  %v5884_v42 = vsel %vm1790_vm6, %v1791_v37, %v1792_v38  ;;  %v705_v59 = vor.u32 %v703_v52, %v701_v26  ;;  %v1058_v25 = vrot.slane %v5822_v53, 1  ;;  %v5486_v52 = vld [vmem:[%s5747_s22 + $0x78] sm:$0xff] }
  0xd7   : > { %v446_v30 = vpop.f32.mrf.mxu0  ;;  %4733 = vmatmul.msk.bf16.gmra.mxu1 %vm751_vm2, %v702_v31  ;;  %v1200_v14 = vor.u32 %v1199_v9, %v1196_v8  ;;  %v1060_v8 = vrot.slane %v5862_v21, 1 }
  0xd8   : > { %v537_v35 = vpack.c.bf16 %v446_v30, %v446_v30 }
  0xd9   : > { %v1201_v18 = vsel %vm1175_vm7, %v1191_v46, %v1200_v14 }
  0xda   : > { %579 = vst.msk [vmem:[#allocation2 + $0x24] sm:$0xf] %vm569_vm1, %v537_v35 }
  0xdf   : > { %v449_v47 = vpop.f32.mrf.mxu0 }
  0xe0   : > { %v538_v48 = vpack.c.bf16 %v449_v47, %v449_v47  ;;  %v5508_v47 = vld [vmem:[%s7758_s2 + $0x58] sm:$0xff] }
  0xe1   : > { %v5887_v50 = vld [vmem:[#allocation2 + $0x20] sm:$0xff] }
  0xe2   : > { %580 = vst.msk [vmem:[#allocation2 + $0x28] sm:$0xf] %vm569_vm1, %v538_v48  ;;  %4687 = vmatmul.msk.bf16.gmra.mxu0 %vm351_vm0, %v5484_v45  ;;  %4839 = vmatmul.msk.bf16.vlgmr.msrb.gmra.mxu2 %vm751_vm2, %v1192_v51  ;;  %v707_v54 = vshll.u32 %v5887_v50, 16  ;;  %v5894_v55 = vld [vmem:[#allocation2 + $0x20] sm:$0xff]  ;;  %v904_v58 = vrot.slane %v5887_v50, 1 }
  0xe3   : > { %v5896_v56 = vld [vmem:[#allocation2 + $0x20] sm:$0xff]  ;;  %v1349_v5 = vrot.slane %v5894_v55, 2  ;;  %v1203_v34 = vshrl.u32 %v5894_v55, 16  ;;  %v1206_v35 = vshll.u32 %v5894_v55, 16 }
  0xe4   : > { %v709_v60 = vrot.slane %v707_v54, 1  ;;  %v5902_v0 = vsel %vm896_vm4, %v902_v23, %v904_v58  ;;  %v1794_v7 = vrot.slane %v5896_v56, 3  ;;  %v711_v23 = vshrl.u32 %v5887_v50, 16 }
  0xe5   : > { %v5910_v10 = vsel %vm1343_vm5, %v1347_v36, %v1349_v5  ;;  %v1205_v43 = vrot.slane %v1203_v34, 1  ;;  %v1208_v45 = vrot.slane %v1206_v35, 2 }
  0xe6   : > { %v710_v2 = vsel %vm674_vm3, %v705_v59, %v709_v60  ;;  %v5913_v11 = vsel %vm1790_vm6, %v1792_v38, %v1794_v7  ;;  %v713_v30 = vor.u32 %v711_v23, %v709_v60  ;;  %v1059_v38 = vsel %vm896_vm4, %v1057_v32, %v1058_v25 }
  0xe7   : > { %v451_v1 = vpop.f32.mrf.mxu0  ;;  %4734 = vmatmul.msk.bf16.gmra.mxu1 %vm751_vm2, %v710_v2  ;;  %v1209_v54 = vor.u32 %v1208_v45, %v1205_v43  ;;  %v5507_v2 = vld [vmem:[%s7758_s2 + $0x50] sm:$0xff]  ;;  %v1061_v23 = vsel %vm896_vm4, %v1058_v25, %v1060_v8  ;;  %v5506_v25 = vld [vmem:[%s7758_s2 + $0x48] sm:$0xff] }
  0xe8   : > { %v539_v3 = vpack.c.bf16 %v451_v1, %v451_v1 }
  0xe9   : > { %v1210_v1 = vsel %vm1175_vm7, %v1200_v14, %v1209_v54 }
  0xea   : > { %581 = vst.msk [vmem:[#allocation2 + $0x2c] sm:$0xf] %vm569_vm1, %v539_v3 }
  0xef   : > { %v454_v15 = vpop.f32.mrf.mxu0 }
  0xf0   : > { %v540_v16 = vpack.c.bf16 %v454_v15, %v454_v15 }
  0xf1   : > { %v5916_v17 = vld [vmem:[#allocation2 + $0x28] sm:$0xff] }
  0xf2   : > { %582 = vst.msk [vmem:[#allocation2 + $0x30] sm:$0xf] %vm569_vm1, %v540_v16  ;;  %4688 = vmatmul.msk.bf16.gmra.mxu0 %vm351_vm0, %v5485_v12  ;;  %4840 = vmatmul.msk.bf16.gmra.mxu2 %vm751_vm2, %v1201_v18  ;;  %v715_v24 = vshll.u32 %v5916_v17, 16  ;;  %v5928_v26 = vld [vmem:[#allocation2 + $0x28] sm:$0xff]  ;;  %v906_v28 = vrot.slane %v5916_v17, 1 }
  0xf3   : > { %v5930_v27 = vld [vmem:[#allocation2 + $0x28] sm:$0xff]  ;;  %v1351_v19 = vrot.slane %v5928_v26, 2  ;;  %v1212_v15 = vshrl.u32 %v5928_v26, 16  ;;  %v1215_v14 = vshll.u32 %v5928_v26, 16 }
  0xf4   : > { %v717_v31 = vrot.slane %v715_v24, 1  ;;  %v5937_v36 = vsel %vm896_vm4, %v904_v58, %v906_v28  ;;  %v1796_v40 = vrot.slane %v5930_v27, 3 }
  0xf5   : > { %v5950_v48 = vsel %vm1343_vm5, %v1349_v5, %v1351_v19  ;;  %v719_v5 = vshrl.u32 %v5916_v17, 16  ;;  %v1214_v32 = vrot.slane %v1212_v15, 1  ;;  %v1217_v34 = vrot.slane %v1215_v14, 2  ;;  %v5535_v14 = vld [vmem:[%s7758_s2 + $0xe0] sm:$0xff] }
  0xf6   : > { %v718_v53 = vsel %vm674_vm3, %v713_v30, %v717_v31  ;;  %v5953_v49 = vsel %vm1790_vm6, %v1794_v7, %v1796_v40 }
  0xf7   : > { %v456_v37 = vpop.f32.mrf.mxu0  ;;  %4735 = vmatmul.msk.bf16.vlgmr.msra.gmra.mxu3 %vm751_vm2, %v718_v53  ;;  %4817 = vmatmul.msk.bf16.vlgmr.msrb.gmra.mxu1 %vm751_vm2, %v1059_v38  ;;  %v721_v12 = vor.u32 %v719_v5, %v717_v31  ;;  %v5487_v53 = vld [vmem:[%s5747_s22 + $0x80] sm:$0xff]  ;;  %v1218_v38 = vor.u32 %v1217_v34, %v1214_v32 }
  0xf8   : > { %v541_v39 = vpack.c.bf16 %v456_v37, %v456_v37  ;;  %956 = vmatpush.bf16.msra.mxu3 %v5508_v47  ;;  %v1062_v47 = vrot.slane %v5894_v55, 1 }
  0xf9   : > { %v632_v44 = vld [vmem:[#allocation2 + $0x30] sm:$0x1]  ;;  %v1219_v45 = vsel %vm1175_vm7, %v1209_v54, %v1218_v38 }
  0xfa   : > { %583 = vst.msk [vmem:[#allocation2 + $0x34] sm:$0xf] %vm569_vm1, %v541_v39  ;;  %v666_v46 = vunpack.c.l.b16 %v632_v44  ;;  %v1063_v55 = vsel %vm896_vm4, %v1060_v8, %v1062_v47  ;;  %v5536_v8 = vld [vmem:[%s7758_s2 + $0xe8] sm:$0xff] }
  0xfc   : > { %v673_v51 = vpack.c.b16 %v666_v46, %v666_v46  ;;  %957 = vmatpush.bf16.msra.mxu3 %v5507_v2  ;;  %v5505_v46 = vld [vmem:[%s7758_s2 + $0x40] sm:$0xff] }
  0xfe   : > { %v908_v58 = vrot.slane %v673_v51, 1  ;;  %v723_v60 = vshll.u32 %v673_v51, 16  ;;  %v5538_v51 = vld [vmem:[%s7758_s2 + $0xf8] sm:$0xff] }
  0xff   : > { %v459_v59 = vpop.f32.mrf.mxu0  ;;  %1731 = vmatpush.bf16.msra.mxu2 %v5538_v51 }
 0x100   : > { %v542_v61 = vpack.c.bf16 %v459_v59, %v459_v59  ;;  %v5957_v63 = vsel %vm896_vm4, %v906_v28, %v908_v58  ;;  %v725_v7 = vrot.slane %v723_v60, 1  ;;  %958 = vmatpush.bf16.msra.mxu3 %v5506_v25 }
 0x101   : > { %v5965_v3 = vld [vmem:[#allocation2 + $0x30] sm:$0xff] }
 0x102   : > { %584 = vst.msk [vmem:[#allocation2 + $0x38] sm:$0xf] %vm569_vm1, %v542_v61  ;;  %4689 = vmatmul.msk.bf16.gmra.mxu0 %vm351_vm0, %v5486_v52  ;;  %4841 = vmatmul.msk.bf16.gmra.mxu2 %vm751_vm2, %v1210_v1  ;;  %v5970_v9 = vld [vmem:[#allocation2 + $0x30] sm:$0xff]  ;;  %v1353_v16 = vrot.slane %v5965_v3, 2  ;;  %v726_v20 = vsel %vm674_vm3, %v721_v12, %v725_v7  ;;  %v1221_v58 = vshrl.u32 %v5965_v3, 16  ;;  %v1224_v54 = vshll.u32 %v5965_v3, 16 }
 0x103   : > { %v1798_v24 = vrot.slane %v5970_v9, 3  ;;  %v5537_v61 = vld [vmem:[%s7758_s2 + $0xf0] sm:$0xff]  ;;  %v5525_v7 = vld [vmem:[%s7758_s2 + $0xb8] sm:$0xff]  ;;  %v5488_v12 = vld [vmem:[%s5747_s22 + $0x88] sm:$0xff] }
 0x104   : > { %v5981_v30 = vsel %vm1343_vm5, %v1351_v19, %v1353_v16  ;;  %959 = vmatpush.bf16.msra.mxu3 %v5505_v46  ;;  %1732 = vmatpush.bf16.msra.mxu2 %v5537_v61  ;;  %v1223_v2 = vrot.slane %v1221_v58, 1  ;;  %v1226_v5 = vrot.slane %v1224_v54, 2 }
 0x105   : > { %v5984_v31 = vsel %vm1790_vm6, %v1796_v40, %v1798_v24 }
 0x106   : > { %v1227_v15 = vor.u32 %v1226_v5, %v1223_v2 }
 0x107   : > { %v461_v18 = vpop.f32.mrf.mxu0  ;;  %4736 = vmatmul.msk.bf16.gmra.mxu3 %vm751_vm2, %v726_v20  ;;  %4818 = vmatmul.msk.bf16.gmra.mxu1 %vm751_vm2, %v1061_v23  ;;  %v5534_v20 = vld [vmem:[%s7758_s2 + $0xd8] sm:$0xff]  ;;  %v1064_v23 = vrot.slane %v5928_v26, 1  ;;  %v5533_v26 = vld [vmem:[%s7758_s2 + $0xd0] sm:$0xff] }
 0x108   : > { %v543_v28 = vpack.c.bf16 %v461_v18, %v461_v18  ;;  %1733 = vmatpush.bf16.msra.mxu2 %v5536_v8  ;;  %v1228_v18 = vsel %vm1175_vm7, %v1218_v38, %v1227_v15  ;;  %1563 = vmatpush.bf16.msra.mxu1 %v5534_v20 }
 0x109   : > { %v1163_v21 = vld [vmem:[#allocation2 + $0x38] sm:$0x3]  ;;  %v1065_v34 = vsel %vm896_vm4, %v1062_v47, %v1064_v23  ;;  %v5658_v47 = vld [vmem:[#allocation2] sm:$0xe] }
 0x10a   : > { %585 = vst.msk [vmem:[#allocation2 + $0x3c] sm:$0xf] %vm569_vm1, %v543_v28  ;;  %v1173_v35 = vunpack.c.l.b16 %v1163_v21  ;;  %v1015_v20 = vld [vmem:[#allocation2 + $0x38] sm:$0x1] }
 0x10c   : > { %v1174_v37 = vpack.c.b16 %v1173_v35, %v1173_v35  ;;  %1734 = vmatpush.bf16.msra.mxu2 %v5535_v14  ;;  %1564 = vmatpush.bf16.msra.mxu1 %v5533_v26 }
 0x10e   : > { %v1355_v39 = vrot.slane %v1174_v37, 2  ;;  %v1230_v28 = vshrl.u32 %v1174_v37, 16  ;;  %v1233_v21 = vshll.u32 %v1174_v37, 16 }
 0x10f   : > { %v464_v43 = vpop.f32.mrf.mxu0 }
 0x110   : > { %v544_v19 = vpack.c.bf16 %v464_v43, %v464_v43  ;;  %v5994_v40 = vsel %vm1343_vm5, %v1353_v16, %v1355_v39  ;;  %v1232_v35 = vrot.slane %v1230_v28, 1  ;;  %v5489_v39 = vld [vmem:[%s5747_s22 + $0x90] sm:$0xff]  ;;  %v5657_v43 = vld [vmem:[#allocation2] sm:$0xf0] }
 0x111   : > { %v5991_v44 = vld [vmem:[#allocation2 + $0x38] sm:$0xff]  ;;  %v5659_v51 = vor.u32 %v5658_v47, %v5657_v43 }
 0x112   : > { %586 = vst.msk [vmem:[#allocation2 + $0x40] sm:$0xf] %vm569_vm1, %v544_v19  ;;  %4690 = vmatmul.msk.bf16.gmra.mxu0 %vm351_vm0, %v5487_v53  ;;  %4842 = vmatmul.msk.bf16.gmra.mxu2 %vm751_vm2, %v1219_v45  ;;  %v1800_v52 = vrot.slane %v5991_v44, 3  ;;  %v1235_v53 = vrot.slane %v1233_v21, 2  ;;  %v1450_v45 = vld [vmem:[#allocation2 + $0x10] sm:$0xc] }
 0x113   : > { %v1484_v54 = vunpack.c.l.b16 %v1450_v45  ;;  %v897_v5 = vrot.slane %v5659_v51, 1  ;;  %v1641_v51 = vshrl.u32 %v5896_v56, 16 }
 0x114   : > { %v6013_v59 = vsel %vm1790_vm6, %v1798_v24, %v1800_v52  ;;  %v1236_v37 = vor.u32 %v1235_v53, %v1232_v35  ;;  %v5490_v35 = vld [vmem:[%s5747_s22 + $0x98] sm:$0xff] }
 0x115   : > { %v6063_v61 = vpack.c.b16 %v1485_v13, %v1484_v54 }
 0x116   : > { %v1237_v58 = vsel %vm1175_vm7, %v1227_v15, %v1236_v37  ;;  %v1635_v15 = vshll.u32 %v5864_v22, 16  ;;  %v5565_v37 = vld [vmem:[%s7758_s2 + $0x60] sm:$0xff] }
 0x117   : > { %v466_v60 = vpop.f32.mrf.mxu0  ;;  %4757 = vmatmul.msk.bf16.vlgmr.msrb.gmra.mxu3 %vm751_vm2, %v5887_v50  ;;  %4819 = vmatmul.msk.bf16.gmra.mxu1 %vm751_vm2, %v1063_v55  ;;  %v1066_v55 = vrot.slane %v5965_v3, 1  ;;  %v899_v3 = vsel %vm896_vm4, %v897_v5, %v898_v57  ;;  %v5566_v57 = vld [vmem:[%s7758_s2 + $0x68] sm:$0xff] }
 0x118   : > { %v545_v1 = vpack.c.bf16 %v466_v60, %v466_v60  ;;  %1403 = vmatpush.bf16.msrb.mxu3 %v5525_v7  ;;  %v5524_v60 = vld [vmem:[%s7758_s2 + $0xb0] sm:$0xff]  ;;  %v1637_v33 = vrot.slane %v1635_v15, 3  ;;  %2427 = vmatpush.bf16.msrb.mxu0 %v5566_v57  ;;  %v5523_v15 = vld [vmem:[%s7758_s2 + $0xa8] sm:$0xff] }
 0x11a   : > { %587 = vst.msk [vmem:[#allocation2 + $0x44] sm:$0xf] %vm569_vm1, %v545_v1  ;;  %v5531_v1 = vld [vmem:[%s7758_s2 + $0xc0] sm:$0xff] }
 0x11c   : > { %1404 = vmatpush.bf16.msrb.mxu3 %v5524_v60  ;;  %2428 = vmatpush.bf16.msrb.mxu0 %v5565_v37 }
 0x11f   : > { %v469_v50 = vpop.f32.mrf.mxu0 }
 0x120   : > { %v546_v16 = vpack.c.bf16 %v469_v50, %v469_v50  ;;  %v1067_v50 = vsel %vm896_vm4, %v1064_v23, %v1066_v55  ;;  %v1049_v23 = vunpack.c.l.b16 %v1015_v20  ;;  %1405 = vmatpush.bf16.msrb.mxu3 %v5523_v15 }
 0x122   : > { %588 = vst.msk [vmem:[#allocation2 + $0x48] sm:$0xf] %vm569_vm1, %v546_v16  ;;  %4691 = vmatmul.msk.bf16.gmra.mxu0 %vm351_vm0, %v5488_v12  ;;  %4843 = vmatmul.msk.bf16.gmra.mxu2 %vm751_vm2, %v1228_v18  ;;  %v1632_v12 = vshrl.u32 %v5864_v22, 16  ;;  %v1624_v16 = vshrl.u32 %v6063_v61, 16  ;;  %v1627_v18 = vshll.u32 %v6063_v61, 16 }
 0x124   : > { %v1626_v28 = vrot.slane %v1624_v16, 2  ;;  %v1629_v21 = vrot.slane %v1627_v18, 3  ;;  %v2312_v16 = vld [vmem:[#allocation2 + $0x38] sm:$0xe]  ;;  %v2313_v18 = vld [vmem:[#allocation2 + $0x3c] sm:$0xf] }
 0x125   : > { %v854_v24 = vpop.f32.mrf.mxu2  ;;  %v2347_v57 = vunpack.c.l.b16 %v2313_v18  ;;  %v2639_v18 = vld [vmem:[#allocation2 + $0x38] sm:$0xc] }
 0x127   : > { %v471_v32 = vpop.f32.mrf.mxu0  ;;  %4758 = vmatmul.msk.bf16.gmra.mxu3 %vm751_vm2, %v5916_v17  ;;  %4820 = vmatmul.msk.bf16.gmra.mxu1 %vm751_vm2, %v1065_v34  ;;  %v5532_v17 = vld [vmem:[%s7758_s2 + $0xc8] sm:$0xff] }
 0x128   : > { %v547_v25 = vpack.c.bf16 %v471_v32, %v471_v32  ;;  %1565 = vmatpush.bf16.msra.mxu1 %v5532_v17 }
 0x12a   : > { %589 = vst.msk [vmem:[#allocation2 + $0x4c] sm:$0xf] %vm569_vm1, %v547_v25 }
 0x12c   : > { %1566 = vmatpush.bf16.msra.mxu1 %v5531_v1  ;;  %v239_v1 = vld [vmem:[%s5747_s22 + $0xa0] sm:$0xf]  ;;  %s5677_s22 = smul.u32 288, %s7971_s16 }
 0x12d   : > { %v856_v38 = vpop.f32.mrf.mxu2  ;;  %v323_v5 = vunpack.c.l.b16 %v239_v1  ;;  %v1610_v1 = vld [vmem:[#allocation2 + $0x40] sm:$0x7] }
 0x12e   : > { %s6962_s27 = scalar_lea.vmem %s7760_s4, %s5677_s22 }
 0x12f   : > { %v474_v19 = vpop.f32.mrf.mxu0 }
 0x130   : > { %v548_v46 = vpack.c.bf16 %v474_v19, %v474_v19  ;;  %v1630_v19 = vor.u32 %v1629_v21, %v1626_v28  ;;  %v1504_v28 = vrot.slane %v6063_v61, 2 }
 0x132   : > { %590 = vst.msk [vmem:[#allocation2 + $0x50] sm:$0xf] %vm569_vm1, %v548_v46  ;;  %4692 = vmatmul.msk.bf16.gmra.mxu0 %vm351_vm0, %v5489_v39  ;;  %4844 = vmatmul.msk.bf16.gmra.mxu2 %vm751_vm2, %v1237_v58  ;;  %v1056_v39 = vpack.c.b16 %v1049_v23, %v1049_v23  ;;  %v1644_v58 = vshll.u32 %v5896_v56, 16 }
 0x134   : > { %v779_v2 = vpop.f32.mrf.mxu1  ;;  %v1068_v45 = vrot.slane %v1056_v39, 1 }
 0x135   : > { %v6068_v7 = vadd.f32 %v854_v24, %v779_v2  ;;  %v859_v8 = vpop.f32.mrf.mxu2  ;;  %v1634_v24 = vrot.slane %v1632_v12, 2  ;;  %v1646_v12 = vrot.slane %v1644_v58, 3 }
 0x136   : > { %v1069_v60 = vsel %vm896_vm4, %v1066_v55, %v1068_v45 }
 0x137   : > { %v476_v13 = vpop.f32.mrf.mxu0  ;;  %4775 = vmatmul.msk.bf16.vlgmr.msra.gmra.mxu3 %vm751_vm2, %v899_v3  ;;  %4821 = vmatmul.msk.bf16.gmra.mxu1 %vm751_vm2, %v1067_v50  ;;  %v1638_v53 = vor.u32 %v1637_v33, %v1634_v24  ;;  %v344_v3 = vpack.c.b16 %v323_v5, %v323_v5  ;;  %v1505_v24 = vrot.slane %v5864_v22, 2  ;;  %v2346_v33 = vunpack.c.l.b16 %v2312_v16  ;;  %v6150_v16 = vld [vmem:[#allocation2 + $0x48] sm:$0xff] }
 0x138   : > { %v549_v14 = vpack.c.bf16 %v476_v13, %v476_v13  ;;  %v1620_v5 = vunpack.c.l.b16 %v1610_v1 }
 0x139   : > { %v1506_v39 = vsel %vm1343_vm5, %v1504_v28, %v1505_v24  ;;  %v2359_v37 = vpack.c.b16 %v2347_v57, %v2346_v33 }
 0x13a   : > { %591 = vst.msk [vmem:[#allocation2 + $0x54] sm:$0xf] %vm569_vm1, %v549_v14  ;;  %v6141_v15 = vpack.c.b16 %v1620_v5, %v1620_v5 }
 0x13c   : > { %v781_v32 = vpop.f32.mrf.mxu1  ;;  %v1802_v33 = vrot.slane %v6141_v15, 3 }
 0x13d   : > { %v6087_v34 = vadd.f32 %v856_v38, %v781_v32  ;;  %v861_v25 = vpop.f32.mrf.mxu2  ;;  %v1639_v38 = vsel %vm1622_vm8, %v1630_v19, %v1638_v53  ;;  %v2366_v19 = vrot.slane %v2359_v37, 1 }
 0x13f   : > { %v479_v26 = vpop.f32.mrf.mxu0 }
 0x140   : > { %v550_v43 = vpack.c.bf16 %v479_v26, %v479_v26 }
 0x142   : > { %592 = vst.msk [vmem:[#allocation2 + $0x58] sm:$0xf] %vm569_vm1, %v550_v43  ;;  %4693 = vmatmul.msk.bf16.gmra.mxu0 %vm351_vm0, %v5490_v35  ;;  %4925 = vmatmul.msk.bf16.vlgmr.msra.gmra.mxu2 %vm751_vm2, %v1639_v38  ;;  %v1653_v35 = vshll.u32 %v5930_v27, 16 }
 0x144   : > { %v784_v46 = vpop.f32.mrf.mxu1  ;;  %v1655_v61 = vrot.slane %v1653_v35, 3 }
 0x145   : > { %v6097_v47 = vadd.f32 %v859_v8, %v784_v46  ;;  %v864_v17 = vpop.f32.mrf.mxu2  ;;  %v1643_v8 = vrot.slane %v1641_v51, 2 }
 0x147   : > { %v481_v54 = vpop.f32.mrf.mxu0  ;;  %4776 = vmatmul.msk.bf16.gmra.mxu3 %vm751_vm2, %v5833_v62  ;;  %4822 = vmatmul.msk.bf16.gmra.mxu1 %vm751_vm2, %v1069_v60  ;;  %v1647_v50 = vor.u32 %v1646_v12, %v1643_v8  ;;  %v1507_v8 = vrot.slane %v5896_v56, 2  ;;  %v2649_v56 = vunpack.c.l.b16 %v2639_v18  ;;  %v1668_v18 = vshrl.u32 %v5991_v44, 16 }
 0x148   : > { %v551_v2 = vpack.c.bf16 %v481_v54, %v481_v54 }
 0x149   : > { %v1648_v20 = vsel %vm1622_vm8, %v1638_v53, %v1647_v50  ;;  %v6123_v53 = vld [vmem:[#allocation2 + $0x40] sm:$0xff] }
 0x14a   : > { %593 = vst.msk [vmem:[#allocation2 + $0x5c] sm:$0xf] %vm569_vm1, %v551_v2  ;;  %v2367_v38 = vrot.slane %v6123_v53, 1  ;;  %v5522_v2 = vld [vmem:[%s7758_s2 + $0xa0] sm:$0xff] }
 0x14b   : > { %1406 = vmatpush.bf16.msrb.mxu3 %v5522_v2 }
 0x14c   : > { %v786_v6 = vpop.f32.mrf.mxu1  ;;  %v2368_v54 = vsel %vm896_vm4, %v2366_v19, %v2367_v38 }
 0x14d   : > { %v6110_v13 = vadd.f32 %v861_v25, %v786_v6  ;;  %v866_v55 = vpop.f32.mrf.mxu2  ;;  %v1650_v25 = vshrl.u32 %v5930_v27, 16 }
 0x14f   : > { %v484_v14 = vpop.f32.mrf.mxu0  ;;  %v1652_v22 = vrot.slane %v1650_v25, 2  ;;  %v2369_v25 = vrot.slane %v6150_v16, 1 }
 0x150   : > { %v552_v62 = vpack.c.bf16 %v484_v14, %v484_v14 }
 0x151   : > { %v1656_v51 = vor.u32 %v1655_v61, %v1652_v22  ;;  %v2493_v22 = vshrl.u32 %v6123_v53, 16  ;;  %v2496_v61 = vshll.u32 %v6123_v53, 16 }
 0x152   : > { %594 = vst.msk [vmem:[#allocation2 + $0x60] sm:$0xf] %vm569_vm1, %v552_v62  ;;  %4694 = vmatmul.msk.bf16.gmra.mxu0 %vm351_vm0, %v344_v3  ;;  %4926 = vmatmul.msk.bf16.gmra.mxu2 %vm751_vm2, %v1648_v20  ;;  %v1659_v3 = vshrl.u32 %v5970_v9, 16  ;;  %v1508_v62 = vsel %vm1343_vm5, %v1505_v24, %v1507_v8  ;;  %v6161_v24 = vsel %vm1790_vm6, %v1800_v52, %v1802_v33 }
 0x153   : > { %7777 = vst [vmem:[#allocation3_spill] sm:$0xff] %v6161_v24 }
 0x154   : > { %v789_v23 = vpop.f32.mrf.mxu1 }
 0x155   : > { %v6118_v21 = vadd.f32 %v864_v17, %v789_v23  ;;  %v869_v32 = vpop.f32.mrf.mxu2  ;;  %v1661_v23 = vrot.slane %v1659_v3, 2  ;;  %v1509_v3 = vrot.slane %v5930_v27, 2 }
 0x157   : > { %v486_v26 = vpop.f32.mrf.mxu0  ;;  %4777 = vmatmul.msk.bf16.gmra.mxu3 %vm751_vm2, %v5871_v29  ;;  %4903 = vmatmul.msk.bf16.vlgmr.msra.gmra.mxu1 %vm751_vm2, %v1506_v39  ;;  %v1657_v29 = vsel %vm1622_vm8, %v1647_v50, %v1656_v51  ;;  %v1662_v50 = vshll.u32 %v5970_v9, 16  ;;  %v1510_v27 = vsel %vm1343_vm5, %v1507_v8, %v1509_v3  ;;  %v5542_v8 = vld [vmem:[%s7758_s2 + $0x118] sm:$0xff] }
 0x158   : > { %v553_v43 = vpack.c.bf16 %v486_v26, %v486_v26  ;;  %v2485_v26 = vshrl.u32 %v2359_v37, 16  ;;  %1850 = vmatpush.bf16.msra.mxu3 %v5542_v8 }
 0x159   : > { %v1664_v28 = vrot.slane %v1662_v50, 3 }
 0x15a   : > { %595 = vst.msk [vmem:[#allocation2 + $0x64] sm:$0xf] %vm569_vm1, %v553_v43  ;;  %v2488_v43 = vshll.u32 %v2359_v37, 16  ;;  %v2495_v37 = vrot.slane %v2493_v22, 1 }
 0x15c   : > { %v791_v45 = vpop.f32.mrf.mxu1  ;;  %v2490_v1 = vrot.slane %v2488_v43, 2 }
 0x15d   : > { %v6130_v46 = vadd.f32 %v866_v55, %v791_v45  ;;  %v871_v17 = vpop.f32.mrf.mxu2  ;;  %v1665_v45 = vor.u32 %v1664_v28, %v1661_v23  ;;  %v5550_v23 = vld [vmem:[%s7758_s2 + $0x10] sm:$0xff]  ;;  %v1670_v28 = vrot.slane %v1668_v18, 2 }
 0x15f   : > { %v489_v58 = vpop.f32.mrf.mxu0 }
 0x160   : > { %v554_v60 = vpack.c.bf16 %v489_v58, %v489_v58  ;;  %v2487_v58 = vrot.slane %v2485_v26, 1 }
 0x162   : > { %596 = vst.msk [vmem:[#allocation2 + $0x68] sm:$0xf] %vm569_vm1, %v554_v60  ;;  %5075 = vmatmul.msk.bf16.vlgmr.msrb.gmra.mxu0 %vm751_vm2, %v2368_v54  ;;  %4927 = vmatmul.msk.bf16.gmra.mxu2 %vm751_vm2, %v1657_v29  ;;  %v2370_v60 = vsel %vm896_vm4, %v2367_v38, %v2369_v25  ;;  %v2498_v29 = vrot.slane %v2496_v61, 2  ;;  %v2491_v5 = vor.u32 %v2490_v1, %v2487_v58  ;;  %v5551_v38 = vld [vmem:[%s7758_s2 + $0x18] sm:$0xff] }
 0x163   : > { %2159 = vmatpush.bf16.msrb.mxu2 %v5551_v38 }
 0x164   : > { %v794_v12 = vpop.f32.mrf.mxu1 }
 0x165   : > { %v6143_v6 = vadd.f32 %v869_v32, %v794_v12  ;;  %v6145_v55 = vpop.f32.mrf.mxu2  ;;  %v2650_v32 = vpack.c.b16 %v2347_v57, %v2649_v56  ;;  %v6176_v12 = vor.u32 %v2498_v29, %v2495_v37  ;;  %v6197_v56 = vld [vmem:[#allocation2 + $0x50] sm:$0xff]  ;;  %v5555_v37 = vld [vmem:[%s7758_s2 + $0x38] sm:$0xff] }
 0x166   : > { %v2371_v26 = vrot.slane %v6197_v56, 1  ;;  %2084 = vmatpush.bf16.msrb.mxu1 %v5555_v37  ;;  %v5552_v37 = vld [vmem:[%s7758_s2 + $0x20] sm:$0xff] }
 0x167   : > { %v491_v14 = vpop.f32.mrf.mxu0  ;;  %4778 = vmatmul.msk.bf16.gmra.mxu3 %vm751_vm2, %v5902_v0  ;;  %4904 = vmatmul.msk.bf16.gmra.mxu1 %vm751_vm2, %v1508_v62  ;;  %v2651_v35 = vrot.slane %v2650_v32, 2  ;;  %v7761_v0 = vrot.slane %v6123_v53, 2  ;;  %v6188_v50 = vsel %vm1175_vm7, %v2491_v5, %v6176_v12 }
 0x168   : > { %v555_v20 = vpack.c.bf16 %v491_v14, %v491_v14  ;;  %2160 = vmatpush.bf16.msrb.mxu2 %v5550_v23  ;;  %v2372_v58 = vsel %vm896_vm4, %v2369_v25, %v2371_v26  ;;  %v1511_v25 = vrot.slane %v5970_v9, 2 }
 0x169   : > { %v6173_v52 = vsel %vm1343_vm5, %v2651_v35, %v7761_v0 }
 0x16a   : > { %597 = vst.msk [vmem:[#allocation2 + $0x6c] sm:$0xf] %vm569_vm1, %v555_v20  ;;  %v1512_v18 = vsel %vm1343_vm5, %v1509_v3, %v1511_v25  ;;  %v5554_v3 = vld [vmem:[%s7758_s2 + $0x30] sm:$0xff] }
 0x16b   : > { %2085 = vmatpush.bf16.msrb.mxu1 %v5554_v3 }
 0x16c   : > { %v796_v39 = vpop.f32.mrf.mxu1 }
 0x16d   : > { %v6166_v19 = vadd.f32 %v871_v17, %v796_v39  ;;  %v6168_v57 = vpop.f32.mrf.mxu2  ;;  %v1666_v17 = vsel %vm1622_vm8, %v1656_v51, %v1665_v45  ;;  %v1671_v51 = vshll.u32 %v5991_v44, 16 }
 0x16f   : > { %v494_v54 = vpop.f32.mrf.mxu0  ;;  %v1673_v32 = vrot.slane %v1671_v51, 3  ;;  %v6240_v51 = vld [vmem:[#allocation2 + $0x58] sm:$0xff] }
 0x170   : > { %v556_v2 = vpack.c.bf16 %v494_v54, %v494_v54  ;;  %v2373_v23 = vrot.slane %v6240_v51, 1 }
 0x171   : > { %v1674_v22 = vor.u32 %v1673_v32, %v1670_v28 }
 0x172   : > { %598 = vst.msk [vmem:[#allocation2 + $0x70] sm:$0xf] %vm569_vm1, %v556_v2  ;;  %5076 = vmatmul.msk.bf16.gmra.mxu0 %vm751_vm2, %v2370_v60  ;;  %4928 = vmatmul.msk.bf16.gmra.mxu2 %vm751_vm2, %v1666_v17  ;;  %v5548_v60 = vld [vmem:[%s7758_s2] sm:$0xff]  ;;  %v1677_v17 = vshrl.u32 %v6141_v15, 16  ;;  %v2374_v8 = vsel %vm896_vm4, %v2371_v26, %v2373_v23  ;;  %v5589_v26 = vld [vmem:[%s7758_s2 + $0xf8] sm:$0xff] }
 0x173   : > { %v1675_v1 = vsel %vm1622_vm8, %v1665_v45, %v1674_v22  ;;  %v1680_v45 = vshll.u32 %v6141_v15, 16  ;;  %3037 = vmatpush.bf16.msra.mxu0 %v5589_v26  ;;  %v2324_v26 = vld [vmem:[#allocation2 + $0x68] sm:$0x1] }
 0x174   : > { %v6190_v14 = vpop.f32.mrf.mxu1  ;;  %v1679_v9 = vrot.slane %v1677_v17, 2 }
 0x175   : > { %v6192_v62 = vpop.f32.mrf.mxu2 }
 0x177   : > { %v496_v20 = vpop.f32.mrf.mxu0  ;;  %4779 = vmatmul.msk.bf16.gmra.mxu3 %vm751_vm2, %v5937_v36  ;;  %4905 = vmatmul.msk.bf16.gmra.mxu1 %vm751_vm2, %v1510_v27  ;;  %v5549_v36 = vld [vmem:[%s7758_s2 + $0x8] sm:$0xff]  ;;  %v1682_v27 = vrot.slane %v1680_v45, 3 }
 0x178   : > { %v557_v33 = vpack.c.bf16 %v496_v20, %v496_v20  ;;  %2161 = vmatpush.bf16.msrb.mxu2 %v5549_v36 }
 0x179   : > { %v1683_v32 = vor.u32 %v1682_v27, %v1679_v9  ;;  %v5588_v9 = vld [vmem:[%s7758_s2 + $0xf0] sm:$0xff] }
 0x17a   : > { %599 = vst.msk [vmem:[#allocation2 + $0x74] sm:$0xf] %vm569_vm1, %v557_v33  ;;  %v6209_v35 = vpop.f32.mrf.mxu3  ;;  %3038 = vmatpush.bf16.msra.mxu0 %v5588_v9 }
 0x17c   : > { %v6215_v39 = vpop.f32.mrf.mxu1  ;;  %2162 = vmatpush.bf16.msrb.mxu2 %v5548_v60 }
 0x17d   : > { %v6217_v43 = vpop.f32.mrf.mxu2 }
 0x17f   : > { %v499_v61 = vpop.f32.mrf.mxu0 }
 0x180   : > { %v558_v54 = vpack.c.bf16 %v499_v61, %v499_v61  ;;  %v1684_v61 = vsel %vm1622_vm8, %v1674_v22, %v1683_v32 }
 0x182   : > { %600 = vst.msk [vmem:[#allocation2 + $0x78] sm:$0xf] %vm569_vm1, %v558_v54  ;;  %5077 = vmatmul.msk.bf16.gmra.mxu0 %vm751_vm2, %v2372_v58  ;;  %v6229_v29 = vpop.f32.mrf.mxu3  ;;  %4929 = vmatmul.msk.bf16.gmra.mxu2 %vm751_vm2, %v1675_v1  ;;  %v5541_v58 = vld [vmem:[%s7758_s2 + $0x110] sm:$0xff]  ;;  %v5553_v54 = vld [vmem:[%s7758_s2 + $0x28] sm:$0xff]  ;;  %v1513_v1 = vrot.slane %v5991_v44, 2 }
 0x183   : > { %1851 = vmatpush.bf16.msra.mxu3 %v5541_v58  ;;  %2086 = vmatpush.bf16.msrb.mxu1 %v5553_v54  ;;  %v1462_v44 = vld [vmem:[#allocation2 + $0x40] sm:$0x3] }
 0x184   : > { %v6233_v2 = vpop.f32.mrf.mxu1 }
 0x185   : > { %v6235_v5 = vpop.f32.mrf.mxu2 }
 0x187   : > { %v501_v38 = vpop.f32.mrf.mxu0  ;;  %4780 = vmatmul.msk.bf16.gmra.mxu3 %vm751_vm2, %v5957_v63  ;;  %4906 = vmatmul.msk.bf16.gmra.mxu1 %vm751_vm2, %v1512_v18  ;;  %v6281_v18 = vld [vmem:[#allocation2 + $0x60] sm:$0xff] }
 0x188   : > { %v559_v20 = vpack.c.bf16 %v501_v38, %v501_v38  ;;  %v1514_v38 = vsel %vm1343_vm5, %v1511_v25, %v1513_v1  ;;  %2087 = vmatpush.bf16.msrb.mxu1 %v5552_v37  ;;  %v2375_v3 = vrot.slane %v6281_v18, 1  ;;  %v1496_v25 = vunpack.c.l.b16 %v1462_v44  ;;  %v5586_v37 = vld [vmem:[%s7758_s2 + $0xe0] sm:$0xff] }
 0x18a   : > { %601 = vst.msk [vmem:[#allocation2 + $0x7c] sm:$0xf] %vm569_vm1, %v559_v20  ;;  %v6246_v33 = vpop.f32.mrf.mxu3  ;;  %v1503_v58 = vpack.c.b16 %v1496_v25, %v1496_v25 }
 0x18c   : > { %v6249_v15 = vpop.f32.mrf.mxu1 }
 0x18d   : > { %v6254_v28 = vpop.f32.mrf.mxu2 }
 0x18f   : > { %v504_v63 = vpop.f32.mrf.mxu0 }
 0x190   : > { %v560_v36 = vpack.c.bf16 %v504_v63, %v504_v63 }
 0x192   : > { %602 = vst.msk [vmem:[#allocation2 + $0x80] sm:$0xf] %vm569_vm1, %v560_v36  ;;  %5078 = vmatmul.msk.bf16.gmra.mxu0 %vm751_vm2, %v2374_v8  ;;  %v6269_v60 = vpop.f32.mrf.mxu3  ;;  %4930 = vmatmul.msk.bf16.gmra.mxu2 %vm751_vm2, %v1684_v61  ;;  %v2376_v61 = vsel %vm896_vm4, %v2373_v23, %v2375_v3 }
 0x194   : > { %v6273_v22 = vpop.f32.mrf.mxu1 }
 0x195   : > { %v6278_v17 = vpop.f32.mrf.mxu2 }
 0x196   : > { %7778 = vst [vmem:[#allocation4_spill] sm:$0xff] %v6278_v17 }
 0x197   : > { %v506_v45 = vpop.f32.mrf.mxu0  ;;  %4861 = vmatmul.msk.bf16.vlgmr.msrb.gmra.mxu3 %vm751_vm2, %v5841_v4  ;;  %4907 = vmatmul.msk.bf16.gmra.mxu1 %vm751_vm2, %v1514_v38  ;;  %v5587_v4 = vld [vmem:[%s7758_s2 + $0xe8] sm:$0xff]  ;;  %v1515_v38 = vrot.slane %v1503_v58, 2  ;;  %v6319_v58 = vld [vmem:[#allocation2 + $0x44] sm:$0xf] }
 0x198   : > { %v561_v20 = vpack.c.bf16 %v506_v45, %v506_v45  ;;  %3039 = vmatpush.bf16.msra.mxu0 %v5587_v4 }
 0x199   : > { %v1516_v25 = vsel %vm1343_vm5, %v1513_v1, %v1515_v38 }
 0x19a   : > { %603 = vst.msk [vmem:[#allocation2 + $0x84] sm:$0xf] %vm569_vm1, %v561_v20  ;;  %v874_v27 = vpop.f32.mrf.mxu3  ;;  %v2358_v20 = vunpack.c.l.b16 %v2324_v26 }
 0x19b   : > { %v6292_v32 = vadd.f32 %v874_v27, %v6209_v35  ;;  %v5660_v35 = vld [vmem:[#allocation2 + $0x30] sm:$0xff]  }
 0x19c   : > { %v6297_v63 = vpop.f32.mrf.mxu1  ;;  %3040 = vmatpush.bf16.msra.mxu0 %v5586_v37  ;;  %v2365_v4 = vpack.c.b16 %v2358_v20, %v2358_v20  ;;  %v1989_v38 = vshll.u32 %v5660_v35, 16 }
 0x19d   : > { %v6299_v8 = vpop.f32.mrf.mxu2 }
 0x19e   : > { %7779 = vst [vmem:[#allocation5_spill] sm:$0xff] %v6299_v8  ;;  %v2377_v1 = vrot.slane %v2365_v4, 1 }
 0x19f   : > { %v509_v36 = vpop.f32.mrf.mxu0 }
 0x1a0   : > { %v562_v54 = vpack.c.bf16 %v509_v36, %v509_v36  ;;  %v2378_v0 = vsel %vm896_vm4, %v2375_v3, %v2377_v1 }
 0x1a2   : > { %604 = vst.msk [vmem:[#allocation2 + $0x88] sm:$0xf] %vm569_vm1, %v562_v54  ;;  %5079 = vmatmul.msk.bf16.gmra.mxu0 %vm751_vm2, %v2376_v61  ;;  %v876_v45 = vpop.f32.mrf.mxu3  ;;  %5011 = vmatmul.msk.bf16.vlgmr.msrb.gmra.mxu2 %vm751_vm2, %v5660_v35  ;;  %v2757_v61 = vld [vmem:[#allocation2 + $0x40] sm:$0xc]  ;;  %v5540_v54 = vld [vmem:[%s7758_s2 + $0x108] sm:$0xff] }
 0x1a3   : > { %v6309_v23 = vadd.f32 %v876_v45, %v6229_v29  ;;  %v6322_v29 = vld [vmem:[#allocation2 + $0x38] sm:$0xff]  ;;  %v2791_v37 = vunpack.c.l.b16 %v2757_v61  ;;  %v7762_v45 = vunpack.c.l.b16 %v6319_v58  ;;  %1852 = vmatpush.bf16.msra.mxu3 %v5540_v54  ;;  %v1991_v61 = vrot.slane %v1989_v38, 1 }
 0x1a4   : > { %v6311_v44 = vpop.f32.mrf.mxu1 }
 0x1a5   : > { %7780 = vst [vmem:[#allocation6_spill] sm:$0xff] %v6311_v44  ;;  %v6313_v9 = vpop.f32.mrf.mxu2  ;;  %v6341_v4 = vpack.c.b16 %v7762_v45, %v2791_v37 }
 0x1a6   : > { %7781 = vst [vmem:[#allocation7_spill] sm:$0xff] %v6313_v9  ;;  %v6337_v9 = vld [vmem:[#allocation2 + $0x48] sm:$0xff] }
 0x1a7   : > { %v511_v27 = vpop.f32.mrf.mxu0  ;;  %4862 = vmatmul.msk.bf16.gmra.mxu3 %vm751_vm2, %v5881_v41  ;;  %4908 = vmatmul.msk.bf16.gmra.mxu1 %vm751_vm2, %v1516_v25  ;;  %v1994_v25 = vshll.u32 %v6322_v29, 16  ;;  %7784 = vst [vmem:[#allocation10_spill] sm:$0xff] %v6337_v9  ;;  %v2930_v3 = vshrl.u32 %v6341_v4, 16  ;;  %v2933_v1 = vshll.u32 %v6341_v4, 16  ;;  %v2941_v37 = vshll.u32 %v6337_v9, 16 }
 0x1a8   : > { %v563_v36 = vpack.c.bf16 %v511_v27, %v511_v27 }
 0x1a9   : > { %v1996_v54 = vrot.slane %v1994_v25, 1  ;;  %v2932_v45 = vrot.slane %v2930_v3, 2  ;;  %v2943_v24 = vrot.slane %v2941_v37, 3 }
 0x1aa   : > { %605 = vst.msk [vmem:[#allocation2 + $0x8c] sm:$0xf] %vm569_vm1, %v563_v36  ;;  %v879_v26 = vpop.f32.mrf.mxu3 }
 0x1ab   : > { %v6329_v41 = vadd.f32 %v879_v26, %v6246_v33  ;;  %v1987_v33 = vshrl.u32 %v5660_v35, 16 }
 0x1ac   : > { %v6331_v20 = vpop.f32.mrf.mxu1 }
 0x1ad   : > { %7782 = vst [vmem:[#allocation8_spill] sm:$0xff] %v6331_v20  ;;  %v6333_v27 = vpop.f32.mrf.mxu2  ;;  %v1992_v38 = vor.u32 %v1991_v61, %v1987_v33  ;;  %v2935_v20 = vrot.slane %v2933_v1, 3 }
 0x1ae   : > { %7783 = vst [vmem:[#allocation9_spill] sm:$0xff] %v6333_v27  ;;  %v2938_v27 = vshrl.u32 %v6337_v9, 16 }
 0x1af   : > { %v514_v36 = vpop.f32.mrf.mxu0  ;;  %v1997_v25 = vsel %vm674_vm3, %v1992_v38, %v1996_v54  ;;  %v2936_v61 = vor.u32 %v2935_v20, %v2932_v45 }
 0x1b0   : > { %v564_v8 = vpack.c.bf16 %v514_v36, %v514_v36  ;;  %v2940_v17 = vrot.slane %v2938_v27, 2 }
 0x1b2   : > { %606 = vst.msk [vmem:[#allocation2 + $0x90] sm:$0xf] %vm569_vm1, %v564_v8  ;;  %5080 = vmatmul.msk.bf16.gmra.mxu0 %vm751_vm2, %v2378_v0  ;;  %v881_v26 = vpop.f32.mrf.mxu3  ;;  %5012 = vmatmul.msk.bf16.gmra.mxu2 %vm751_vm2, %v6322_v29  ;;  %v2944_v33 = vor.u32 %v2943_v24, %v2940_v17  ;;  %v5539_v24 = vld [vmem:[%s7758_s2 + $0x100] sm:$0xff] }
 0x1b3   : > { %v6352_v35 = vadd.f32 %v881_v26, %v6269_v60  ;;  %v6363_v26 = vld [vmem:[#allocation2 + $0x40] sm:$0xff]  ;;  %1853 = vmatpush.bf16.msra.mxu3 %v5539_v24 }
 0x1b4   : > { %v6354_v8 = vpop.f32.mrf.mxu1  ;;  %v2945_v37 = vsel %vm1622_vm8, %v2936_v61, %v2944_v33 }
 0x1b5   : > { %7785 = vst [vmem:[#allocation11_spill] sm:$0xff] %v6354_v8  ;;  %v6356_v0 = vpop.f32.mrf.mxu2 }
 0x1b6   : > { %7786 = vst [vmem:[#allocation12_spill] sm:$0xff] %v6356_v0 }
 0x1b7   : > { %v516_v36 = vpop.f32.mrf.mxu0  ;;  %4863 = vmatmul.msk.bf16.gmra.mxu3 %vm751_vm2, %v5910_v10  ;;  %4989 = vmatmul.msk.bf16.vlgmr.msrb.gmra.mxu1 %vm751_vm2, %v1997_v25  ;;  %v1998_v10 = vshrl.u32 %v6322_v29, 16  ;;  %v2002_v25 = vshll.u32 %v6363_v26, 16 }
 0x1b8   : > { %v565_v44 = vpack.c.bf16 %v516_v36, %v516_v36 }
 0x1b9   : > { %v2000_v45 = vor.u32 %v1998_v10, %v1996_v54  ;;  %v2004_v20 = vrot.slane %v2002_v25, 1  ;;  %v6393_v54 = vld [vmem:[#allocation2 + $0x48] sm:$0xff] }
 0x1ba   : > { %607 = vst.msk [vmem:[#allocation2 + $0x94] sm:$0xf] %vm569_vm1, %v565_v44  ;;  %v961_v60 = vpop.f32.mrf.mxu3  ;;  %v5578_v44 = vld [vmem:[#allocation2 + $0x50] sm:$0xff] }
 0x1bb   : > { %v6366_v38 = vadd.f32 %v961_v60, %v6068_v7  ;;  %v2947_v36 = vshrl.u32 %v5578_v44, 16  ;;  %v2950_v60 = vshll.u32 %v5578_v44, 16  ;;  %v2005_v24 = vsel %vm674_vm3, %v2000_v45, %v2004_v20 }
 0x1bc   : > { %v6368_v3 = vpop.f32.mrf.mxu1  ;;  %v7790_v45 = vunpack.c.l.b16 %v6319_v58 }
 0x1bd   : > { %7787 = vst [vmem:[#allocation13_spill] sm:$0xff] %v6368_v3  ;;  %v6370_v27 = vpop.f32.mrf.mxu2  ;;  %v3084_v3 = vld [vmem:[#allocation2 + $0x40] sm:$0x8] }
 0x1be   : > { %7788 = vst [vmem:[#allocation14_spill] sm:$0xff] %v6370_v27 }
 0x1bf   : > { %v519_v1 = vpop.f32.mrf.mxu0 }
 0x1c0   : > { %v566_v17 = vpack.c.bf16 %v519_v1, %v519_v1 }
 0x1c2   : > { %608 = vst.msk [vmem:[#allocation2 + $0x98] sm:$0xf] %vm569_vm1, %v566_v17  ;;  %5183 = vmatmul.msk.bf16.vlgmr.msra.gmra.mxu0 %vm751_vm2, %v2945_v37  ;;  %v963_v7 = vpop.f32.mrf.mxu3  ;;  %5013 = vmatmul.msk.bf16.gmra.mxu2 %vm751_vm2, %v6363_v26  ;;  %v2949_v17 = vrot.slane %v2947_v36, 2  ;;  %v2952_v37 = vrot.slane %v2950_v60, 3 }
 0x1c3   : > { %v6383_v61 = vadd.f32 %v963_v7, %v6087_v34  ;;  %v3094_v34 = vunpack.c.l.b16 %v3084_v3  ;;  %v2006_v7 = vshrl.u32 %v6363_v26, 16 }
 0x1c4   : > { %v6385_v27 = vpop.f32.mrf.mxu1  ;;  %v2953_v25 = vor.u32 %v2952_v37, %v2949_v17 }
 0x1c5   : > { %v6387_v0 = vpop.f32.mrf.mxu2  ;;  %v3095_v36 = vpack.c.b16 %v7790_v45, %v3094_v34  ;;  %v2008_v45 = vor.u32 %v2006_v7, %v2004_v20 }
 0x1c6   : > { %7789 = vst [vmem:[#allocation15_spill] sm:$0xff] %v6387_v0  ;;  %v2954_v37 = vsel %vm1622_vm8, %v2944_v33, %v2953_v25 }
 0x1c7   : > { %v521_v1 = vpop.f32.mrf.mxu0  ;;  %4864 = vmatmul.msk.bf16.gmra.mxu3 %vm751_vm2, %v5950_v48  ;;  %4990 = vmatmul.msk.bf16.gmra.mxu1 %vm751_vm2, %v2005_v24  ;;  %v2010_v48 = vshll.u32 %v6393_v54, 16  ;;  %v2811_v24 = vrot.slane %v6341_v4, 2  ;;  %v3096_v17 = vrot.slane %v3095_v36, 3 }
 0x1c8   : > { %v567_v8 = vpack.c.bf16 %v521_v1, %v521_v1  ;;  %v7764_v1 = vrot.slane %v6337_v9, 3 }
 0x1c9   : > { %v2012_v0 = vrot.slane %v2010_v48, 1 }
 0x1ca   : > { %609 = vst.msk [vmem:[#allocation2 + $0x9c] sm:$0xf] %vm569_vm1, %v567_v8  ;;  %v966_v10 = vpop.f32.mrf.mxu3  ;;  %v7763_v8 = vrot.slane %v6337_v9, 2  ;;  %v6419_v4 = vsel %vm1790_vm6, %v3096_v17, %v7764_v1  ;;  %v5576_v17 = vld [vmem:[%s7758_s2 + $0xb8] sm:$0xff]  ;;  %v5580_v1 = vld [vmem:[#allocation2 + $0x60] sm:$0xff] }
 0x1cb   : > { %v6397_v44 = vadd.f32 %v966_v10, %v6097_v47  ;;  %v5579_v10 = vld [vmem:[#allocation2 + $0x58] sm:$0xff]  ;;  %v2013_v7 = vsel %vm674_vm3, %v2008_v45, %v2012_v0  ;;  %2710 = vmatpush.bf16.msra.mxu2 %v5576_v17  ;;  %v5575_v45 = vld [vmem:[%s7758_s2 + $0xb0] sm:$0xff]  ;;  %v5574_v17 = vld [vmem:[%s7758_s2 + $0xa8] sm:$0xff] }
 0x1cc   : > { %v6402_v60 = vpop.f32.mrf.mxu1  ;;  %v6414_v58 = vsel %vm1343_vm5, %v2811_v24, %v7763_v8  ;;  %v2956_v33 = vshrl.u32 %v5579_v10, 16 }
 0x1cd   : > { %v6408_v3 = vpop.f32.mrf.mxu2  ;;  %7792 = vst [vmem:[#allocation17_spill] sm:$0xff] %v6414_v58  ;;  %v2965_v58 = vshrl.u32 %v5580_v1, 16 }
 0x1ce   : > { %7791 = vst [vmem:[#allocation16_spill] sm:$0xff] %v6408_v3  ;;  %v2959_v3 = vshll.u32 %v5579_v10, 16  ;;  %v6442_v10 = vld [vmem:[#allocation2 + $0x50] sm:$0xff] }
 0x1cf   : > { %v524_v47 = vpop.f32.mrf.mxu0  ;;  %2711 = vmatpush.bf16.msra.mxu2 %v5575_v45  ;;  %v5572_v45 = vld [vmem:[%s7758_s2 + $0x98] sm:$0xff] }
 0x1d0   : > { %v568_v34 = vpack.c.bf16 %v524_v47, %v524_v47  ;;  %2592 = vmatpush.bf16.msra.mxu1 %v5572_v45 }
 0x1d2   : > { %610 = vst.msk [vmem:[#allocation2 + $0xa0] sm:$0xf] %vm569_vm1, %v568_v34  ;;  %5184 = vmatmul.msk.bf16.gmra.mxu0 %vm751_vm2, %v2954_v37  ;;  %v968_v36 = vpop.f32.mrf.mxu3  ;;  %5014 = vmatmul.msk.bf16.gmra.mxu2 %vm751_vm2, %v6393_v54  ;;  %v2958_v37 = vrot.slane %v2956_v33, 2  ;;  %v2961_v34 = vrot.slane %v2959_v3, 3 }
 0x1d3   : > { %v6426_v24 = vadd.f32 %v968_v36, %v6110_v13  ;;  %v5559_v13 = vld [vmem:[%s7758_s2 + $0x58] sm:$0xff]  ;;  %2712 = vmatpush.bf16.msra.mxu2 %v5574_v17 }
 0x1d4   : > { %v6428_v20 = vpop.f32.mrf.mxu1  ;;  %2265 = vmatpush.bf16.msrb.mxu3 %v5559_v13  ;;  %v2962_v33 = vor.u32 %v2961_v34, %v2958_v37 }
 0x1d5   : > { %v6431_v48 = vpop.f32.mrf.mxu2 }
 0x1d6   : > { %7793 = vst [vmem:[#allocation18_spill] sm:$0xff] %v6431_v48  ;;  %v2963_v13 = vsel %vm1622_vm8, %v2953_v25, %v2962_v33  ;;  %v2968_v25 = vshll.u32 %v5580_v1, 16  ;;  %v6480_v48 = vld [vmem:[#allocation2 + $0x58] sm:$0xff] }
 0x1d7   : > { %v526_v47 = vpop.f32.mrf.mxu0  ;;  %4865 = vmatmul.msk.bf16.gmra.mxu3 %vm751_vm2, %v5981_v30  ;;  %4991 = vmatmul.msk.bf16.gmra.mxu1 %vm751_vm2, %v2013_v7  ;;  %v2014_v7 = vshrl.u32 %v6393_v54, 16 }
 0x1d8   : > { %v2018_v47 = vshll.u32 %v6442_v10, 16 }
 0x1d9   : > { %v2016_v37 = vor.u32 %v2014_v7, %v2012_v0 }
 0x1da   : > { %v971_v36 = vpop.f32.mrf.mxu3  ;;  %v2020_v34 = vrot.slane %v2018_v47, 1 }
 0x1db   : > { %v6448_v3 = vadd.f32 %v971_v36, %v6118_v21  ;;  %v5573_v21 = vld [vmem:[%s7758_s2 + $0xa0] sm:$0xff] }
 0x1dc   : > { %v6450_v30 = vpop.f32.mrf.mxu1  ;;  %v2021_v47 = vsel %vm674_vm3, %v2016_v37, %v2020_v34  ;;  %2713 = vmatpush.bf16.msra.mxu2 %v5573_v21  ;;  %v2022_v21 = vshrl.u32 %v6442_v10, 16 }
 0x1dd   : > { %7794 = vst [vmem:[#allocation19_spill] sm:$0xff] %v6450_v30  ;;  %v6454_v8 = vpop.f32.mrf.mxu2 }
 0x1de   : > { %7795 = vst [vmem:[#allocation20_spill] sm:$0xff] %v6454_v8  ;;  %v2970_v8 = vrot.slane %v2968_v25, 3 }
 0x1e2   : > { %5185 = vmatmul.msk.bf16.gmra.mxu0 %vm751_vm2, %v2963_v13  ;;  %v973_v36 = vpop.f32.mrf.mxu3  ;;  %5015 = vmatmul.msk.bf16.gmra.mxu2 %vm751_vm2, %v6442_v10  ;;  %v2967_v13 = vrot.slane %v2965_v58, 2  ;;  %v2026_v58 = vshll.u32 %v6480_v48, 16 }
 0x1e3   : > { %v6470_v0 = vadd.f32 %v973_v36, %v6130_v46  ;;  %v6482_v36 = vpop.f32.mrf.mxu0 }
 0x1e4   : > { %v6472_v7 = vpop.f32.mrf.mxu1  ;;  %v2971_v46 = vor.u32 %v2970_v8, %v2967_v13  ;;  %7798 = vst [vmem:[#allocation23_spill] sm:$0xff] %v6482_v36  ;;  %v5581_v8 = vld [vmem:[#allocation2 + $0x68] sm:$0xff]  ;;  %v2028_v36 = vrot.slane %v2026_v58, 1 }
 0x1e5   : > { %7796 = vst [vmem:[#allocation21_spill] sm:$0xff] %v6472_v7  ;;  %v6475_v17 = vpop.f32.mrf.mxu2  ;;  %v5570_v13 = vld [vmem:[%s7758_s2 + $0x88] sm:$0xff]  ;;  %v5569_v7 = vld [vmem:[%s7758_s2 + $0x80] sm:$0xff] }
 0x1e6   : > { %7797 = vst [vmem:[#allocation22_spill] sm:$0xff] %v6475_v17 }
 0x1e7   : > { %4866 = vmatmul.msk.bf16.gmra.mxu3 %vm751_vm2, %v5994_v40  ;;  %4992 = vmatmul.msk.bf16.gmra.mxu1 %vm751_vm2, %v2021_v47  ;;  %v5571_v40 = vld [vmem:[%s7758_s2 + $0x90] sm:$0xff]  ;;  %v2972_v47 = vsel %vm1622_vm8, %v2962_v33, %v2971_v46  ;;  %v5610_v33 = vld [vmem:[%s7758_s2 + $0x58] sm:$0xff] }
 0x1e8   : > { %2593 = vmatpush.bf16.msra.mxu1 %v5571_v40  ;;  %v2977_v40 = vshll.u32 %v5581_v8, 16  ;;  %3567 = vmatpush.bf16.msrb.mxu0 %v5610_v33 }
 0x1ea   : > { %v976_v1 = vpop.f32.mrf.mxu3 }
 0x1eb   : > { %v6485_v45 = vadd.f32 %v976_v1, %v6143_v6  ;;  %v5558_v6 = vld [vmem:[%s7758_s2 + $0x50] sm:$0xff]  ;;  %v2024_v1 = vor.u32 %v2022_v21, %v2020_v34 }
 0x1ec   : > { %v6487_v37 = vpop.f32.mrf.mxu1  ;;  %2266 = vmatpush.bf16.msrb.mxu3 %v5558_v6  ;;  %2594 = vmatpush.bf16.msra.mxu1 %v5570_v13  ;;  %v5608_v13 = vld [vmem:[%s7758_s2 + $0x48] sm:$0xff] }
 0x1ed   : > { %7799 = vst [vmem:[#allocation24_spill] sm:$0xff] %v6487_v37  ;;  %v6491_v25 = vpop.f32.mrf.mxu2  ;;  %v2974_v37 = vshrl.u32 %v5581_v8, 16  ;;  %v2029_v21 = vsel %vm674_vm3, %v2024_v1, %v2028_v36  ;;  %v2979_v8 = vrot.slane %v2977_v40, 3 }
 0x1ee   : > { %7800 = vst [vmem:[#allocation25_spill] sm:$0xff] %v6491_v25  ;;  %v1944_v25 = vld [vmem:[#allocation2 + $0x60] sm:$0x1] }
 0x1ef   : > { %v1978_v58 = vunpack.c.l.b16 %v1944_v25  ;;  %v2976_v30 = vrot.slane %v2974_v37, 2  ;;  %v2213_v37 = vrot.slane %v6442_v10, 1 }
 0x1f0   : > { %2595 = vmatpush.bf16.msra.mxu1 %v5569_v7 }
 0x1f1   : > { %v6528_v25 = vpack.c.b16 %v1978_v58, %v1978_v58  ;;  %v2980_v33 = vor.u32 %v2979_v8, %v2976_v30  ;;  %v2030_v58 = vshrl.u32 %v6480_v48, 16 }
 0x1f2   : > { %5186 = vmatmul.msk.bf16.gmra.mxu0 %vm751_vm2, %v2972_v47  ;;  %v978_v17 = vpop.f32.mrf.mxu3  ;;  %5016 = vmatmul.msk.bf16.gmra.mxu2 %vm751_vm2, %v6480_v48  ;;  %v6515_v47 = vpop.f32.mrf.mxu0 }
 0x1f3   : > { %v6510_v9 = vadd.f32 %v978_v17, %v6166_v19  ;;  %7801 = vst [vmem:[#allocation26_spill] sm:$0xff] %v6515_v47  ;;  %v5609_v19 = vld [vmem:[%s7758_s2 + $0x50] sm:$0xff]  ;;  %v7767_v47 = vrot.slane %v6393_v54, 1  ;;  %v2034_v7 = vshll.u32 %v6528_v25, 16  ;;  %v2981_v30 = vsel %vm1622_vm8, %v2971_v46, %v2980_v33 }
 0x1f4   : > { %v6512_v34 = vpop.f32.mrf.mxu1  ;;  %v2917_v17 = vld [vmem:[#allocation2 + $0x70] sm:$0x7]  ;;  %3568 = vmatpush.bf16.msrb.mxu0 %v5609_v19 }
 0x1f5   : > { %v6517_v6 = vpop.f32.mrf.mxu2  ;;  %v2927_v40 = vunpack.c.l.b16 %v2917_v17  ;;  %v6545_v19 = vsel %vm896_vm4, %v7767_v47, %v2213_v37 }
 0x1f6   : > { %7802 = vst [vmem:[#allocation27_spill] sm:$0xff] %v6517_v6  ;;  %v2036_v6 = vrot.slane %v2034_v7, 1 }
 0x1f7   : > { %4947 = vmatmul.msk.bf16.vlgmr.msra.gmra.mxu3 %vm751_vm2, %v5884_v42  ;;  %4993 = vmatmul.msk.bf16.gmra.mxu1 %vm751_vm2, %v2029_v21  ;;  %v6550_v8 = vpack.c.b16 %v2927_v40, %v2927_v40 }
 0x1f8   : > { %3569 = vmatpush.bf16.msrb.mxu0 %v5608_v13 }
 0x1f9   : > { %7804 = vst [vmem:[#allocation29_spill] sm:$0xff] %v6550_v8  ;;  %v2983_v47 = vshrl.u32 %v6550_v8, 16  ;;  %v2986_v46 = vshll.u32 %v6550_v8, 16 }
 0x1fa   : > { %v981_v1 = vpop.f32.mrf.mxu3  ;;  %v6555_v17 = vpop.f32.mrf.mxu0 }
 0x1fb   : > { %v6536_v42 = vadd.f32 %v981_v1, %v6292_v32  ;;  %v5607_v32 = vld [vmem:[%s7758_s2 + $0x40] sm:$0xff]  ;;  %7805 = vst [vmem:[#allocation30_spill] sm:$0xff] %v6555_v17  ;;  %v2032_v1 = vor.u32 %v2030_v58, %v2028_v36  ;;  %v2985_v58 = vrot.slane %v2983_v47, 2  ;;  %v2988_v7 = vrot.slane %v2986_v46, 3 }
 0x1fc   : > { %v6538_v21 = vpop.f32.mrf.mxu1  ;;  %3570 = vmatpush.bf16.msrb.mxu0 %v5607_v32 }
 0x1fd   : > { %v6547_v10 = vpop.f32.mrf.mxu2  ;;  %v2037_v17 = vsel %vm674_vm3, %v2032_v1, %v2036_v6  ;;  %v2989_v6 = vor.u32 %v2988_v7, %v2985_v58 }
 0x1fe   : > { %7803 = vst [vmem:[#allocation28_spill] sm:$0xff] %v6547_v10 }
 0x1ff   : > { %v2990_v46 = vsel %vm1622_vm8, %v2980_v33, %v2989_v6  ;;  %v1151_v33 = vadd.f32 %v6190_v14, %v6366_v38  ;;  %v2502_v14 = vshrl.u32 %v6150_v16, 16  ;;  %v2505_v38 = vshll.u32 %v6150_v16, 16 }
 0x202   : > { %5187 = vmatmul.msk.bf16.gmra.mxu0 %vm751_vm2, %v2981_v30  ;;  %v983_v13 = vpop.f32.mrf.mxu3  ;;  %5119 = vmatmul.msk.bf16.vlgmr.msra.gmra.mxu2 %vm751_vm2, %v6173_v52  ;;  %v5557_v52 = vld [vmem:[%s7758_s2 + $0x48] sm:$0xff]  ;;  %v6576_v30 = vpop.f32.mrf.mxu0 }
 0x203   : > { %v6563_v40 = vadd.f32 %v983_v13, %v6309_v23  ;;  %7806 = vst [vmem:[#allocation31_spill] sm:$0xff] %v6576_v30  ;;  %2267 = vmatpush.bf16.msrb.mxu3 %v5557_v52  ;;  %v2215_v23 = vrot.slane %v6480_v48, 1  ;;  %v2654_v13 = vrot.slane %v6150_v16, 2  ;;  %v7807_v48 = vrot.slane %v6123_v53, 2  ;;  %v5665_v52 = vld [vmem:[#allocation2 + $0x60] sm:$0xf0] }
 0x204   : > { %v6565_v10 = vpop.f32.mrf.mxu1  ;;  %v6607_v53 = vld [vmem:[#allocation2 + $0x68] sm:$0xff]  ;;  %v2507_v16 = vrot.slane %v2505_v38, 2 }
 0x205   : > { %v6568_v36 = vpop.f32.mrf.mxu2  ;;  %v2655_v58 = vsel %vm1343_vm5, %v7807_v48, %v2654_v13  ;;  %v2217_v48 = vrot.slane %v6528_v25, 1 }
 0x207   : > { %4948 = vmatmul.msk.bf16.gmra.mxu3 %vm751_vm2, %v5913_v11  ;;  %4994 = vmatmul.msk.bf16.gmra.mxu1 %vm751_vm2, %v2037_v17  ;;  %v6585_v11 = vsel %vm896_vm4, %v2213_v37, %v2215_v23 }
 0x20a   : > { %v986_v32 = vpop.f32.mrf.mxu3 }
 0x20b   : > { %v6580_v1 = vadd.f32 %v986_v32, %v6329_v41  ;;  %v6596_v41 = vpop.f32.mrf.mxu0  ;;  %v5666_v32 = vld [vmem:[#allocation2 + $0x60] sm:$0xe] }
 0x20c   : > { %v6582_v47 = vpop.f32.mrf.mxu1  ;;  %7808 = vst [vmem:[#allocation32_spill] sm:$0xff] %v6596_v41  ;;  %v3509_v41 = vrot.slane %v6607_v53, 1 }
 0x20d   : > { %v6587_v17 = vpop.f32.mrf.mxu2 }
 0x212   : > { %5188 = vmatmul.msk.bf16.gmra.mxu0 %vm751_vm2, %v2990_v46  ;;  %v988_v7 = vpop.f32.mrf.mxu3  ;;  %5120 = vmatmul.msk.bf16.gmra.mxu2 %vm751_vm2, %v2655_v58  ;;  %v5667_v46 = vor.u32 %v5666_v32, %v5665_v52  ;;  %v2656_v32 = vrot.slane %v6197_v56, 2 }
 0x213   : > { %v6599_v37 = vadd.f32 %v988_v7, %v6352_v35  ;;  %v1319_v35 = vadd.f32 %v6145_v55, %v1151_v33  ;;  %v1152_v55 = vadd.f32 %v6215_v39, %v6383_v61 }
 0x214   : > { %v6601_v30 = vpop.f32.mrf.mxu1  ;;  %v3508_v7 = vrot.slane %v5667_v46, 1  ;;  %v2504_v46 = vrot.slane %v2502_v14, 1  ;;  %v2657_v39 = vsel %vm1343_vm5, %v2654_v13, %v2656_v32  ;;  %v1153_v14 = vadd.f32 %v6233_v2, %v6397_v44 }
 0x215   : > { %v6605_v6 = vpop.f32.mrf.mxu2  ;;  %v2511_v2 = vshrl.u32 %v6197_v56, 16  ;;  %v2514_v44 = vshll.u32 %v6197_v56, 16 }
 0x216   : > { %7809 = vst [vmem:[#allocation33_spill] sm:$0xff] %v6605_v6  ;;  %v3510_v33 = vsel %vm896_vm4, %v3508_v7, %v3509_v41  ;;  %v1321_v13 = vadd.f32 %v6192_v62, %v1153_v14 }
 0x217   : > { %4949 = vmatmul.msk.bf16.gmra.mxu3 %vm751_vm2, %v5953_v49  ;;  %5097 = vmatmul.msk.bf16.vlgmr.msra.gmra.mxu1 %vm751_vm2, %v6188_v50  ;;  %v6623_v49 = vsel %vm896_vm4, %v2215_v23, %v2217_v48  ;;  %v6627_v50 = vpop.f32.mrf.mxu0  ;;  %v1320_v23 = vadd.f32 %v6168_v57, %v1152_v55  ;;  %v2508_v48 = vor.u32 %v2507_v16, %v2504_v46  ;;  %v2513_v62 = vrot.slane %v2511_v2, 1 }
 0x218   : > { %7810 = vst [vmem:[#allocation34_spill] sm:$0xff] %v6627_v50  ;;  %v2516_v14 = vrot.slane %v2514_v44, 2 }
 0x21a   : > { %v1408_v58 = vpop.f32.mrf.mxu3 }
 0x21b   : > { %v6618_v6 = vadd.f32 %v1408_v58, %v1319_v35  ;;  %v5556_v35 = vld [vmem:[%s7758_s2 + $0x40] sm:$0xff] }
 0x21c   : > { %v6620_v52 = vpop.f32.mrf.mxu1  ;;  %2268 = vmatpush.bf16.msrb.mxu3 %v5556_v35  ;;  %v2509_v35 = vsel %vm1175_vm7, %v6176_v12, %v2508_v48 }
 0x21d   : > { %v6629_v25 = vpop.f32.mrf.mxu2 }
 0x21e   : > { %7811 = vst [vmem:[#allocation35_spill] sm:$0xff] %v6629_v25 }
 0x21f   : > { %v6650_v57 = vpop.f32.mrf.mxu0 }
 0x220   : > { %7813 = vst [vmem:[#allocation37_spill] sm:$0xff] %v6650_v57  ;;  %v2517_v57 = vor.u32 %v2516_v14, %v2513_v62  ;;  %v2520_v62 = vshrl.u32 %v6240_v51, 16 }
 0x222   : > { %5291 = vmatmul.msk.bf16.vlgmr.msrb.gmra.mxu0 %vm751_vm2, %v3510_v33  ;;  %v1410_v61 = vpop.f32.mrf.mxu3  ;;  %5121 = vmatmul.msk.bf16.gmra.mxu2 %vm751_vm2, %v2657_v39  ;;  %v6648_v33 = vld [vmem:[#allocation2 + $0x70] sm:$0xff] }
 0x223   : > { %v6640_v58 = vadd.f32 %v1410_v61, %v1320_v23  ;;  %v3511_v46 = vrot.slane %v6648_v33, 1  ;;  %v1154_v23 = vadd.f32 %v6249_v15, %v6426_v24 }
 0x224   : > { %v6642_v7 = vpop.f32.mrf.mxu1 }
 0x225   : > { %7812 = vst [vmem:[#allocation36_spill] sm:$0xff] %v6642_v7  ;;  %v2164_v38 = vpop.f32.mrf.mxu2  ;;  %v3512_v61 = vsel %vm896_vm4, %v3509_v41, %v3511_v46  ;;  %v1322_v56 = vadd.f32 %v6217_v43, %v1154_v23  ;;  %v1155_v41 = vadd.f32 %v6273_v22, %v6448_v3  ;;  %v2518_v43 = vsel %vm1175_vm7, %v2508_v48, %v2517_v57  ;;  %v5585_v22 = vld [vmem:[%s7758_s2 + $0xd8] sm:$0xff]  ;;  %v5605_v3 = vld [vmem:[%s7758_s2 + $0x30] sm:$0xff] }
 0x226   : > { %2870 = vmatpush.bf16.msra.mxu3 %v5585_v22 }
 0x227   : > { %4950 = vmatmul.msk.bf16.gmra.mxu3 %vm751_vm2, %v5984_v31  ;;  %5098 = vmatmul.msk.bf16.gmra.mxu1 %vm751_vm2, %v2509_v35  ;;  %v2658_v31 = vrot.slane %v6240_v51, 2  ;;  %v6667_v35 = vpop.f32.mrf.mxu0 }
 0x228   : > { %7815 = vst [vmem:[#allocation39_spill] sm:$0xff] %v6667_v35  ;;  %v5661_v35 = vld [vmem:[#allocation2 + $0x30] sm:$0xf0] }
 0x22a   : > { %v1413_v55 = vpop.f32.mrf.mxu3 }
 0x22b   : > { %v6659_v16 = vadd.f32 %v1413_v55, %v1321_v13  ;;  %v2659_v13 = vsel %vm1343_vm5, %v2656_v32, %v2658_v31  ;;  %v6683_v32 = vld [vmem:[#allocation2 + $0x78] sm:$0xff] }
 0x22c   : > { %v6661_v12 = vpop.f32.mrf.mxu1  ;;  %v3513_v23 = vrot.slane %v6683_v32, 1 }
 0x22d   : > { %7814 = vst [vmem:[#allocation38_spill] sm:$0xff] %v6661_v12  ;;  %v2166_v39 = vpop.f32.mrf.mxu2 }
 0x22f   : > { %v6698_v14 = vpop.f32.mrf.mxu0 }
 0x230   : > { %7817 = vst [vmem:[#allocation41_spill] sm:$0xff] %v6698_v14 }
 0x232   : > { %5292 = vmatmul.msk.bf16.gmra.mxu0 %vm751_vm2, %v3512_v61  ;;  %v1415_v55 = vpop.f32.mrf.mxu3  ;;  %5122 = vmatmul.msk.bf16.gmra.mxu2 %vm751_vm2, %v2659_v13  ;;  %v5606_v61 = vld [vmem:[%s7758_s2 + $0x38] sm:$0xff] }
 0x233   : > { %v6673_v15 = vadd.f32 %v1415_v55, %v1322_v56  ;;  %3386 = vmatpush.bf16.msrb.mxu2 %v5606_v61  ;;  %v1156_v55 = vadd.f32 %v6297_v63, %v6470_v0  ;;  %v5604_v61 = vld [vmem:[%s7758_s2 + $0x28] sm:$0xff] }
 0x234   : > { %v2089_v24 = vpop.f32.mrf.mxu1 }
 0x235   : > { %v6677_v2 = vadd.f32 %v2164_v38, %v2089_v24  ;;  %v2169_v44 = vpop.f32.mrf.mxu2  ;;  %v1323_v38 = vadd.f32 %v6235_v5, %v1155_v41  ;;  %v2660_v41 = vrot.slane %v6281_v18, 2  ;;  %v1324_v63 = vadd.f32 %v6254_v28, %v1156_v55 }
 0x237   : > { %7816 = vst [vmem:[#allocation40_spill] sm:$0xff] %v6677_v2  ;;  %4951 = vmatmul.msk.bf16.gmra.mxu3 %vm751_vm2, %v6013_v59  ;;  %5099 = vmatmul.msk.bf16.gmra.mxu1 %vm751_vm2, %v2518_v43  ;;  %v2523_v59 = vshll.u32 %v6240_v51, 16  ;;  %v3514_v51 = vsel %vm896_vm4, %v3511_v46, %v3513_v23  ;;  %v2522_v43 = vrot.slane %v2520_v62, 1  ;;  %v2661_v0 = vsel %vm1343_vm5, %v2658_v31, %v2660_v41  ;;  %v6727_v55 = vpop.f32.mrf.mxu0 }
 0x238   : > { %3387 = vmatpush.bf16.msrb.mxu2 %v5605_v3  ;;  %v5603_v3 = vld [vmem:[%s7758_s2 + $0x20] sm:$0xff] }
 0x239   : > { %v2525_v22 = vrot.slane %v2523_v59, 2 }
 0x23a   : > { %v1418_v48 = vpop.f32.mrf.mxu3 }
 0x23b   : > { %v6700_v56 = vadd.f32 %v1418_v48, %v1323_v38  ;;  %v6721_v46 = vor.u32 %v2525_v22, %v2522_v43  ;;  %v2472_v48 = vld [vmem:[#allocation2 + $0x68] sm:$0x3]  ;;  %v6733_v43 = vld [vmem:[#allocation2 + $0x80] sm:$0xff] }
 0x23c   : > { %v2091_v13 = vpop.f32.mrf.mxu1  ;;  %3388 = vmatpush.bf16.msrb.mxu2 %v5604_v61  ;;  %v7822_v22 = vld [vmem:[#allocation3_spill] sm:$0xff] }
 0x23d   : > { %v6704_v24 = vadd.f32 %v2166_v39, %v2091_v13  ;;  %v2171_v5 = vpop.f32.mrf.mxu2  ;;  %v5593_v39 = vld [vmem:[%s7758_s2 + $0x118] sm:$0xff] }
 0x23e   : > { %3155 = vmatpush.bf16.msrb.mxu1 %v5593_v39  ;;  %v7819_v13 = vld [vmem:[#allocation6_spill] sm:$0xff] }
 0x23f   : > { %7818 = vst [vmem:[#allocation42_spill] sm:$0xff] %v6704_v24  ;;  %v1157_v28 = vadd.f32 %v7819_v13, %v6485_v45  ;;  %v3941_v13 = vld [vmem:[#allocation2 + $0x68] sm:$0xc] }
 0x240   : > { %3389 = vmatpush.bf16.msrb.mxu2 %v5603_v3  ;;  %7820 = vst [vmem:[#allocation6_spill] sm:$0xff] %v6727_v55  ;;  %v7823_v3 = vld [vmem:[#allocation4_spill] sm:$0xff] }
 0x242   : > { %5293 = vmatmul.msk.bf16.gmra.mxu0 %vm751_vm2, %v3514_v51  ;;  %v1420_v38 = vpop.f32.mrf.mxu3  ;;  %5123 = vmatmul.msk.bf16.gmra.mxu2 %vm751_vm2, %v2661_v0  ;;  %v2482_v51 = vunpack.c.l.b16 %v2472_v48  ;;  %v2527_v0 = vsel %vm1175_vm7, %v2517_v57, %v6721_v46  ;;  %v2532_v48 = vshll.u32 %v6281_v18, 16  ;;  %v6746_v57 = vld [vmem:[#allocation2 + $0x6c] sm:$0xf] }
 0x243   : > { %v6723_v62 = vadd.f32 %v1420_v38, %v1324_v63  ;;  %v1325_v63 = vadd.f32 %v7823_v3, %v1157_v28  ;;  %v2529_v38 = vshrl.u32 %v6281_v18, 16  ;;  %v7824_v28 = vld [vmem:[#allocation8_spill] sm:$0xff] }
 0x244   : > { %v2094_v59 = vpop.f32.mrf.mxu1  ;;  %v6739_v39 = vpack.c.b16 %v2482_v51, %v2482_v51  ;;  %v1158_v51 = vadd.f32 %v7824_v28, %v6510_v9  ;;  %v5592_v18 = vld [vmem:[%s7758_s2 + $0x110] sm:$0xff]  ;;  %v5591_v28 = vld [vmem:[%s7758_s2 + $0x108] sm:$0xff] }
 0x245   : > { %v6729_v31 = vadd.f32 %v2169_v44, %v2094_v59  ;;  %v2174_v61 = vpop.f32.mrf.mxu2  ;;  %v5584_v9 = vld [vmem:[%s7758_s2 + $0xd0] sm:$0xff]  ;;  %3156 = vmatpush.bf16.msrb.mxu1 %v5592_v18  ;;  %v5636_v18 = vld [vmem:[%s7758_s2 + $0xd8] sm:$0xff] }
 0x246   : > { %v2662_v44 = vrot.slane %v6739_v39, 2  ;;  %2871 = vmatpush.bf16.msra.mxu3 %v5584_v9  ;;  %4172 = vmatpush.bf16.msra.mxu0 %v5636_v18  ;;  %v7835_v18 = vld [vmem:[#allocation7_spill] sm:$0xff] }
 0x247   : > { %7821 = vst [vmem:[#allocation43_spill] sm:$0xff] %v6729_v31  ;;  %4952 = vmatmul.msk.bf16.gmra.mxu3 %vm751_vm2, %v7822_v22  ;;  %5100 = vmatmul.msk.bf16.gmra.mxu1 %vm751_vm2, %v2527_v0  ;;  %v3951_v0 = vunpack.c.l.b16 %v3941_v13  ;;  %v2531_v22 = vrot.slane %v2529_v38, 1  ;;  %v2534_v13 = vrot.slane %v2532_v48, 2  ;;  %v7829_v48 = vld [vmem:[#allocation5_spill] sm:$0xff] }
 0x248   : > { %v2663_v31 = vsel %vm1343_vm5, %v2660_v41, %v2662_v44 }
 0x249   : > { %v6784_v9 = vor.u32 %v2534_v13, %v2531_v22  ;;  %3157 = vmatpush.bf16.msrb.mxu1 %v5591_v28  ;;  %v6805_v13 = vld [vmem:[#allocation2 + $0x88] sm:$0xff] }
 0x24a   : > { %v1423_v45 = vpop.f32.mrf.mxu3 }
 0x24b   : > { %v6744_v59 = vadd.f32 %v1423_v45, %v1325_v63  ;;  %v7826_v63 = vrot.slane %v6733_v43, 1  ;;  %v2536_v22 = vsel %vm1175_vm7, %v6721_v46, %v6784_v9  ;;  %v5634_v46 = vld [vmem:[%s7758_s2 + $0xc8] sm:$0xff] }
 0x24c   : > { %v2096_v55 = vpop.f32.mrf.mxu1 }
 0x24d   : > { %v6751_v3 = vadd.f32 %v2171_v5, %v2096_v55  ;;  %v6753_v14 = vpop.f32.mrf.mxu2  ;;  %v3516_v45 = vsel %vm896_vm4, %v3513_v23, %v7826_v63  ;;  %v6765_v5 = vpop.f32.mrf.mxu0  ;;  %v5662_v55 = vld [vmem:[#allocation2 + $0x30] sm:$0xe]  ;;  %v7828_v23 = vunpack.c.l.b16 %v6746_v57  ;;  %v1326_v63 = vadd.f32 %v7829_v48, %v1158_v51 }
 0x24e   : > { %7827 = vst [vmem:[#allocation4_spill] sm:$0xff] %v6765_v5  ;;  %v5663_v50 = vor.u32 %v5662_v55, %v5661_v35  ;;  %v6777_v5 = vld [vmem:[#allocation2 + $0x60] sm:$0xff]   ;;  %v7769_v35 = vrot.slane %v6322_v29, 1 }
 0x24f   : > { %7825 = vst [vmem:[#allocation3_spill] sm:$0xff] %v6751_v3  ;;  %v6770_v3 = vld [vmem:[#allocation2 + $0x70] sm:$0xff]  ;;  %v3952_v38 = vpack.c.b16 %v7828_v23, %v3951_v0  ;;  %v3291_v41 = vshll.u32 %v6777_v5, 16  ;;  %v7831_v23 = vld [vmem:[#allocation11_spill] sm:$0xff]  ;;  %v3289_v28 = vshrl.u32 %v6777_v5, 16 }
 0x250   : > { %7830 = vst [vmem:[#allocation8_spill] sm:$0xff] %v6777_v5  ;;  %v7768_v55 = vrot.slane %v6770_v3, 2  ;;  %v1159_v48 = vadd.f32 %v7831_v23, %v6536_v42  ;;  %v5635_v42 = vld [vmem:[%s7758_s2 + $0xd0] sm:$0xff]  ;;  %v2541_v23 = vshll.u32 %v6739_v39, 16 }
 0x251   : > { %v3953_v44 = vrot.slane %v3952_v38, 2  ;;  %v3293_v38 = vrot.slane %v3291_v41, 1  ;;  %4173 = vmatpush.bf16.msra.mxu0 %v5635_v42  ;;  %v4060_v42 = vld [vmem:[#allocation2 + $0x74] sm:$0xf]  ;;  %v4386_v5 = vld [vmem:[#allocation2 + $0x70] sm:$0x8] }
 0x252   : > { %5294 = vmatmul.msk.bf16.gmra.mxu0 %vm751_vm2, %v3516_v45  ;;  %v1425_v24 = vpop.f32.mrf.mxu3  ;;  %5124 = vmatmul.msk.bf16.gmra.mxu2 %vm751_vm2, %v2663_v31  ;;  %v2206_v45 = vrot.slane %v5663_v50, 1 }
 0x253   : > { %v6786_v0 = vadd.f32 %v1425_v24, %v1326_v63  ;;  %v5590_v24 = vld [vmem:[%s7758_s2 + $0x100] sm:$0xff] }
 0x254   : > { %v2099_v51 = vpop.f32.mrf.mxu1  ;;  %v2208_v50 = vsel %vm896_vm4, %v2206_v45, %v7769_v35  ;;  %3158 = vmatpush.bf16.msrb.mxu1 %v5590_v24  ;;  %v3296_v45 = vshll.u32 %v6607_v53, 16  ;;  %v4059_v24 = vld [vmem:[#allocation2 + $0x70] sm:$0xc] }
 0x255   : > { %v6792_v2 = vadd.f32 %v2174_v61, %v2099_v51  ;;  %v6794_v31 = vpop.f32.mrf.mxu2  ;;  %v6813_v61 = vsel %vm1343_vm5, %v3953_v44, %v7768_v55  ;;  %v6821_v63 = vpop.f32.mrf.mxu0  ;;  %v1327_v51 = vadd.f32 %v7835_v18, %v1159_v48  ;;  %v2538_v44 = vshrl.u32 %v6739_v39, 16  ;;  %v7836_v55 = vld [vmem:[#allocation13_spill] sm:$0xff]  ;;  %4174 = vmatpush.bf16.msra.mxu0 %v5634_v46 }
 0x256   : > { %7833 = vst [vmem:[#allocation11_spill] sm:$0xff] %v6813_v61  ;;  %v1160_v35 = vadd.f32 %v7836_v55, %v6563_v40  ;;  %v4093_v48 = vunpack.c.l.b16 %v4059_v24  ;;  %v4094_v18 = vunpack.c.l.b16 %v4060_v42  ;;  %v3298_v25 = vrot.slane %v3296_v45, 1  ;;  %v6841_v55 = vld [vmem:[#allocation2 + $0x78] sm:$0xff] }
 0x257   : > { %7832 = vst [vmem:[#allocation5_spill] sm:$0xff] %v6792_v2  ;;  %5033 = vmatmul.msk.bf16.vlgmr.msrb.gmra.mxu3 %vm751_vm2, %v2208_v50  ;;  %5101 = vmatmul.msk.bf16.gmra.mxu1 %vm751_vm2, %v2536_v22  ;;  %v2540_v12 = vrot.slane %v2538_v44, 1  ;;  %v2543_v22 = vrot.slane %v2541_v23, 2  ;;  %v7771_v40 = vrot.slane %v6363_v26, 1  ;;  %v7840_v46 = vld [vmem:[#allocation9_spill] sm:$0xff] }
 0x258   : > { %7834 = vst [vmem:[#allocation44_spill] sm:$0xff] %v6821_v63  ;;  %v3294_v63 = vor.u32 %v3293_v38, %v3289_v28  ;;  %v6843_v28 = vpack.c.b16 %v4094_v18, %v4093_v48  ;;  %v3246_v38 = vld [vmem:[#allocation2 + $0x90] sm:$0x1]  ;;  %v1328_v45 = vadd.f32 %v7840_v46, %v1160_v35  ;;  %v6849_v44 = vld [vmem:[#allocation2 + $0x78] sm:$0xff] }
 0x259   : > { %v2544_v24 = vor.u32 %v2543_v22, %v2540_v12  ;;  %v3280_v35 = vunpack.c.l.b16 %v3246_v38 }
 0x25a   : > { %v1428_v50 = vpop.f32.mrf.mxu3  ;;  %v3299_v23 = vsel %vm674_vm3, %v3294_v63, %v3298_v25  ;;  %v4232_v46 = vshrl.u32 %v6843_v28, 16 }
 0x25b   : > { %v6828_v41 = vadd.f32 %v1428_v50, %v1327_v51  ;;  %v7838_v51 = vrot.slane %v6805_v13, 1  ;;  %v7839_v50 = vrot.slane %v6733_v43, 1 }
 0x25c   : > { %v2101_v61 = vpop.f32.mrf.mxu1 }
 0x25d   : > { %v6833_v2 = vadd.f32 %v6753_v14, %v2101_v61  ;;  %v2181_v39 = vpop.f32.mrf.mxu2  ;;  %v3518_v7 = vsel %vm896_vm4, %v7839_v50, %v7838_v51  ;;  %v5633_v14 = vld [vmem:[%s7758_s2 + $0xc0] sm:$0xff]  ;;  %v4396_v61 = vunpack.c.l.b16 %v4386_v5  ;;  %v4399_v51 = vrot.slane %v6841_v55, 3  ;;  %v6862_v63 = vpop.f32.mrf.mxu0 }
 0x25e   : > { %v7841_v50 = vrot.slane %v6322_v29, 1  ;;  %4175 = vmatpush.bf16.msra.mxu0 %v5633_v14  ;;  %7842 = vst [vmem:[#allocation13_spill] sm:$0xff] %v6862_v63  ;;  %v1161_v29 = vadd.f32 %v6385_v27, %v6580_v1  ;;  %v3956_v14 = vrot.slane %v6849_v44, 2  ;;  %v6879_v63 = vpack.c.b16 %v3280_v35, %v3280_v35 }
 0x25f   : > { %7837 = vst [vmem:[#allocation7_spill] sm:$0xff] %v6833_v2  ;;  %v4397_v42 = vpack.c.b16 %v4094_v18, %v4396_v61  ;;  %v4240_v18 = vshrl.u32 %v6841_v55, 16  ;;  %v4243_v61 = vshll.u32 %v6841_v55, 16  ;;  %v7843_v1 = vrot.slane %v6770_v3, 2 }
 0x260   : > { %v2210_v5 = vsel %vm896_vm4, %v7841_v50, %v7771_v40  ;;  %v4234_v50 = vrot.slane %v4232_v46, 2 }
 0x261   : > { %v4398_v22 = vrot.slane %v4397_v42, 3  ;;  %v4245_v27 = vrot.slane %v4243_v61, 3  ;;  %v6884_v46 = vsel %vm1343_vm5, %v7843_v1, %v3956_v14  ;;  %v3519_v61 = vrot.slane %v6879_v63, 1 }
 0x262   : > { %5295 = vmatmul.msk.bf16.gmra.mxu0 %vm751_vm2, %v3518_v7  ;;  %v1430_v48 = vpop.f32.mrf.mxu3  ;;  %5247 = vmatmul.msk.bf16.vlgmr.msrb.gmra.mxu2 %vm751_vm2, %v3299_v23  ;;  %v4235_v7 = vshll.u32 %v6843_v28, 16  ;;  %7844 = vst [vmem:[#allocation9_spill] sm:$0xff] %v6884_v46 }
 0x263   : > { %v6864_v12 = vadd.f32 %v1430_v48, %v1328_v45  ;;  %v2545_v45 = vsel %vm1175_vm7, %v6784_v9, %v2544_v24  ;;  %v6877_v42 = vsel %vm1790_vm6, %v4398_v22, %v4399_v51  ;;  %v4242_v48 = vrot.slane %v4240_v18, 2  ;;  %v5583_v9 = vld [vmem:[%s7758_s2 + $0xc8] sm:$0xff] }
 0x264   : > { %v2104_v23 = vpop.f32.mrf.mxu1  ;;  %v4237_v38 = vrot.slane %v4235_v7, 3  ;;  %v3304_v24 = vshll.u32 %v6648_v33, 16  ;;  %v7845_v7 = vld [vmem:[#allocation12_spill] sm:$0xff]  ;;  %2872 = vmatpush.bf16.msra.mxu3 %v5583_v9  ;;  %v6908_v9 = vld [vmem:[#allocation2 + $0x80] sm:$0xff] }
 0x265   : > { %v6872_v40 = vadd.f32 %v6794_v31, %v2104_v23  ;;  %v2184_v2 = vpop.f32.mrf.mxu2  ;;  %v3300_v31 = vshrl.u32 %v6607_v53, 16  ;;  %v4246_v35 = vor.u32 %v4245_v27, %v4242_v48  ;;  %v1329_v22 = vadd.f32 %v7845_v7, %v1161_v29  ;;  %v6904_v48 = vpop.f32.mrf.mxu0 }
 0x266   : > { %v4238_v8 = vor.u32 %v4237_v38, %v4234_v50  ;;  %v6900_v50 = vld [vmem:[#allocation2 + $0x80] sm:$0xff]  ;;  %v1162_v38 = vadd.f32 %v6402_v60, %v6599_v37  ;;  %v3306_v1 = vrot.slane %v3304_v24, 1  ;;  %7847 = vst [vmem:[#allocation45_spill] sm:$0xff] %v6904_v48 }
 0x267   : > { %5034 = vmatmul.msk.bf16.gmra.mxu3 %vm751_vm2, %v2210_v5  ;;  %5102 = vmatmul.msk.bf16.gmra.mxu1 %vm751_vm2, %v2545_v45  ;;  %v3302_v45 = vor.u32 %v3300_v31, %v3298_v25  ;;  %v4249_v25 = vshrl.u32 %v6900_v50, 16  ;;  %v3958_v31 = vrot.slane %v6908_v9, 2 }
 0x268   : > { %v6896_v23 = vsel %vm1622_vm8, %v4238_v8, %v4246_v35  ;;  %v7848_v8 = vrot.slane %v6805_v13, 1 }
 0x269   : > { %7846 = vst [vmem:[#allocation12_spill] sm:$0xff] %v6896_v23  ;;  %v3307_v60 = vsel %vm674_vm3, %v3302_v45, %v3306_v1  ;;  %v6927_v45 = vsel %vm1343_vm5, %v3956_v14, %v3958_v31  ;;  %v7852_v23 = vrot.slane %v6393_v54, 1  ;;  %v7856_v54 = vld [vmem:[#allocation15_spill] sm:$0xff] }
 0x26a   : > { %v1433_v18 = vpop.f32.mrf.mxu3  ;;  %v3520_v7 = vsel %vm896_vm4, %v7848_v8, %v3519_v61  ;;  %7851 = vst [vmem:[#allocation46_spill] sm:$0xff] %v6927_v45 }
 0x26b   : > { %v6898_v5 = vadd.f32 %v1433_v18, %v1329_v22  ;;  %v4401_v22 = vrot.slane %v6900_v50, 3  ;;  %v7849_v18 = vld [vmem:[#allocation14_spill] sm:$0xff] }
 0x26c   : > { %v2106_v53 = vpop.f32.mrf.mxu1  ;;  %v1330_v46 = vadd.f32 %v7849_v18, %v1162_v38  ;;  %v4251_v38 = vrot.slane %v4249_v25, 2 }
 0x26d   : > { %v6906_v29 = vadd.f32 %v2181_v39, %v2106_v53  ;;  %v2186_v27 = vpop.f32.mrf.mxu2  ;;  %v6918_v37 = vsel %vm1790_vm6, %v4399_v51, %v4401_v22  ;;  %v4252_v39 = vshll.u32 %v6900_v50, 16  ;;  %v1598_v51 = vadd.f32 %v6428_v20, %v6618_v6 }
 0x26e   : > { %7850 = vst [vmem:[#allocation14_spill] sm:$0xff] %v6918_v37  ;;  %v7853_v37 = vrot.slane %v6363_v26, 1  ;;  %v3308_v20 = vshrl.u32 %v6648_v33, 16  ;;  %v3312_v6 = vshll.u32 %v6683_v32, 16  ;;  %v6953_v26 = vld [vmem:[%s7759_s3] ss:$0 sm:$0xff] }
 0x26f   : > { %v4254_v53 = vrot.slane %v4252_v39, 3  ;;  %v6957_v39 = vld [vmem:[#allocation2 + $0x88] sm:$0xff] }
 0x271   : > { %v4255_v48 = vor.u32 %v4254_v53, %v4251_v38  ;;  %v3310_v38 = vor.u32 %v3308_v20, %v3306_v1  ;;  %v3314_v53 = vrot.slane %v3312_v6, 1  ;;  %v7859_v1 = vld [vmem:[#allocation16_spill] sm:$0xff] }
 0x272   : > { %5296 = vmatmul.msk.bf16.gmra.mxu0 %vm751_vm2, %v3520_v7  ;;  %v1435_v24 = vpop.f32.mrf.mxu3  ;;  %5248 = vmatmul.msk.bf16.gmra.mxu2 %vm751_vm2, %v3307_v60  ;;  %v6938_v60 = vpop.f32.mrf.mxu0 }
 0x273   : > { %v6924_v61 = vadd.f32 %v1435_v24, %v1330_v46  ;;  %v2212_v46 = vsel %vm896_vm4, %v7853_v37, %v7852_v23  ;;  %7854 = vst [vmem:[#allocation47_spill] sm:$0xff] %v6938_v60  ;;  %v6944_v14 = vsel %vm1622_vm8, %v4246_v35, %v4255_v48  ;;  %v7857_v37 = vld [vmem:[#allocation19_spill] sm:$0xff]  ;;  %v4113_v35 = vrot.slane %v6843_v28, 2 }
 0x274   : > { %v2109_v8 = vpop.f32.mrf.mxu1  ;;  %7855 = vst [vmem:[#allocation48_spill] sm:$0xff] %v6944_v14  ;;  %v1599_v25 = vadd.f32 %v7857_v37, %v6640_v58  ;;  %v4114_v24 = vrot.slane %v6841_v55, 2  ;;  %v4258_v28 = vshrl.u32 %v6957_v39, 16  ;;  %v3315_v6 = vsel %vm674_vm3, %v3310_v38, %v3314_v53  ;;  %v7864_v14 = vld [vmem:[#allocation10_spill] sm:$0xff] }
 0x275   : > { %v6931_v7 = vadd.f32 %v2184_v2, %v2109_v8  ;;  %v2189_v18 = vpop.f32.mrf.mxu2  ;;  %v1766_v2 = vadd.f32 %v7856_v54, %v1598_v51  ;;  %v5582_v54 = vld [vmem:[%s7758_s2 + $0xc0] sm:$0xff] }
 0x276   : > { %v4115_v55 = vsel %vm1343_vm5, %v4113_v35, %v4114_v24  ;;  %v1767_v20 = vadd.f32 %v7859_v1, %v1599_v25  ;;  %2873 = vmatpush.bf16.msra.mxu3 %v5582_v54  ;;  %v4260_v37 = vrot.slane %v4258_v28, 2  ;;  %v6989_v25 = vld [vmem:[#allocation2 + $0x50] sm:$0xff] }
 0x277   : > { %5035 = vmatmul.msk.bf16.gmra.mxu3 %vm751_vm2, %v2212_v46  ;;  %5205 = vmatmul.msk.bf16.vlgmr.msrb.gmra.mxu1 %vm751_vm2, %v6419_v4  ;;  %v6969_v46 = vld [vmem:[#allocation2 + $0x88] sm:$0xff]  ;;  %v3099_v35 = vrot.slane %v6989_v25, 3  ;;  %v7863_v28 = vld [vmem:[#allocation21_spill] sm:$0xff] }
 0x27a   : > { %v1855_v23 = vpop.f32.mrf.mxu3 }
 0x27b   : > { %v1885_v4 = vadd.f32 %v1855_v23, %v1766_v2  ;;  %v4403_v2 = vrot.slane %v6957_v39, 3 }
 0x27c   : > { %v2111_v33 = vpop.f32.mrf.mxu1 }
 0x27d   : > { %v1900_v8 = vadd.f32 %v6953_v26, %v1885_v4  ;;  %v6967_v51 = vadd.f32 %v2186_v27, %v2111_v33  ;;  %v2191_v58 = vpop.f32.mrf.mxu2  ;;  %v6980_v27 = vpop.f32.mrf.mxu0  ;;  %v6984_v23 = vsel %vm1790_vm6, %v4401_v22, %v4403_v2  ;;  %v4261_v4 = vshll.u32 %v6957_v39, 16 }
 0x27e   : > { %7860 = vst [vmem:[#allocation19_spill] sm:$0xff] %v6980_v27  ;;  %v3960_v33 = vrot.slane %v6969_v46, 2 }
 0x27f   : > { %7858 = vst [vmem:[#allocation15_spill] sm:$0xff] %v6967_v51  ;;  %v4263_v1 = vrot.slane %v4261_v4, 3 }
 0x280   : > { %1912 = vst [vmem:[%s6962_s27] sm:$0xff] %v1900_v8  ;;  %v6993_v54 = vsel %vm1343_vm5, %v3958_v31, %v3960_v33 }
 0x281   : > { %7861 = vst [vmem:[#allocation16_spill] sm:$0xff] %v6984_v23  ;;  %v7865_v23 = vrot.slane %v7864_v14, 3 }
 0x282   : > { %5419 = vmatmul.msk.bf16.vlgmr.msra.gmra.mxu0 %vm751_vm2, %v4115_v55  ;;  %v1857_v8 = vpop.f32.mrf.mxu3  ;;  %5249 = vmatmul.msk.bf16.gmra.mxu2 %vm751_vm2, %v3315_v6  ;;  %7862 = vst [vmem:[#allocation49_spill] sm:$0xff] %v6993_v54  ;;  %v1600_v55 = vadd.f32 %v7863_v28, %v6659_v16  ;;  %v4264_v6 = vor.u32 %v4263_v1, %v4260_v37  ;;  %v3316_v16 = vshrl.u32 %v6683_v32, 16 }
 0x283   : > { %v1886_v38 = vadd.f32 %v1857_v8, %v1767_v20  ;;  %v3100_v51 = vsel %vm1790_vm6, %v7865_v23, %v3099_v35  ;;  %v7866_v20 = vld [vmem:[#allocation18_spill] sm:$0xff] }
 0x284   : > { %v2114_v22 = vpop.f32.mrf.mxu1  ;;  %v7010_v31 = vsel %vm1622_vm8, %v4255_v48, %v4264_v6  ;;  %v1768_v37 = vadd.f32 %v7866_v20, %v1600_v55  ;;  %v7773_v48 = vrot.slane %v6900_v50, 2  ;;  %v3318_v1 = vor.u32 %v3316_v16, %v3314_v53  ;;  %v7027_v55 = vld [vmem:[#allocation2 + $0x90] sm:$0xff] }
 0x285   : > { %v1901_v45 = vadd.f32 %v6953_v26, %v1886_v38  ;;  %v6998_v27 = vadd.f32 %v2189_v18, %v2114_v22  ;;  %v7000_v60 = vpop.f32.mrf.mxu2  ;;  %v3320_v18 = vshll.u32 %v6733_v43, 16  ;;  %v7015_v8 = vpop.f32.mrf.mxu0 }
 0x286   : > { %7867 = vst [vmem:[#allocation21_spill] sm:$0xff] %v7015_v8 }
 0x287   : > { %1913 = vst [vmem:[%s6962_s27 + $0x8] sm:$0xff] %v1901_v45  ;;  %5036 = vmatmul.msk.bf16.gmra.mxu3 %vm751_vm2, %v6545_v19  ;;  %5206 = vmatmul.msk.bf16.gmra.mxu1 %vm751_vm2, %v3100_v51  ;;  %v7017_v45 = vld [vmem:[#allocation2 + $0x90] sm:$0xff]  ;;  %v3322_v22 = vrot.slane %v3320_v18, 1 }
 0x288   : > { %v7868_v19 = vld [vmem:[#allocation24_spill] sm:$0xff]  ;;  %v4405_v20 = vrot.slane %v7017_v45, 3 }
 0x289   : > { %v1601_v38 = vadd.f32 %v7868_v19, %v6673_v15  ;;  %v4117_v15 = vsel %vm1343_vm5, %v4114_v24, %v7773_v48  ;;  %v3323_v16 = vsel %vm674_vm3, %v3318_v1, %v3322_v22  ;;  %v3962_v19 = vrot.slane %v7027_v55, 2 }
 0x28a   : > { %v1860_v4 = vpop.f32.mrf.mxu3 }
 0x28b   : > { %v1887_v23 = vadd.f32 %v1860_v4, %v1768_v37  ;;  %v4267_v37 = vshrl.u32 %v7017_v45, 16  ;;  %v7869_v4 = vld [vmem:[#allocation20_spill] sm:$0xff] }
 0x28c   : > { %v2116_v51 = vpop.f32.mrf.mxu1  ;;  %v1769_v53 = vadd.f32 %v7869_v4, %v1601_v38 }
 0x28d   : > { %v1902_v32 = vadd.f32 %v6953_v26, %v1887_v23  ;;  %v7023_v28 = vadd.f32 %v2191_v58, %v2116_v51  ;;  %v7025_v54 = vpop.f32.mrf.mxu2  ;;  %v7039_v58 = vsel %vm1790_vm6, %v4403_v2, %v4405_v20  ;;  %v4269_v18 = vrot.slane %v4267_v37, 2  ;;  %v7054_v4 = vpop.f32.mrf.mxu0 }
 0x28e   : > { %v4270_v23 = vshll.u32 %v7017_v45, 16  ;;  %v1602_v37 = vadd.f32 %v6512_v34, %v6700_v56  ;;  %7871 = vst [vmem:[#allocation18_spill] sm:$0xff] %v7054_v4  ;;  %v5602_v34 = vld [vmem:[%s7758_s2 + $0x18] sm:$0xff] }
 0x28f   : > { %1914 = vst [vmem:[%s6962_s27 + $0x10] sm:$0xff] %v1902_v32  ;;  %v7044_v32 = vld [vmem:[#allocation2 + $0x58] sm:$0xff]  ;;  %3461 = vmatpush.bf16.msrb.mxu3 %v5602_v34 }
 0x290   : > { %v7774_v24 = vrot.slane %v7044_v32, 3  ;;  %v4272_v1 = vrot.slane %v4270_v23, 3  ;;  %v7873_v23 = vld [vmem:[#allocation22_spill] sm:$0xff] }
 0x292   : > { %5420 = vmatmul.msk.bf16.gmra.mxu0 %vm751_vm2, %v4117_v15  ;;  %v1862_v51 = vpop.f32.mrf.mxu3  ;;  %5250 = vmatmul.msk.bf16.gmra.mxu2 %vm751_vm2, %v3323_v16  ;;  %v7048_v15 = vsel %vm1343_vm5, %v3960_v33, %v3962_v19  ;;  %v4273_v8 = vor.u32 %v4272_v1, %v4269_v18  ;;  %v5623_v33 = vld [vmem:[%s7758_s2 + $0x98] sm:$0xff] }
 0x293   : > { %v1888_v38 = vadd.f32 %v1862_v51, %v1769_v53  ;;  %7870 = vst [vmem:[#allocation10_spill] sm:$0xff] %v7048_v15  ;;  %v3102_v53 = vsel %vm1790_vm6, %v3099_v35, %v7774_v24  ;;  %3894 = vmatpush.bf16.msra.mxu2 %v5623_v33  ;;  %v5622_v35 = vld [vmem:[%s7758_s2 + $0x90] sm:$0xff]  ;;  %v3774_v18 = vld [vmem:[#allocation2 + $0x98] sm:$0x3]  ;;  %v3324_v51 = vshrl.u32 %v6733_v43, 16  ;;  %v4118_v15 = vrot.slane %v6957_v39, 2 }
 0x294   : > { %v7050_v2 = vpop.f32.mrf.mxu1  ;;  %v7073_v56 = vsel %vm1622_vm8, %v4264_v6, %v4273_v8  ;;  %v7081_v24 = vld [vmem:[#allocation2 + $0x98] sm:$0xff] }
 0x295   : > { %v1903_v48 = vadd.f32 %v6953_v26, %v1888_v38  ;;  %v7057_v16 = vpop.f32.mrf.mxu2  ;;  %7872 = vst [vmem:[#allocation24_spill] sm:$0xff] %v7073_v56  ;;  %v3784_v38 = vunpack.c.l.b16 %v3774_v18  ;;  %v5621_v18 = vld [vmem:[%s7758_s2 + $0x88] sm:$0xff]  ;;  %v7097_v56 = vpop.f32.mrf.mxu0 }
 0x296   : > { %7874 = vst [vmem:[#allocation20_spill] sm:$0xff] %v7097_v56 }
 0x297   : > { %1915 = vst [vmem:[%s6962_s27 + $0x18] sm:$0xff] %v1903_v48  ;;  %5037 = vmatmul.msk.bf16.gmra.mxu3 %vm751_vm2, %v6585_v11  ;;  %5207 = vmatmul.msk.bf16.gmra.mxu1 %vm751_vm2, %v3102_v53  ;;  %v1770_v48 = vadd.f32 %v7873_v23, %v1602_v37  ;;  %v3328_v11 = vshll.u32 %v6805_v13, 16  ;;  %v7083_v6 = vpack.c.b16 %v3784_v38, %v3784_v38  ;;  %v4276_v38 = vshrl.u32 %v7081_v24, 16 }
 0x298   : > { %3895 = vmatpush.bf16.msra.mxu2 %v5622_v35  ;;  %v1603_v37 = vadd.f32 %v6538_v21, %v6723_v62  ;;  %v3326_v23 = vor.u32 %v3324_v51, %v3322_v22  ;;  %v7875_v62 = vrot.slane %v6900_v50, 2  ;;  %v5620_v35 = vld [vmem:[%s7758_s2 + $0x80] sm:$0xff] }
 0x299   : > { %v3330_v34 = vrot.slane %v3328_v11, 1  ;;  %v3964_v39 = vrot.slane %v7083_v6, 2  ;;  %v4278_v11 = vrot.slane %v4276_v38, 2 }
 0x29a   : > { %v1865_v1 = vpop.f32.mrf.mxu3  ;;  %v4119_v22 = vsel %vm1343_vm5, %v7875_v62, %v4118_v15 }
 0x29b   : > { %v1889_v53 = vadd.f32 %v1865_v1, %v1770_v48  ;;  %v7775_v48 = vrot.slane %v7081_v24, 3  ;;  %v4279_v1 = vshll.u32 %v7081_v24, 16  ;;  %v3331_v50 = vsel %vm674_vm3, %v3326_v23, %v3330_v34 }
 0x29c   : > { %v7085_v33 = vpop.f32.mrf.mxu1  ;;  %3896 = vmatpush.bf16.msra.mxu2 %v5621_v18  ;;  %v5619_v18 = vld [vmem:[%s7758_s2 + $0x78] sm:$0xff]  ;;  %v7121_v62 = vsel %vm1343_vm5, %v3962_v19, %v3964_v39  ;;  %v1604_v19 = vadd.f32 %v6565_v10, %v6744_v59  ;;  %v3336_v10 = vshll.u32 %v6879_v63, 16  ;;  %v3614_v59 = vld [vmem:[#allocation2 + $0x68] sm:$0xe]  ;;  %v5601_v63 = vld [vmem:[%s7758_s2 + $0x10] sm:$0xff] }
 0x29d   : > { %v1904_v43 = vadd.f32 %v6953_v26, %v1889_v53  ;;  %v7101_v21 = vpop.f32.mrf.mxu2  ;;  %v7112_v51 = vsel %vm1790_vm6, %v4405_v20, %v7775_v48  ;;  %v4281_v53 = vrot.slane %v4279_v1, 3  ;;  %7877 = vst [vmem:[#allocation22_spill] sm:$0xff] %v7121_v62  ;;  %v7124_v20 = vld [vmem:[#allocation2 + $0x60] sm:$0xff]  ;;  %3727 = vmatpush.bf16.msra.mxu1 %v5619_v18  ;;  %3462 = vmatpush.bf16.msrb.mxu3 %v5601_v63  ;;  %v3798_v63 = vshll.u32 %v6770_v3, 16 }
 0x29e   : > { %v3103_v38 = vrot.slane %v7124_v20, 3 }
 0x29f   : > { %1916 = vst [vmem:[%s6962_s27 + $0x20] sm:$0xff] %v1904_v43  ;;  %v7876_v43 = vld [vmem:[#allocation25_spill] sm:$0xff]  ;;  %v7127_v1 = vor.u32 %v4281_v53, %v4278_v11 }
 0x2a0   : > { %v1771_v56 = vadd.f32 %v7876_v43, %v1603_v37  ;;  %3897 = vmatpush.bf16.msra.mxu2 %v5620_v35  ;;  %v7879_v43 = vrot.slane %v7044_v32, 3  ;;  %v3332_v35 = vshrl.u32 %v6805_v13, 16  ;;  %v5618_v13 = vld [vmem:[%s7758_s2 + $0x70] sm:$0xff] }
 0x2a1   : > { %7878 = vst [vmem:[#allocation25_spill] sm:$0xff] %v7127_v1  ;;  %3728 = vmatpush.bf16.msra.mxu1 %v5618_v13 }
 0x2a2   : > { %5421 = vmatmul.msk.bf16.gmra.mxu0 %vm751_vm2, %v4119_v22  ;;  %v1867_v4 = vpop.f32.mrf.mxu3  ;;  %5251 = vmatmul.msk.bf16.gmra.mxu2 %vm751_vm2, %v3331_v50  ;;  %v7133_v22 = vsel %vm1622_vm8, %v4273_v8, %v7127_v1  ;;  %v3104_v50 = vsel %vm1790_vm6, %v7879_v43, %v3103_v38  ;;  %v7880_v8 = vld [vmem:[#allocation27_spill] sm:$0xff]  ;;  %v1605_v43 = vadd.f32 %v6582_v47, %v6786_v0  ;;  %v7882_v47 = vld [vmem:[#allocation28_spill] sm:$0xff] }
 0x2a3   : > { %v1890_v37 = vadd.f32 %v1867_v4, %v1771_v56  ;;  %v7145_v4 = vpop.f32.mrf.mxu0  ;;  %v1772_v56 = vadd.f32 %v7880_v8, %v1604_v19  ;;  %v3334_v19 = vor.u32 %v3332_v35, %v3330_v34  ;;  %v3338_v8 = vrot.slane %v3336_v10, 1  ;;  %v5617_v35 = vld [vmem:[%s7758_s2 + $0x68] sm:$0xff] }
 0x2a4   : > { %v7129_v23 = vpop.f32.mrf.mxu1  ;;  %v1773_v0 = vadd.f32 %v7882_v47, %v1605_v43  ;;  %v7883_v47 = vld [vmem:[#allocation17_spill] sm:$0xff] }
 0x2a5   : > { %v1905_v39 = vadd.f32 %v6953_v26, %v1890_v37  ;;  %v7150_v11 = vpop.f32.mrf.mxu2  ;;  %v3339_v34 = vsel %vm674_vm3, %v3334_v19, %v3338_v8  ;;  %v1606_v8 = vadd.f32 %v6601_v30, %v6828_v41  ;;  %3729 = vmatpush.bf16.msra.mxu1 %v5617_v35 }
 0x2a7   : > { %1917 = vst [vmem:[%s6962_s27 + $0x28] sm:$0xff] %v1905_v39  ;;  %5038 = vmatmul.msk.bf16.gmra.mxu3 %vm751_vm2, %v6623_v49  ;;  %5208 = vmatmul.msk.bf16.gmra.mxu1 %vm751_vm2, %v3104_v50  ;;  %v4120_v49 = vrot.slane %v7017_v45, 2  ;;  %v3648_v39 = vunpack.c.l.b16 %v3614_v59  ;;  %v7881_v45 = vunpack.c.l.b16 %v6746_v57  ;;  %v1774_v41 = vadd.f32 %v6568_v36, %v1606_v8 }
 0x2a9   : > { %v7168_v59 = vpack.c.b16 %v7881_v45, %v3648_v39 }
 0x2aa   : > { %v1870_v53 = vpop.f32.mrf.mxu3 }
 0x2ab   : > { %v1891_v18 = vadd.f32 %v1870_v53, %v1772_v56  ;;  %v4121_v56 = vsel %vm1343_vm5, %v4118_v15, %v4120_v49  ;;  %v7177_v15 = vld [vmem:[#allocation2 + $0x68] sm:$0xff]  ;;  %v7180_v53 = vpop.f32.mrf.mxu0  ;;  %v3790_v19 = vshll.u32 %v7168_v59, 16 }
 0x2ac   : > { %v7152_v37 = vpop.f32.mrf.mxu1  ;;  %v3105_v57 = vrot.slane %v7177_v15, 3 }
 0x2ad   : > { %v1906_v50 = vadd.f32 %v6953_v26, %v1891_v18  ;;  %v7182_v39 = vpop.f32.mrf.mxu2 }
 0x2ae   : > { %v3106_v45 = vsel %vm1790_vm6, %v3103_v38, %v3105_v57 }
 0x2af   : > { %1918 = vst [vmem:[%s6962_s27 + $0x30] sm:$0xff] %v1906_v50  ;;  %v3787_v50 = vshrl.u32 %v7168_v59, 16 }
 0x2b1   : > { %v3789_v30 = vrot.slane %v3787_v50, 1 }
 0x2b2   : > { %5422 = vmatmul.msk.bf16.gmra.mxu0 %vm751_vm2, %v4121_v56  ;;  %v1872_v10 = vpop.f32.mrf.mxu3  ;;  %5252 = vmatmul.msk.bf16.gmra.mxu2 %vm751_vm2, %v3339_v34  ;;  %v3795_v56 = vshrl.u32 %v6770_v3, 16  ;;  %v3792_v34 = vrot.slane %v3790_v19, 2 }
 0x2b3   : > { %v1892_v18 = vadd.f32 %v1872_v10, %v1773_v0  ;;  %v5616_v0 = vld [vmem:[%s7758_s2 + $0x60] sm:$0xff]  ;;  %v7207_v48 = vpop.f32.mrf.mxu0 }
 0x2b4   : > { %v7184_v43 = vpop.f32.mrf.mxu1  ;;  %v3797_v10 = vrot.slane %v3795_v56, 1  ;;  %3730 = vmatpush.bf16.msra.mxu1 %v5616_v0  ;;  %v3793_v62 = vor.u32 %v3792_v34, %v3789_v30  ;;  %v7884_v0 = vld [vmem:[#allocation29_spill] sm:$0xff] }
 0x2b5   : > { %v1907_v13 = vadd.f32 %v6953_v26, %v1892_v18  ;;  %v3800_v18 = vrot.slane %v3798_v63, 2  ;;  %v7210_v36 = vpop.f32.mrf.mxu2  ;;  %v4071_v63 = vld [vmem:[#allocation2 + $0xa0] sm:$0x3]  ;;  %v3107_v30 = vrot.slane %v7884_v0, 3 }
 0x2b7   : > { %1919 = vst [vmem:[%s6962_s27 + $0x38] sm:$0xff] %v1907_v13  ;;  %5161 = vmatmul.msk.bf16.vlgmr.msra.gmra.mxu3 %vm751_vm2, %v7883_v47  ;;  %5209 = vmatmul.msk.bf16.gmra.mxu1 %vm751_vm2, %v3106_v45  ;;  %v4122_v47 = vrot.slane %v7081_v24, 2  ;;  %v1607_v45 = vadd.f32 %v6620_v52, %v6864_v12  ;;  %v3801_v1 = vor.u32 %v3800_v18, %v3797_v10  ;;  %v2814_v12 = vrot.slane %v6989_v25, 2 }
 0x2b8   : > { %v4105_v10 = vunpack.c.l.b16 %v4071_v63  ;;  %v3108_v25 = vsel %vm1790_vm6, %v3105_v57, %v3107_v30 }
 0x2b9   : > { %v4123_v19 = vsel %vm1343_vm5, %v4120_v49, %v4122_v47  ;;  %v1775_v8 = vadd.f32 %v6587_v17, %v1607_v45  ;;  %v3802_v56 = vsel %vm1175_vm7, %v3793_v62, %v3801_v1  ;;  %v7885_v49 = vld [vmem:[#allocation36_spill] sm:$0xff]  ;;  %v3804_v62 = vshrl.u32 %v6849_v44, 16 }
 0x2ba   : > { %v1875_v35 = vpop.f32.mrf.mxu3  ;;  %v1608_v18 = vadd.f32 %v7885_v49, %v6898_v5  ;;  %v5600_v5 = vld [vmem:[%s7758_s2 + $0x8] sm:$0xff]  ;;  %v7888_v49 = vld [vmem:[#allocation38_spill] sm:$0xff] }
 0x2bb   : > { %v1893_v38 = vadd.f32 %v1875_v35, %v1774_v41  ;;  %v3807_v35 = vshll.u32 %v6849_v44, 16  ;;  %v3806_v63 = vrot.slane %v3804_v62, 1  ;;  %3463 = vmatpush.bf16.msrb.mxu3 %v5600_v5 }
 0x2bc   : > { %v7202_v13 = vpop.f32.mrf.mxu1 }
 0x2bd   : > { %v1908_v50 = vadd.f32 %v6953_v26, %v1893_v38  ;;  %v7886_v38 = vrot.slane %v7864_v14, 2  ;;  %v7887_v14 = vld [vmem:[#allocation33_spill] sm:$0xff] }
 0x2bf   : > { %1920 = vst [vmem:[%s6962_s27 + $0x40] sm:$0xff] %v1908_v50  ;;  %v2815_v45 = vsel %vm1343_vm5, %v7886_v38, %v2814_v12  ;;  %v7231_v50 = vpop.f32.mrf.mxu0 }
 0x2c2   : > { %5423 = vmatmul.msk.bf16.gmra.mxu0 %vm751_vm2, %v4123_v19  ;;  %v1877_v52 = vpop.f32.mrf.mxu3  ;;  %5355 = vmatmul.msk.bf16.vlgmr.msra.gmra.mxu2 %vm751_vm2, %v3802_v56  ;;  %v7239_v19 = vpop.f32.mrf.mxu2  ;;  %v1776_v56 = vadd.f32 %v7887_v14, %v1608_v18  ;;  %v7890_v18 = vld [vmem:[#allocation35_spill] sm:$0xff]  ;;  %v3668_v14 = vrot.slane %v7168_v59, 1 }
 0x2c3   : > { %v1894_v41 = vadd.f32 %v1877_v52, %v1775_v8  ;;  %v4112_v8 = vpack.c.b16 %v4105_v10, %v4105_v10  ;;  %v3809_v52 = vrot.slane %v3807_v35, 2 }
 0x2c4   : > { %v7220_v34 = vpop.f32.mrf.mxu1 }
 0x2c5   : > { %v1909_v17 = vadd.f32 %v6953_v26, %v1894_v41  ;;  %v4124_v41 = vrot.slane %v4112_v8, 2 }
 0x2c7   : > { %1921 = vst [vmem:[%s6962_s27 + $0x48] sm:$0xff] %v1909_v17  ;;  %5162 = vmatmul.msk.bf16.gmra.mxu3 %vm751_vm2, %v2815_v45  ;;  %5210 = vmatmul.msk.bf16.gmra.mxu1 %vm751_vm2, %v3108_v25  ;;  %v1609_v17 = vadd.f32 %v7888_v49, %v6924_v61  ;;  %v3810_v45 = vor.u32 %v3809_v52, %v3806_v63  ;;  %v7249_v10 = vpop.f32.mrf.mxu0  ;;  %v2816_v61 = vrot.slane %v7044_v32, 2  ;;  %v7891_v49 = vld [vmem:[#allocation40_spill] sm:$0xff] }
 0x2c8   : > { %v4125_v25 = vsel %vm1343_vm5, %v4122_v47, %v4124_v41  ;;  %7889 = vst [vmem:[#allocation27_spill] sm:$0xff] %v7249_v10  ;;  %v3669_v47 = vrot.slane %v6770_v3, 1 }
 0x2c9   : > { %v1777_v62 = vadd.f32 %v7890_v18, %v1609_v17  ;;  %v3811_v35 = vsel %vm1175_vm7, %v3801_v1, %v3810_v45  ;;  %v3816_v1 = vshll.u32 %v6908_v9, 16 }
 0x2ca   : > { %v1880_v57 = vpop.f32.mrf.mxu3  ;;  %v7254_v5 = vpop.f32.mrf.mxu2  ;;  %v3670_v41 = vsel %vm896_vm4, %v3668_v14, %v3669_v47  ;;  %v3671_v14 = vrot.slane %v6849_v44, 1 }
 0x2cb   : > { %v1895_v0 = vadd.f32 %v1880_v57, %v1776_v56  ;;  %v3813_v57 = vshrl.u32 %v6908_v9, 16  ;;  %v3818_v3 = vrot.slane %v3816_v1, 2  ;;  %v3822_v1 = vshrl.u32 %v6969_v46, 16 }
 0x2cc   : > { %v7242_v30 = vpop.f32.mrf.mxu1 }
 0x2cd   : > { %v1910_v38 = vadd.f32 %v6953_v26, %v1895_v0  ;;  %v2817_v0 = vsel %vm1343_vm5, %v2814_v12, %v2816_v61  ;;  %v3815_v32 = vrot.slane %v3813_v57, 1  ;;  %v5599_v12 = vld [vmem:[%s7758_s2] sm:$0xff]  ;;  %v3824_v44 = vrot.slane %v3822_v1, 1 }
 0x2ce   : > { %3464 = vmatpush.bf16.msrb.mxu3 %v5599_v12  ;;  %v7896_v1 = vld [vmem:[#allocation3_spill] sm:$0xff] }
 0x2cf   : > { %1922 = vst [vmem:[%s6962_s27 + $0x50] sm:$0xff] %v1910_v38  ;;  %v3819_v18 = vor.u32 %v3818_v3, %v3815_v32  ;;  %v3672_v32 = vsel %vm896_vm4, %v3669_v47, %v3671_v14  ;;  %v2820_v47 = vrot.slane %v7177_v15, 2  ;;  %v5627_v15 = vld [vmem:[%s7758_s2 + $0xb8] sm:$0xff] }
 0x2d2   : > { %5424 = vmatmul.msk.bf16.gmra.mxu0 %vm751_vm2, %v4125_v25  ;;  %v1882_v8 = vpop.f32.mrf.mxu3  ;;  %5356 = vmatmul.msk.bf16.gmra.mxu2 %vm751_vm2, %v3811_v35  ;;  %v7273_v38 = vpop.f32.mrf.mxu2 }
 0x2d3   : > { %v1896_v56 = vadd.f32 %v1882_v8, %v1777_v62  ;;  %v3820_v62 = vsel %vm1175_vm7, %v3810_v45, %v3819_v18  ;;  %v2818_v8 = vrot.slane %v7124_v20, 2  ;;  %4012 = vmatpush.bf16.msra.mxu3 %v5627_v15 }
 0x2d4   : > { %v7260_v63 = vpop.f32.mrf.mxu1 }
 0x2d5   : > { %v1911_v52 = vadd.f32 %v6953_v26, %v1896_v56  ;;  %v7892_v56 = vld [vmem:[#allocation42_spill] sm:$0xff]  ;;  %v2819_v45 = vsel %vm1343_vm5, %v2816_v61, %v2818_v8 }
 0x2d7   : > { %1923 = vst [vmem:[%s6962_s27 + $0x58] sm:$0xff] %v1911_v52  ;;  %5163 = vmatmul.msk.bf16.gmra.mxu3 %vm751_vm2, %v2817_v0  ;;  %5333 = vmatmul.msk.bf16.vlgmr.msra.gmra.mxu1 %vm751_vm2, %v3670_v41  ;;  %v3825_v0 = vshll.u32 %v6969_v46, 16 }
 0x2d9   : > { %v3827_v20 = vrot.slane %v3825_v0, 2 }
 0x2da   : > { %v2270_v59 = vpop.f32.mrf.mxu3  ;;  %v7291_v41 = vpop.f32.mrf.mxu2 }
 0x2db   : > { %v7271_v17 = vadd.f32 %v2270_v59, %v7891_v49  ;;  %v7893_v59 = vld [vmem:[#allocation43_spill] sm:$0xff]  ;;  %v3828_v12 = vor.u32 %v3827_v20, %v3824_v44  ;;  %v3834_v44 = vshll.u32 %v7027_v55, 16  ;;  %v5644_v20 = vld [vmem:[%s7758_s2 + $0x118] sm:$0xff] }
 0x2dc   : > { %v7275_v25 = vpop.f32.mrf.mxu1  ;;  %4457 = vmatpush.bf16.msrb.mxu2 %v5644_v20  ;;  %v5642_v20 = vld [vmem:[%s7758_s2 + $0x108] sm:$0xff] }
 0x2e2   : > { %v2272_v35 = vpop.f32.mrf.mxu3  ;;  %5357 = vmatmul.msk.bf16.gmra.mxu2 %vm751_vm2, %v3820_v62 }
 0x2e3   : > { %v7285_v52 = vadd.f32 %v2272_v35, %v7892_v56  ;;  %v7302_v35 = vpop.f32.mrf.mxu2  ;;  %v3829_v56 = vsel %vm1175_vm7, %v3819_v18, %v3828_v12  ;;  %v2821_v18 = vsel %vm1343_vm5, %v2818_v8, %v2820_v47  ;;  %v3836_v8 = vrot.slane %v3834_v44, 2  ;;  %v5641_v44 = vld [vmem:[%s7758_s2 + $0x100] sm:$0xff] }
 0x2e4   : > { %v7287_v57 = vpop.f32.mrf.mxu1  ;;  %7895 = vst [vmem:[#allocation17_spill] sm:$0xff] %v7302_v35 }
 0x2e7   : > { %5164 = vmatmul.msk.bf16.gmra.mxu3 %vm751_vm2, %v2819_v45  ;;  %5334 = vmatmul.msk.bf16.gmra.mxu1 %vm751_vm2, %v3672_v32  ;;  %v3673_v45 = vrot.slane %v6908_v9, 1  ;;  %v3831_v32 = vshrl.u32 %v7027_v55, 16  ;;  %v2769_v9 = vld [vmem:[#allocation2 + $0x70] sm:$0x3] }
 0x2ea   : > { %v2275_v3 = vpop.f32.mrf.mxu3 }
 0x2eb   : > { %v7298_v49 = vadd.f32 %v2275_v3, %v7893_v59  ;;  %v3674_v3 = vsel %vm896_vm4, %v3671_v14, %v3673_v45  ;;  %v7328_v14 = vpop.f32.mrf.mxu2 }
 0x2ec   : > { %v7300_v62 = vpop.f32.mrf.mxu1  ;;  %7897 = vst [vmem:[#allocation29_spill] sm:$0xff] %v7328_v14 }
 0x2ed   : > { %7894 = vst [vmem:[#allocation28_spill] sm:$0xff] %v7300_v62 }
 0x2f2   : > { %v2277_v61 = vpop.f32.mrf.mxu3  ;;  %5358 = vmatmul.msk.bf16.gmra.mxu2 %vm751_vm2, %v3829_v56  ;;  %v5643_v56 = vld [vmem:[%s7758_s2 + $0x110] sm:$0xff] }
 0x2f3   : > { %v7309_v0 = vadd.f32 %v2277_v61, %v7896_v1  ;;  %v3833_v61 = vrot.slane %v3831_v32, 1  ;;  %4458 = vmatpush.bf16.msrb.mxu2 %v5643_v56  ;;  %v5640_v32 = vld [vmem:[%s7758_s2 + $0xf8] sm:$0xff] }
 0x2f4   : > { %v7323_v59 = vpop.f32.mrf.mxu1  ;;  %4339 = vmatpush.bf16.msrb.mxu1 %v5640_v32  ;;  %v3843_v32 = vshll.u32 %v7083_v6, 16 }
 0x2f5   : > { %v3837_v35 = vor.u32 %v3836_v8, %v3833_v61  ;;  %v3675_v8 = vrot.slane %v6969_v46, 1 }
 0x2f6   : > { %v3845_v46 = vrot.slane %v3843_v32, 2 }
 0x2f7   : > { %5165 = vmatmul.msk.bf16.gmra.mxu3 %vm751_vm2, %v2821_v18  ;;  %5335 = vmatmul.msk.bf16.gmra.mxu1 %vm751_vm2, %v3674_v3  ;;  %v2803_v18 = vunpack.c.l.b16 %v2769_v9  ;;  %v7898_v3 = vld [vmem:[#allocation5_spill] sm:$0xff]  ;;  %v3838_v9 = vsel %vm1175_vm7, %v3828_v12, %v3837_v35  ;;  %v3676_v14 = vsel %vm896_vm4, %v3673_v45, %v3675_v8 }
 0x2f8   : > { %4459 = vmatpush.bf16.msrb.mxu2 %v5642_v20  ;;  %v3840_v20 = vshrl.u32 %v7083_v6, 16  ;;  %v5639_v6 = vld [vmem:[%s7758_s2 + $0xf0] sm:$0xff] }
 0x2f9   : > { %v2810_v62 = vpack.c.b16 %v2803_v18, %v2803_v18  ;;  %v5626_v45 = vld [vmem:[%s7758_s2 + $0xb0] sm:$0xff]  ;;  %4340 = vmatpush.bf16.msrb.mxu1 %v5639_v6 }
 0x2fa   : > { %v2280_v1 = vpop.f32.mrf.mxu3  ;;  %4013 = vmatpush.bf16.msra.mxu3 %v5626_v45 }
 0x2fb   : > { %v7331_v10 = vadd.f32 %v2280_v1, %v7898_v3  ;;  %v2822_v61 = vrot.slane %v2810_v62, 2  ;;  %v7899_v1 = vld [vmem:[#allocation7_spill] sm:$0xff]  ;;  %v7350_v3 = vpop.f32.mrf.mxu2  ;;  %v3842_v62 = vrot.slane %v3840_v20, 1  ;;  %v3677_v20 = vrot.slane %v7027_v55, 1 }
 0x2fc   : > { %v7343_v15 = vpop.f32.mrf.mxu1  ;;  %7900 = vst [vmem:[#allocation36_spill] sm:$0xff] %v7350_v3  ;;  %4460 = vmatpush.bf16.msrb.mxu2 %v5641_v44 }
 0x2fd   : > { %v2823_v12 = vsel %vm1343_vm5, %v2820_v47, %v2822_v61  ;;  %v3846_v44 = vor.u32 %v3845_v46, %v3842_v62  ;;  %v3678_v46 = vsel %vm896_vm4, %v3675_v8, %v3677_v20 }
 0x302   : > { %v2282_v56 = vpop.f32.mrf.mxu3  ;;  %5359 = vmatmul.msk.bf16.gmra.mxu2 %vm751_vm2, %v3838_v9 }
 0x303   : > { %v7348_v18 = vadd.f32 %v2282_v56, %v7899_v1  ;;  %v7366_v47 = vpop.f32.mrf.mxu2 }
 0x304   : > { %v7361_v1 = vpop.f32.mrf.mxu1  ;;  %7901 = vst [vmem:[#allocation33_spill] sm:$0xff] %v7366_v47  ;;  %v7913_v47 = vld [vmem:[#allocation30_spill] sm:$0xff] }
 0x307   : > { %5166 = vmatmul.msk.bf16.gmra.mxu3 %vm751_vm2, %v2823_v12  ;;  %5336 = vmatmul.msk.bf16.gmra.mxu1 %vm751_vm2, %v3676_v14  ;;  %v5638_v14 = vld [vmem:[%s7758_s2 + $0xe8] sm:$0xff]  ;;  %v5637_v12 = vld [vmem:[%s7758_s2 + $0xe0] sm:$0xff] }
 0x308   : > { %4341 = vmatpush.bf16.msrb.mxu1 %v5638_v14 }
 0x30a   : > { %v2285_v9 = vpop.f32.mrf.mxu3 }
 0x30b   : > { %v7359_v56 = vadd.f32 %v2285_v9, %v6872_v40  ;;  %v3847_v40 = vsel %vm1175_vm7, %v3837_v35, %v3846_v44  ;;  %v7902_v9 = vld [vmem:[#allocation8_spill] sm:$0xff]  ;;  %v3626_v35 = vld [vmem:[#allocation2 + $0x98] sm:$0x1]  ;;  %v7389_v44 = vpop.f32.mrf.mxu2 }
 0x30c   : > { %v7383_v62 = vpop.f32.mrf.mxu1  ;;  %7903 = vst [vmem:[#allocation38_spill] sm:$0xff] %v7389_v44  ;;  %4342 = vmatpush.bf16.msrb.mxu1 %v5637_v12  ;;  %v3660_v55 = vunpack.c.l.b16 %v3626_v35  ;;  %v5691_v44 = vld [vmem:[#allocation2 + $0x68] sm:$0xff] }
 0x30e   : > { %v3667_v45 = vpack.c.b16 %v3660_v55, %v3660_v55 }
 0x312   : > { %v2287_v61 = vpop.f32.mrf.mxu3  ;;  %5360 = vmatmul.msk.bf16.gmra.mxu2 %vm751_vm2, %v3847_v40 }
 0x313   : > { %v7378_v32 = vadd.f32 %v2287_v61, %v6906_v29  ;;  %v7396_v40 = vpop.f32.mrf.mxu2  ;;  %v3679_v61 = vrot.slane %v3667_v45, 1 }
 0x314   : > { %v7394_v14 = vpop.f32.mrf.mxu1  ;;  %7904 = vst [vmem:[#allocation35_spill] sm:$0xff] %v7396_v40 }
 0x315   : > { %v3680_v12 = vsel %vm896_vm4, %v3677_v20, %v3679_v61  ;;  %v7907_v20 = vld [vmem:[#allocation23_spill] sm:$0xff] }
 0x316   : > { %v2460_v45 = vadd.f32 %v7907_v20, %v7271_v17  ;;  %v7911_v17 = vld [vmem:[#allocation26_spill] sm:$0xff] }
 0x317   : > { %5269 = vmatmul.msk.bf16.vlgmr.msrb.gmra.mxu3 %vm751_vm2, %v7902_v9  ;;  %5337 = vmatmul.msk.bf16.gmra.mxu1 %vm751_vm2, %v3678_v46  ;;  %v7905_v46 = vld [vmem:[#allocation15_spill] sm:$0xff]  ;;  %v2461_v20 = vadd.f32 %v7911_v17, %v7285_v52 }
 0x31a   : > { %v2290_v29 = vpop.f32.mrf.mxu3 }
 0x31b   : > { %v7392_v6 = vadd.f32 %v2290_v29, %v6931_v7  ;;  %v7414_v55 = vpop.f32.mrf.mxu2 }
 0x31c   : > { %v7406_v7 = vpop.f32.mrf.mxu1  ;;  %7906 = vst [vmem:[#allocation40_spill] sm:$0xff] %v7414_v55  ;;  %v7912_v55 = vld [vmem:[#allocation13_spill] sm:$0xff] }
 0x322   : > { %v2292_v8 = vpop.f32.mrf.mxu3  ;;  %5463 = vmatmul.msk.bf16.vlgmr.msrb.gmra.mxu2 %vm751_vm2, %v6877_v42  ;;  %v5625_v42 = vld [vmem:[%s7758_s2 + $0xa8] sm:$0xff] }
 0x323   : > { %v7401_v9 = vadd.f32 %v2292_v8, %v7905_v46  ;;  %4014 = vmatpush.bf16.msra.mxu3 %v5625_v42  ;;  %v7910_v42 = vld [vmem:[#allocation12_spill] sm:$0xff] }
 0x324   : > { %v7423_v46 = vpop.f32.mrf.mxu1 }
 0x327   : > { %5270 = vmatmul.msk.bf16.gmra.mxu3 %vm751_vm2, %v5691_v44  ;;  %5338 = vmatmul.msk.bf16.gmra.mxu1 %vm751_vm2, %v3680_v12  ;;  %v7908_v44 = vld [vmem:[#allocation14_spill] sm:$0xff]  ;;  %v7426_v12 = vpop.f32.mrf.mxu2 }
 0x328   : > { %7909 = vst [vmem:[#allocation42_spill] sm:$0xff] %v7426_v12 }
 0x32a   : > { %v2295_v35 = vpop.f32.mrf.mxu3 }
 0x32b   : > { %v7409_v29 = vadd.f32 %v2295_v35, %v6998_v27  ;;  %v2627_v27 = vadd.f32 %v7050_v2, %v2460_v45  ;;  %v5692_v35 = vld [vmem:[#allocation2 + $0x70] sm:$0xff]  ;;  %v2628_v2 = vadd.f32 %v7085_v33, %v2461_v20 }
 0x32c   : > { %v7436_v45 = vpop.f32.mrf.mxu1 }
 0x32d   : > { %v2746_v52 = vadd.f32 %v7025_v54, %v2628_v2  ;;  %v7916_v54 = vld [vmem:[#allocation48_spill] sm:$0xff]  ;;  %v7918_v2 = vld [vmem:[#allocation47_spill] sm:$0xff] }
 0x332   : > { %v2297_v8 = vpop.f32.mrf.mxu3  ;;  %5464 = vmatmul.msk.bf16.gmra.mxu2 %vm751_vm2, %v7908_v44  ;;  %v2745_v44 = vadd.f32 %v7000_v60, %v2627_v27  ;;  %v7914_v27 = vld [vmem:[#allocation16_spill] sm:$0xff] }
 0x333   : > { %v7421_v61 = vadd.f32 %v2297_v8, %v7023_v28 }
 0x337   : > { %5271 = vmatmul.msk.bf16.gmra.mxu3 %vm751_vm2, %v5692_v35  ;;  %5441 = vmatmul.msk.bf16.vlgmr.msrb.gmra.mxu1 %vm751_vm2, %v7910_v42  ;;  %v7439_v35 = vpop.f32.mrf.mxu2  ;;  %v2462_v42 = vadd.f32 %v7913_v47, %v7298_v49  ;;  %v5693_v47 = vld [vmem:[#allocation2 + $0x78] sm:$0xff] }
 0x339   : > { %v2629_v17 = vadd.f32 %v7129_v23, %v2462_v42 }
 0x33a   : > { %v2875_v28 = vpop.f32.mrf.mxu3 }
 0x33b   : > { %v2905_v8 = vadd.f32 %v2875_v28, %v2745_v44  ;;  %v2747_v28 = vadd.f32 %v7057_v16, %v2629_v17 }
 0x33d   : > { %v3072_v40 = vadd.f32 %v7912_v55, %v2905_v8 }
 0x33f   : > { %v3190_v12 = vadd.f32 %v7323_v59, %v3072_v40  ;;  %v5624_v59 = vld [vmem:[%s7758_s2 + $0xa0] sm:$0xff]  ;;  %v7915_v40 = vld [vmem:[#allocation45_spill] sm:$0xff]  ;;  %v7463_v23 = vpop.f32.mrf.mxu2 }
 0x340   : > { %4015 = vmatpush.bf16.msra.mxu3 %v5624_v59 }
 0x341   : > { %v3202_v3 = vadd.f32 %v6953_v26, %v3190_v12  ;;  %v7917_v12 = vld [vmem:[#allocation31_spill] sm:$0xff] }
 0x342   : > { %v2877_v60 = vpop.f32.mrf.mxu3  ;;  %5465 = vmatmul.msk.bf16.gmra.mxu2 %vm751_vm2, %v7914_v27  ;;  %v2463_v20 = vadd.f32 %v7917_v12, %v7309_v0  ;;  %v7919_v27 = vld [vmem:[#allocation32_spill] sm:$0xff] }
 0x343   : > { %3214 = vst [vmem:[%s6962_s27 + $0x60] sm:$0xff] %v3202_v3  ;;  %v2906_v33 = vadd.f32 %v2877_v60, %v2746_v52  ;;  %v7457_v3 = vpop.f32.mrf.mxu1 }
 0x344   : > { %v2630_v52 = vadd.f32 %v7152_v37, %v2463_v20  ;;  %v7920_v37 = vld [vmem:[#allocation19_spill] sm:$0xff] }
 0x345   : > { %v3073_v55 = vadd.f32 %v7915_v40, %v2906_v33  ;;  %v2464_v33 = vadd.f32 %v7919_v27, %v7331_v10 }
 0x346   : > { %v2748_v59 = vadd.f32 %v7101_v21, %v2630_v52  ;;  %v7921_v21 = vld [vmem:[#allocation34_spill] sm:$0xff] }
 0x347   : > { %v3191_v49 = vadd.f32 %v7343_v15, %v3073_v55  ;;  %5272 = vmatmul.msk.bf16.gmra.mxu3 %vm751_vm2, %v5693_v47  ;;  %5442 = vmatmul.msk.bf16.gmra.mxu1 %vm751_vm2, %v7916_v54  ;;  %v7478_v17 = vpop.f32.mrf.mxu2  ;;  %v5694_v47 = vld [vmem:[#allocation2 + $0x80] sm:$0xff]  ;;  %v2465_v54 = vadd.f32 %v7921_v21, %v7348_v18  ;;  %v7923_v18 = vld [vmem:[#allocation37_spill] sm:$0xff] }
 0x349   : > { %v3203_v44 = vadd.f32 %v6953_v26, %v3191_v49  ;;  %v2631_v49 = vadd.f32 %v7184_v43, %v2464_v33 }
 0x34a   : > { %v2880_v8 = vpop.f32.mrf.mxu3 }
 0x34b   : > { %3215 = vst [vmem:[%s6962_s27 + $0x68] sm:$0xff] %v3203_v44  ;;  %v2907_v15 = vadd.f32 %v2880_v8, %v2747_v28  ;;  %v7473_v40 = vpop.f32.mrf.mxu1  ;;  %v2749_v12 = vadd.f32 %v7150_v11, %v2631_v49  ;;  %v2632_v8 = vadd.f32 %v7202_v13, %v2465_v54  ;;  %v7924_v13 = vld [vmem:[#allocation18_spill] sm:$0xff] }
 0x34d   : > { %v3074_v42 = vadd.f32 %v7918_v2, %v2907_v15  ;;  %v2466_v2 = vadd.f32 %v7923_v18, %v7359_v56  ;;  %v2750_v11 = vadd.f32 %v7182_v39, %v2632_v8  ;;  %v7925_v39 = vld [vmem:[#allocation24_spill] sm:$0xff]  ;;  %v7930_v8 = vrot.slane %v7081_v24, 3 }
 0x34f   : > { %v3192_v60 = vadd.f32 %v7361_v1, %v3074_v42  ;;  %v7495_v15 = vpop.f32.mrf.mxu2 }
 0x351   : > { %v3204_v0 = vadd.f32 %v6953_v26, %v3192_v60  ;;  %v4219_v60 = vld [vmem:[#allocation2 + $0xa0] sm:$0x7] }
 0x352   : > { %v2882_v16 = vpop.f32.mrf.mxu3  ;;  %5466 = vmatmul.msk.bf16.gmra.mxu2 %vm751_vm2, %v7039_v58 }
 0x353   : > { %3216 = vst [vmem:[%s6962_s27 + $0x70] sm:$0xff] %v3204_v0  ;;  %v2908_v55 = vadd.f32 %v2882_v16, %v2748_v59  ;;  %v7491_v43 = vpop.f32.mrf.mxu1  ;;  %v2633_v0 = vadd.f32 %v7220_v34, %v2466_v2  ;;  %v5695_v16 = vld [vmem:[#allocation2 + $0x88] sm:$0xff] }
 0x355   : > { %v3075_v1 = vadd.f32 %v7920_v37, %v2908_v55  ;;  %v7927_v55 = vld [vmem:[#allocation39_spill] sm:$0xff]  ;;  %v2751_v34 = vadd.f32 %v7210_v36, %v2633_v0 }
 0x356   : > { %v2467_v37 = vadd.f32 %v7927_v55, %v7378_v32  ;;  %v7929_v32 = vld [vmem:[#allocation41_spill] sm:$0xff] }
 0x357   : > { %v3193_v10 = vadd.f32 %v7383_v62, %v3075_v1  ;;  %5273 = vmatmul.msk.bf16.gmra.mxu3 %vm751_vm2, %v5694_v47  ;;  %5443 = vmatmul.msk.bf16.gmra.mxu1 %vm751_vm2, %v7010_v31  ;;  %v7922_v62 = vld [vmem:[#allocation21_spill] sm:$0xff]  ;;  %v7928_v47 = vld [vmem:[#allocation20_spill] sm:$0xff] }
 0x358   : > { %v2634_v54 = vadd.f32 %v7242_v30, %v2467_v37 }
 0x359   : > { %v3205_v58 = vadd.f32 %v6953_v26, %v3193_v10 }
 0x35a   : > { %v2885_v20 = vpop.f32.mrf.mxu3 }
 0x35b   : > { %3217 = vst [vmem:[%s6962_s27 + $0x78] sm:$0xff] %v3205_v58  ;;  %v2909_v44 = vadd.f32 %v2885_v20, %v2749_v12  ;;  %v7507_v59 = vpop.f32.mrf.mxu1  ;;  %v7522_v12 = vpop.f32.mrf.mxu0 }
 0x35d   : > { %v3076_v28 = vadd.f32 %v7922_v62, %v2909_v44  ;;  %v2468_v62 = vadd.f32 %v7929_v32, %v7392_v6 }
 0x35f   : > { %v3194_v31 = vadd.f32 %v7394_v14, %v3076_v28  ;;  %v4229_v14 = vunpack.c.l.b16 %v4219_v60  ;;  %v2752_v28 = vadd.f32 %v7239_v19, %v2634_v54  ;;  %v2635_v6 = vadd.f32 %v7260_v63, %v2468_v62  ;;  %v7932_v19 = vld [vmem:[#allocation6_spill] sm:$0xff]  ;;  %v7936_v54 = vld [vmem:[#allocation44_spill] sm:$0xff] }
 0x361   : > { %v3206_v42 = vadd.f32 %v6953_v26, %v3194_v31  ;;  %v4230_v49 = vpack.c.b16 %v4229_v14, %v4229_v14 }
 0x362   : > { %v2887_v52 = vpop.f32.mrf.mxu3  ;;  %5467 = vmatmul.msk.bf16.gmra.mxu2 %vm751_vm2, %v7112_v51  ;;  %v7513_v51 = vpop.f32.mrf.mxu2 }
 0x363   : > { %3218 = vst [vmem:[%s6962_s27 + $0x80] sm:$0xff] %v3206_v42  ;;  %v2910_v27 = vadd.f32 %v2887_v52, %v2750_v11  ;;  %v4409_v58 = vrot.slane %v4230_v49, 3  ;;  %v7525_v44 = vpop.f32.mrf.mxu1  ;;  %v7931_v11 = vld [vmem:[#allocation11_spill] sm:$0xff]  ;;  %v7545_v24 = vpop.f32.mrf.mxu0  ;;  %v2469_v52 = vadd.f32 %v7932_v19, %v7401_v9 }
 0x364   : > { %7926 = vst [vmem:[#allocation43_spill] sm:$0xff] %v7513_v51 }
 0x365   : > { %v3077_v33 = vadd.f32 %v7924_v13, %v2910_v27  ;;  %v4410_v31 = vsel %vm1790_vm6, %v7930_v8, %v4409_v58  ;;  %v2753_v27 = vadd.f32 %v7254_v5, %v2635_v6  ;;  %v4285_v13 = vshrl.u32 %v4230_v49, 16  ;;  %v7933_v5 = vld [vmem:[#allocation4_spill] sm:$0xff] }
 0x366   : > { %v2636_v14 = vadd.f32 %v7275_v25, %v2469_v52  ;;  %v2471_v58 = vadd.f32 %v7936_v54, %v7421_v61  ;;  %v7940_v52 = vld [vmem:[#allocation46_spill] sm:$0xff] }
 0x367   : > { %v3195_v56 = vadd.f32 %v7406_v7, %v3077_v33  ;;  %5274 = vmatmul.msk.bf16.gmra.mxu3 %vm751_vm2, %v5695_v16  ;;  %5444 = vmatmul.msk.bf16.gmra.mxu1 %vm751_vm2, %v7925_v39  ;;  %v2470_v16 = vadd.f32 %v7933_v5, %v7409_v29  ;;  %v7564_v39 = vld [vmem:[%s7759_s3] ss:$0 sm:$0xff] }
 0x368   : > { %v2754_v37 = vadd.f32 %v7273_v38, %v2636_v14  ;;  %v7941_v14 = vld [vmem:[#allocation49_spill] sm:$0xff] }
 0x369   : > { %v3207_v1 = vadd.f32 %v6953_v26, %v3195_v56  ;;  %v4287_v56 = vrot.slane %v4285_v13, 2 }
 0x36a   : > { %v2890_v10 = vpop.f32.mrf.mxu3  ;;  %v7534_v18 = vpop.f32.mrf.mxu2 }
 0x36b   : > { %3219 = vst [vmem:[%s6962_s27 + $0x88] sm:$0xff] %v3207_v1  ;;  %v2911_v7 = vadd.f32 %v2890_v10, %v2751_v34  ;;  %v7568_v1 = vpop.f32.mrf.mxu0 }
 0x36d   : > { %v3078_v21 = vadd.f32 %v7928_v47, %v2911_v7  ;;  %v7934_v7 = vld [vmem:[#allocation25_spill] sm:$0xff] }
 0x36f   : > { %v3196_v20 = vadd.f32 %v7423_v46, %v3078_v21  ;;  %v7935_v21 = vld [vmem:[#allocation9_spill] sm:$0xff] }
 0x371   : > { %v3208_v36 = vadd.f32 %v6953_v26, %v3196_v20 }
 0x372   : > { %v2892_v30 = vpop.f32.mrf.mxu3  ;;  %5468 = vmatmul.msk.bf16.gmra.mxu2 %vm751_vm2, %v4410_v31  ;;  %v7554_v0 = vpop.f32.mrf.mxu2 }
 0x373   : > { %3220 = vst [vmem:[%s6962_s27 + $0x90] sm:$0xff] %v3208_v36  ;;  %v2912_v46 = vadd.f32 %v2892_v30, %v2752_v28  ;;  %v7588_v62 = vpop.f32.mrf.mxu0  ;;  %v7937_v36 = vld [vmem:[#allocation28_spill] sm:$0xff] }
 0x374   : > { %v2638_v28 = vadd.f32 %v7937_v36, %v2471_v58 }
 0x375   : > { %v3079_v2 = vadd.f32 %v7145_v4, %v2912_v46  ;;  %v7551_v4 = vpop.f32.mrf.mxu1  ;;  %v7938_v46 = vld [vmem:[#allocation17_spill] sm:$0xff] }
 0x377   : > { %v3197_v42 = vadd.f32 %v7436_v45, %v3079_v2  ;;  %5377 = vmatmul.msk.bf16.vlgmr.msra.gmra.mxu3 %vm751_vm2, %v7931_v11  ;;  %5445 = vmatmul.msk.bf16.gmra.mxu1 %vm751_vm2, %v7133_v22  ;;  %v4288_v45 = vshll.u32 %v4230_v49, 16  ;;  %v2637_v49 = vadd.f32 %v7287_v57, %v2470_v16 }
 0x379   : > { %v3209_v60 = vadd.f32 %v6953_v26, %v3197_v42  ;;  %v4290_v9 = vrot.slane %v4288_v45, 3  ;;  %v2755_v57 = vadd.f32 %v7291_v41, %v2637_v49  ;;  %v2756_v41 = vadd.f32 %v7938_v46, %v2638_v28  ;;  %v7939_v42 = vld [vmem:[#allocation27_spill] sm:$0xff] }
 0x37a   : > { %v2895_v63 = vpop.f32.mrf.mxu3  ;;  %v7575_v10 = vpop.f32.mrf.mxu2 }
 0x37b   : > { %3221 = vst [vmem:[%s6962_s27 + $0x98] sm:$0xff] %v3209_v60  ;;  %v2913_v33 = vadd.f32 %v2895_v63, %v2753_v27  ;;  %v4291_v25 = vor.u32 %v4290_v9, %v4287_v56  ;;  %v7601_v19 = vpop.f32.mrf.mxu0 }
 0x37d   : > { %v3080_v22 = vadd.f32 %v7180_v53, %v2913_v33  ;;  %v4292_v47 = vsel %vm1622_vm8, %v7934_v7, %v4291_v25 }
 0x37f   : > { %v3198_v26 = vadd.f32 %v7457_v3, %v3080_v22  ;;  %v7571_v3 = vpop.f32.mrf.mxu1 }
 0x381   : > { %v3210_v55 = vadd.f32 %v7564_v39, %v3198_v26 }
 0x382   : > { %v2897_v53 = vpop.f32.mrf.mxu3  ;;  %v7595_v30 = vpop.f32.mrf.mxu2 }
 0x383   : > { %3222 = vst [vmem:[%s6962_s27 + $0xa0] sm:$0xff] %v3210_v55  ;;  %v2914_v34 = vadd.f32 %v2897_v53, %v2754_v37  ;;  %v7612_v13 = vpop.f32.mrf.mxu0  ;;  %v7942_v37 = vld [vmem:[#allocation10_spill] sm:$0xff] }
 0x385   : > { %v3081_v29 = vadd.f32 %v7207_v48, %v2914_v34 }
 0x387   : > { %v3199_v38 = vadd.f32 %v7473_v40, %v3081_v29  ;;  %5378 = vmatmul.msk.bf16.gmra.mxu3 %vm751_vm2, %v7935_v21  ;;  %5446 = vmatmul.msk.bf16.gmra.mxu1 %vm751_vm2, %v4292_v47  ;;  %v7592_v8 = vpop.f32.mrf.mxu1  ;;  %v7943_v47 = vld [vmem:[#allocation22_spill] sm:$0xff] }
 0x389   : > { %v3211_v48 = vadd.f32 %v7564_v39, %v3199_v38 }
 0x38a   : > { %v2900_v20 = vpop.f32.mrf.mxu3  ;;  %v7609_v27 = vpop.f32.mrf.mxu2 }
 0x38b   : > { %3223 = vst [vmem:[%s6962_s27 + $0xa8] sm:$0xff] %v3211_v48  ;;  %v2915_v32 = vadd.f32 %v2900_v20, %v2755_v57 }
 0x38d   : > { %v3082_v40 = vadd.f32 %v7231_v50, %v2915_v32 }
 0x38f   : > { %v3200_v31 = vadd.f32 %v7491_v43, %v3082_v40  ;;  %v7606_v60 = vpop.f32.mrf.mxu1 }
 0x391   : > { %v3212_v61 = vadd.f32 %v7564_v39, %v3200_v31 }
 0x392   : > { %v2902_v2 = vpop.f32.mrf.mxu3  ;;  %v7616_v22 = vpop.f32.mrf.mxu2 }
 0x393   : > { %3224 = vst [vmem:[%s6962_s27 + $0xb0] sm:$0xff] %v3212_v61  ;;  %v2916_v6 = vadd.f32 %v2902_v2, %v2756_v41 }
 0x395   : > { %v3083_v11 = vadd.f32 %v7939_v42, %v2916_v6  ;;  %v7952_v42 = vld [vmem:[#allocation29_spill] sm:$0xff] }
 0x397   : > { %v3201_v50 = vadd.f32 %v7507_v59, %v3083_v11  ;;  %5379 = vmatmul.msk.bf16.gmra.mxu3 %vm751_vm2, %v7940_v52  ;;  %v7614_v45 = vpop.f32.mrf.mxu1  ;;  %v7620_v59 = vpop.f32.mrf.mxu0 }
 0x399   : > { %v3213_v43 = vadd.f32 %v7564_v39, %v3201_v50 }
 0x39a   : > { %v3466_v63 = vpop.f32.mrf.mxu3  ;;  %v7624_v26 = vpop.f32.mrf.mxu2 }
 0x39b   : > { %3225 = vst [vmem:[%s6962_s27 + $0xb8] sm:$0xff] %v3213_v43  ;;  %v3467_v11 = vadd.f32 %v3466_v63, %v7952_v42  ;;  %v7955_v42 = vld [vmem:[#allocation33_spill] sm:$0xff] }
 0x39d   : > { %v3602_v52 = vadd.f32 %v7522_v12, %v3467_v11 }
 0x39f   : > { %v7622_v9 = vpop.f32.mrf.mxu1  ;;  %v7626_v16 = vpop.f32.mrf.mxu0 }
 0x3a2   : > { %v3468_v33 = vpop.f32.mrf.mxu3  ;;  %v7632_v53 = vpop.f32.mrf.mxu2 }
 0x3a7   : > { %5380 = vmatmul.msk.bf16.gmra.mxu3 %vm751_vm2, %v7941_v14  ;;  %v7628_v55 = vpop.f32.mrf.mxu1  ;;  %v7634_v34 = vpop.f32.mrf.mxu0 }
 0x3aa   : > { %v3471_v56 = vpop.f32.mrf.mxu3  ;;  %v7638_v49 = vpop.f32.mrf.mxu2 }
 0x3af   : > { %v7636_v29 = vpop.f32.mrf.mxu1  ;;  %v7644_v38 = vpop.f32.mrf.mxu0 }
 0x3b2   : > { %v3473_v5 = vpop.f32.mrf.mxu3  ;;  %v7650_v58 = vpop.f32.mrf.mxu2 }
 0x3b3   : > { %7945 = vst [vmem:[#allocation5_spill] sm:$0xff] %v7650_v58 }
 0x3b7   : > { %5381 = vmatmul.msk.bf16.gmra.mxu3 %vm751_vm2, %v7942_v37  ;;  %v7646_v21 = vpop.f32.mrf.mxu1  ;;  %v7652_v48 = vpop.f32.mrf.mxu0 }
 0x3b8   : > { %7944 = vst [vmem:[#allocation3_spill] sm:$0xff] %v7646_v21 }
 0x3b9   : > { %7946 = vst [vmem:[#allocation7_spill] sm:$0xff] %v7652_v48  ;;  %v3472_v48 = vadd.f32 %v3471_v56, %v7955_v42 }
 0x3ba   : > { %v3476_v25 = vpop.f32.mrf.mxu3  ;;  %v7658_v32 = vpop.f32.mrf.mxu2 }
 0x3bb   : > { %7948 = vst [vmem:[#allocation15_spill] sm:$0xff] %v7658_v32 }
 0x3bf   : > { %v7656_v20 = vpop.f32.mrf.mxu1  ;;  %v7662_v36 = vpop.f32.mrf.mxu0 }
 0x3c0   : > { %7947 = vst [vmem:[#allocation8_spill] sm:$0xff] %v7656_v20 }
 0x3c1   : > { %7949 = vst [vmem:[#allocation23_spill] sm:$0xff] %v7662_v36 }
 0x3c2   : > { %v7640_v7 = vpop.f32.mrf.mxu3  ;;  %v7666_v31 = vpop.f32.mrf.mxu2 }
 0x3c3   : > { %7951 = vst [vmem:[#allocation12_spill] sm:$0xff] %v7666_v31  ;;  %v3762_v31 = vadd.f32 %v7525_v44, %v3602_v52  ;;  %v7957_v52 = vld [vmem:[#allocation35_spill] sm:$0xff] }
 0x3c4   : > { %v3477_v42 = vadd.f32 %v3476_v25, %v7957_v52 }
 0x3c5   : > { %v3929_v36 = vadd.f32 %v7534_v18, %v3762_v31 }
 0x3c7   : > { %5382 = vmatmul.msk.bf16.gmra.mxu3 %vm751_vm2, %v7943_v47  ;;  %v7664_v28 = vpop.f32.mrf.mxu1  ;;  %v4177_v46 = vpop.f32.mrf.mxu0  ;;  %v7954_v47 = vld [vmem:[#allocation36_spill] sm:$0xff] }
 0x3c8   : > { %7950 = vst [vmem:[#allocation14_spill] sm:$0xff] %v7664_v28  ;;  %v3469_v28 = vadd.f32 %v3468_v33, %v7954_v47  ;;  %v3604_v33 = vadd.f32 %v7568_v1, %v3472_v48 }
 0x3ca   : > { %v7648_v54 = vpop.f32.mrf.mxu3  ;;  %v4462_v2 = vpop.f32.mrf.mxu2  ;;  %v3603_v32 = vadd.f32 %v7545_v24, %v3469_v28 }
 0x3cc   : > { %v3763_v11 = vadd.f32 %v7551_v4, %v3603_v32 }
 0x3ce   : > { %v3930_v44 = vadd.f32 %v7554_v0, %v3763_v11  ;;  %v3606_v11 = vadd.f32 %v7601_v19, %v3477_v42 }
 0x3cf   : > { %v4344_v41 = vpop.f32.mrf.mxu1  ;;  %v4179_v50 = vpop.f32.mrf.mxu0 }
 0x3d2   : > { %v7654_v57 = vpop.f32.mrf.mxu3  ;;  %v4464_v37 = vpop.f32.mrf.mxu2 }
 0x3d7   : > { %v4346_v43 = vpop.f32.mrf.mxu1  ;;  %v4182_v20 = vpop.f32.mrf.mxu0 }
 0x3da   : > { %v7660_v40 = vpop.f32.mrf.mxu3 }
 0x3df   : > { %v4349_v63 = vpop.f32.mrf.mxu1  ;;  %v4184_v31 = vpop.f32.mrf.mxu0 }
 0x3e2   : > { %v7668_v61 = vpop.f32.mrf.mxu3 }
 0x3e7   : > { %v4351_v4 = vpop.f32.mrf.mxu1 }
 0x3ea   : > { %v7670_v6 = vpop.f32.mrf.mxu3 }
 0x3f2   : > { %v7674_v14 = vpop.f32.mrf.mxu3 }
 0x3f3   : > { %7953 = vst [vmem:[#allocation26_spill] sm:$0xff] %v7674_v14  ;;  %v4467_v14 = vpop.f32.mrf.mxu2 }
 0x3fa   : > { %v4017_v51 = vpop.f32.mrf.mxu3 }
 0x3fb   : > { %v4047_v58 = vadd.f32 %v4017_v51, %v3929_v36  ;;  %v7956_v51 = vld [vmem:[#allocation38_spill] sm:$0xff] }
 0x3fc   : > { %v3474_v36 = vadd.f32 %v3473_v5, %v7956_v51 }
 0x3fd   : > { %v4207_v12 = vadd.f32 %v4177_v46, %v4047_v58  ;;  %v3764_v58 = vadd.f32 %v7571_v3, %v3604_v33  ;;  %v4469_v46 = vpop.f32.mrf.mxu2  ;;  %v4187_v3 = vpop.f32.mrf.mxu0 }
 0x3fe   : > { %v3605_v1 = vadd.f32 %v7588_v62, %v3474_v36 }
 0x3ff   : > { %v4374_v21 = vadd.f32 %v4344_v41, %v4207_v12  ;;  %v3931_v0 = vadd.f32 %v7575_v10, %v3764_v58 }
 0x401   : > { %v4492_v47 = vadd.f32 %v4462_v2, %v4374_v21 }
 0x402   : > { %v4019_v24 = vpop.f32.mrf.mxu3 }
 0x403   : > { %v4504_v18 = vadd.f32 %v7564_v39, %v4492_v47  ;;  %v4048_v28 = vadd.f32 %v4019_v24, %v3930_v44  ;;  %v7958_v24 = vld [vmem:[#allocation40_spill] sm:$0xff] }
 0x404   : > { %v3479_v25 = vadd.f32 %v7640_v7, %v7958_v24 }
 0x405   : > { %4516 = vst [vmem:[%s6962_s27 + $0xc0] sm:$0xff] %v4504_v18  ;;  %v4208_v56 = vadd.f32 %v4179_v50, %v4048_v28  ;;  %v3765_v50 = vadd.f32 %v7592_v8, %v3605_v1  ;;  %v4472_v10 = vpop.f32.mrf.mxu2  ;;  %v3766_v8 = vadd.f32 %v7606_v60, %v3606_v11  ;;  %v4189_v18 = vpop.f32.mrf.mxu0 }
 0x406   : > { %v3607_v19 = vadd.f32 %v7612_v13, %v3479_v25 }
 0x407   : > { %v4375_v32 = vadd.f32 %v4346_v43, %v4208_v56  ;;  %v4354_v43 = vpop.f32.mrf.mxu1 }
 0x408   : > { %v3767_v60 = vadd.f32 %v7614_v45, %v3607_v19 }
 0x409   : > { %v4493_v21 = vadd.f32 %v4464_v37, %v4375_v32  ;;  %v3932_v37 = vadd.f32 %v7595_v30, %v3765_v50  ;;  %v3933_v30 = vadd.f32 %v7609_v27, %v3766_v8  ;;  %v7959_v32 = vld [vmem:[#allocation42_spill] sm:$0xff] }
 0x40a   : > { %v4022_v48 = vpop.f32.mrf.mxu3  ;;  %v3482_v7 = vadd.f32 %v7648_v54, %v7959_v32  ;;  %v3934_v27 = vadd.f32 %v7616_v22, %v3767_v60  ;;  %v3484_v54 = vadd.f32 %v7654_v57, %v7439_v35  ;;  %v3487_v35 = vadd.f32 %v7660_v40, %v7463_v23 }
 0x40b   : > { %v4505_v41 = vadd.f32 %v7564_v39, %v4493_v21  ;;  %v4049_v2 = vadd.f32 %v4022_v48, %v3931_v0  ;;  %v3489_v23 = vadd.f32 %v7668_v61, %v7478_v17  ;;  %v3492_v17 = vadd.f32 %v7670_v6, %v7495_v15  ;;  %v7964_v15 = vld [vmem:[#allocation26_spill] sm:$0xff] }
 0x40c   : > { %v3608_v13 = vadd.f32 %v7620_v59, %v3482_v7  ;;  %v3609_v59 = vadd.f32 %v7626_v16, %v3484_v54  ;;  %v3610_v16 = vadd.f32 %v7634_v34, %v3487_v35  ;;  %v7967_v54 = vld [vmem:[#allocation15_spill] sm:$0xff] }
 0x40d   : > { %4517 = vst [vmem:[%s6962_s27 + $0xc8] sm:$0xff] %v4505_v41  ;;  %v4209_v5 = vadd.f32 %v4182_v20, %v4049_v2  ;;  %v4474_v58 = vpop.f32.mrf.mxu2  ;;  %v4192_v1 = vpop.f32.mrf.mxu0  ;;  %v3611_v34 = vadd.f32 %v7644_v38, %v3489_v23 }
 0x40e   : > { %v3768_v45 = vadd.f32 %v7622_v9, %v3608_v13  ;;  %v3769_v9 = vadd.f32 %v7628_v55, %v3609_v59  ;;  %v3770_v55 = vadd.f32 %v7636_v29, %v3610_v16  ;;  %v7960_v29 = vld [vmem:[#allocation3_spill] sm:$0xff] }
 0x40f   : > { %v4376_v12 = vadd.f32 %v4349_v63, %v4209_v5  ;;  %v4356_v28 = vpop.f32.mrf.mxu1  ;;  %v7963_v13 = vld [vmem:[#allocation43_spill] sm:$0xff] }
 0x410   : > { %v3935_v22 = vadd.f32 %v7624_v26, %v3768_v45  ;;  %v3936_v26 = vadd.f32 %v7632_v53, %v3769_v9  ;;  %v3937_v53 = vadd.f32 %v7638_v49, %v3770_v55  ;;  %v3494_v6 = vadd.f32 %v7964_v15, %v7963_v13 }
 0x411   : > { %v4494_v62 = vadd.f32 %v4467_v14, %v4376_v12 }
 0x412   : > { %v4024_v33 = vpop.f32.mrf.mxu3 }
 0x413   : > { %v4506_v47 = vadd.f32 %v7564_v39, %v4494_v62  ;;  %v4050_v44 = vadd.f32 %v4024_v33, %v3932_v37 }
 0x415   : > { %4518 = vst [vmem:[%s6962_s27 + $0xd0] sm:$0xff] %v4506_v47  ;;  %v4210_v20 = vadd.f32 %v4184_v31, %v4050_v44  ;;  %v4477_v52 = vpop.f32.mrf.mxu2 }
 0x417   : > { %v4377_v63 = vadd.f32 %v4351_v4, %v4210_v20  ;;  %v4359_v41 = vpop.f32.mrf.mxu1 }
 0x419   : > { %v4495_v14 = vadd.f32 %v4469_v46, %v4377_v63 }
 0x41a   : > { %v4027_v51 = vpop.f32.mrf.mxu3 }
 0x41b   : > { %v4507_v36 = vadd.f32 %v7564_v39, %v4495_v14  ;;  %v4051_v56 = vadd.f32 %v4027_v51, %v3933_v30  ;;  %v3771_v30 = vadd.f32 %v7960_v29, %v3611_v34 }
 0x41d   : > { %4519 = vst [vmem:[%s6962_s27 + $0xd8] sm:$0xff] %v4507_v36  ;;  %v4211_v31 = vadd.f32 %v4187_v3, %v4051_v56  ;;  %v4479_v37 = vpop.f32.mrf.mxu2  ;;  %v7961_v36 = vld [vmem:[#allocation7_spill] sm:$0xff] }
 0x41e   : > { %v3612_v38 = vadd.f32 %v7961_v36, %v3492_v17 }
 0x41f   : > { %v4378_v4 = vadd.f32 %v4354_v43, %v4211_v31  ;;  %v4194_v43 = vpop.f32.mrf.mxu0  ;;  %v4361_v11 = vpop.f32.mrf.mxu1 }
 0x421   : > { %v4496_v46 = vadd.f32 %v4472_v10, %v4378_v4 }
 0x422   : > { %v4029_v21 = vpop.f32.mrf.mxu3 }
 0x423   : > { %v4508_v0 = vadd.f32 %v7564_v39, %v4496_v46  ;;  %v4052_v48 = vadd.f32 %v4029_v21, %v3934_v27  ;;  %v7965_v27 = vld [vmem:[#allocation8_spill] sm:$0xff] }
 0x425   : > { %4520 = vst [vmem:[%s6962_s27 + $0xe0] sm:$0xff] %v4508_v0  ;;  %v4212_v2 = vadd.f32 %v4189_v18, %v4052_v48  ;;  %v4482_v63 = vpop.f32.mrf.mxu2  ;;  %v7966_v0 = vld [vmem:[#allocation23_spill] sm:$0xff] }
 0x426   : > { %v3613_v48 = vadd.f32 %v7966_v0, %v3494_v6 }
 0x427   : > { %v4379_v42 = vadd.f32 %v4356_v28, %v4212_v2  ;;  %v4197_v24 = vpop.f32.mrf.mxu0  ;;  %v4364_v20 = vpop.f32.mrf.mxu1 }
 0x429   : > { %v4497_v5 = vadd.f32 %v4474_v58, %v4379_v42  ;;  %v7962_v58 = vld [vmem:[#allocation5_spill] sm:$0xff] }
 0x42a   : > { %v4032_v50 = vpop.f32.mrf.mxu3  ;;  %v3938_v49 = vadd.f32 %v7962_v58, %v3771_v30 }
 0x42b   : > { %v4509_v3 = vadd.f32 %v7564_v39, %v4497_v5  ;;  %v4053_v12 = vadd.f32 %v4032_v50, %v3935_v22  ;;  %v7968_v50 = vld [vmem:[#allocation14_spill] sm:$0xff] }
 0x42d   : > { %4521 = vst [vmem:[%s6962_s27 + $0xe8] sm:$0xff] %v4509_v3  ;;  %v4213_v57 = vadd.f32 %v4192_v1, %v4053_v12  ;;  %v4484_v4 = vpop.f32.mrf.mxu2  ;;  %v3772_v1 = vadd.f32 %v7965_v27, %v3612_v38  ;;  %v3773_v3 = vadd.f32 %v7968_v50, %v3613_v48 }
 0x42f   : > { %v4380_v62 = vadd.f32 %v4359_v41, %v4213_v57  ;;  %v4199_v51 = vpop.f32.mrf.mxu0  ;;  %v4366_v32 = vpop.f32.mrf.mxu1  ;;  %v3939_v2 = vadd.f32 %v7967_v54, %v3772_v1  ;;  %v7969_v57 = vld [vmem:[#allocation12_spill] sm:$0xff] }
 0x430   : > { %v3940_v9 = vadd.f32 %v7969_v57, %v3773_v3 }
 0x431   : > { %v4498_v10 = vadd.f32 %v4477_v52, %v4380_v62 }
 0x432   : > { %v4034_v33 = vpop.f32.mrf.mxu3 }
 0x433   : > { %v4510_v47 = vadd.f32 %v7564_v39, %v4498_v10  ;;  %v4054_v44 = vadd.f32 %v4034_v33, %v3936_v26 }
 0x435   : > { %4522 = vst [vmem:[%s6962_s27 + $0xf0] sm:$0xff] %v4510_v47  ;;  %v4214_v40 = vadd.f32 %v4194_v43, %v4054_v44  ;;  %v4487_v12 = vpop.f32.mrf.mxu2 }
 0x437   : > { %v4381_v25 = vadd.f32 %v4361_v11, %v4214_v40  ;;  %v4202_v45 = vpop.f32.mrf.mxu0  ;;  %v4369_v5 = vpop.f32.mrf.mxu1 }
 0x439   : > { %v4499_v8 = vadd.f32 %v4479_v37, %v4381_v25 }
 0x43a   : > { %v4037_v18 = vpop.f32.mrf.mxu3 }
 0x43b   : > { %v4511_v19 = vadd.f32 %v7564_v39, %v4499_v8  ;;  %v4055_v14 = vadd.f32 %v4037_v18, %v3937_v53 }
 0x43d   : > { %4523 = vst [vmem:[%s6962_s27 + $0xf8] sm:$0xff] %v4511_v19  ;;  %v4215_v61 = vadd.f32 %v4197_v24, %v4055_v14  ;;  %v4489_v47 = vpop.f32.mrf.mxu2 }
 0x43f   : > { %v4382_v28 = vadd.f32 %v4364_v20, %v4215_v61  ;;  %v4204_v16 = vpop.f32.mrf.mxu0  ;;  %v4371_v26 = vpop.f32.mrf.mxu1 }
 0x441   : > { %v4500_v56 = vadd.f32 %v4482_v63, %v4382_v28 }
 0x442   : > { %v4039_v7 = vpop.f32.mrf.mxu3 }
 0x443   : > { %v4512_v31 = vadd.f32 %v7564_v39, %v4500_v56  ;;  %v4056_v60 = vadd.f32 %v4039_v7, %v3938_v49 }
 0x445   : > { %4524 = vst [vmem:[%s6962_s27 + $0x100] sm:$0xff] %v4512_v31  ;;  %v4216_v46 = vadd.f32 %v4199_v51, %v4056_v60 }
 0x447   : > { %v4383_v21 = vadd.f32 %v4366_v32, %v4216_v46 }
 0x449   : > { %v4501_v41 = vadd.f32 %v4484_v4, %v4383_v21 }
 0x44a   : > { %v4042_v52 = vpop.f32.mrf.mxu3 }
 0x44b   : > { %v4513_v42 = vadd.f32 %v7564_v39, %v4501_v41  ;;  %v4057_v59 = vadd.f32 %v4042_v52, %v3939_v2 }
 0x44d   : > { %4525 = vst [vmem:[%s6962_s27 + $0x108] sm:$0xff] %v4513_v42  ;;  %v4217_v22 = vadd.f32 %v4202_v45, %v4057_v59 }
 0x44f   : > { %v4384_v43 = vadd.f32 %v4369_v5, %v4217_v22 }
 0x451   : > { %v4502_v35 = vadd.f32 %v4487_v12, %v4384_v43 }
 0x452   : > { %v4044_v11 = vpop.f32.mrf.mxu3 }
 0x453   : > { %v4514_v62 = vadd.f32 %v7564_v39, %v4502_v35  ;;  %v4058_v37 = vadd.f32 %v4044_v11, %v3940_v9 }
 0x455   : > { %4526 = vst [vmem:[%s6962_s27 + $0x110] sm:$0xff] %v4514_v62  ;;  %v4218_v10 = vadd.f32 %v4204_v16, %v4058_v37 }
 0x457   : > { %v4385_v33 = vadd.f32 %v4371_v26, %v4218_v10 }
 0x459   : > { %v4503_v44 = vadd.f32 %v4489_v47, %v4385_v33 }
 0x45b   : > { %v4515_v23 = vadd.f32 %v7564_v39, %v4503_v44 }
 0x45d   : > { %4527 = vst [vmem:[%s6962_s27 + $0x118] sm:$0xff] %v4515_v23 }
 0x45e PF: > { %s14_s15 = sadd.s32 1, %s5703_s15  }
 0x45f   : > { %p11_p4 = scmp.ge.s32.totalorder %s14_s15, 4  }
 0x461   :  { %13 = sbr.rel (!%p11_p4) target bundleno = 1 (0x1), region = 66 }

</bundles_post_ra>
